<compile_context>
chip_gen: v7x
topology: tpu7x:2x2x1
jax: 0.10.0
libtpu: 0.0.40
codegen_flags: <defaults>
</compile_context>

<pallas_src>
import math
from functools import partial

import jax
import jax.numpy as jnp
import numpy as np
from jax.experimental import pallas as pl
from jax.experimental.pallas import tpu as pltpu

LN_EPS = 1e-5  # torch.nn.LayerNorm default


# ----------------------------------------------------------------------------
# Kernel: one full post-norm transformer encoder layer for Bt batch rows.
# ----------------------------------------------------------------------------
def _encoder_layer_kernel(
    x_ref,            # (Bt, L, N)   input tokens for this batch tile
    wqkv_ref,         # (N, 3N)      fused Q/K/V projection
    bqkv_ref,         # (1, 3N)
    wo_ref,           # (N, N)       attention output projection
    bo_ref,           # (1, N)
    g1_ref, be1_ref,  # (1, N)       LayerNorm 1 gamma / beta
    w1_ref,           # (N, F)       FFN up-projection
    bf1_ref,          # (1, F)
    w2_ref,           # (F, N)       FFN down-projection
    bf2_ref,          # (1, N)
    g2_ref, be2_ref,  # (1, N)       LayerNorm 2 gamma / beta
    out_ref,          # (Bt, L, N)
    *, nhead,
):
    Bt, L, N = x_ref.shape
    dh = N // nhead
    scale = 1.0 / math.sqrt(dh)
    cdt = wqkv_ref.dtype           # native MXU feed dtype (bf16 or f32)
    M = Bt * L

    x2d = x_ref[...].reshape(M, N)             # native dtype for the matmuls
    x_f32 = x2d.astype(jnp.float32)            # f32 only for residual / LN stats

    # ---- fused QKV projection over all Bt*L rows (f32 MXU accumulation) -----
    qkv = jnp.dot(x2d.astype(cdt), wqkv_ref[...],
                  preferred_element_type=jnp.float32)
    qkv = qkv + bqkv_ref[...].astype(jnp.float32)            # (M, 3N) f32

    # ---- per-row, per-head attention; out-proj accumulated per head ---------
    # (no lane-axis concat of heads; each head stays lane-local.)
    row_outs = []
    for b in range(Bt):
        r0 = b * L
        qkv_b = qkv[r0:r0 + L, :]                            # (L, 3N)
        acc_b = jnp.zeros((L, N), jnp.float32)
        for h in range(nhead):
            c0 = h * dh
            q = qkv_b[:, c0:c0 + dh].astype(cdt)             # (L, dh)
            k = qkv_b[:, N + c0:N + c0 + dh].astype(cdt)     # (L, dh)
            v = qkv_b[:, 2 * N + c0:2 * N + c0 + dh].astype(cdt)

            s = jnp.einsum('ld,md->lm', q, k,
                           preferred_element_type=jnp.float32) * scale
            s = s - jnp.max(s, axis=-1, keepdims=True)
            e = jnp.exp(s)                                   # EUP
            inv = pl.reciprocal(jnp.sum(e, axis=-1, keepdims=True), approx=True)
            p = (e * inv).astype(cdt)                        # softmax probs
            o = jnp.dot(p, v, preferred_element_type=jnp.float32)       # (L, dh)
            acc_b = acc_b + jnp.dot(o.astype(cdt), wo_ref[c0:c0 + dh, :],
                                    preferred_element_type=jnp.float32)  # (L, N)
        row_outs.append(acc_b)
    attn = row_outs[0] if Bt == 1 else jnp.concatenate(row_outs, axis=0)
    attn = attn + bo_ref[...].astype(jnp.float32)            # (M, N) f32

    # ---- residual + LayerNorm 1 (f32 statistics) -----------------------------
    x1 = x_f32 + attn
    mu = jnp.mean(x1, axis=-1, keepdims=True)
    var = jnp.mean((x1 - mu) ** 2, axis=-1, keepdims=True)
    x1 = (x1 - mu) * jax.lax.rsqrt(var + LN_EPS)
    x1 = x1 * g1_ref[...].astype(jnp.float32) + be1_ref[...].astype(jnp.float32)

    # ---- feed-forward (relu), native-dtype MXU feeds, f32 accumulation ------
    h1 = jnp.dot(x1.astype(cdt), w1_ref[...], preferred_element_type=jnp.float32)
    h1 = jnp.maximum(h1 + bf1_ref[...].astype(jnp.float32), 0.0)
    ff = jnp.dot(h1.astype(cdt), w2_ref[...], preferred_element_type=jnp.float32)
    ff = ff + bf2_ref[...].astype(jnp.float32)

    # ---- residual + LayerNorm 2 ----------------------------------------------
    x2 = x1 + ff
    mu2 = jnp.mean(x2, axis=-1, keepdims=True)
    var2 = jnp.mean((x2 - mu2) ** 2, axis=-1, keepdims=True)
    y = (x2 - mu2) * jax.lax.rsqrt(var2 + LN_EPS)
    y = y * g2_ref[...].astype(jnp.float32) + be2_ref[...].astype(jnp.float32)

    out_ref[...] = y.reshape(Bt, L, N).astype(out_ref.dtype)


# ----------------------------------------------------------------------------
# Wrapper: one pallas_call per encoder layer, gridded over batch tiles.
# ----------------------------------------------------------------------------
_WEIGHT_KEYS = ('wqkv', 'bqkv', 'wo', 'bo', 'g1', 'be1',
                'w1', 'bf1', 'w2', 'bf2', 'g2', 'be2')


def _choose_bt(B, L, N, d_ffn):
    """Fold enough batch rows per grid step to get Bt*L toward ~256 MXU rows,
    bounded by an ~8 MiB per-step f32 activation budget."""
    bt = max(1, min(B, -(-256 // L)))                       # ceil(256 / L)
    row_f32_bytes = 4 * (3 * N + 4 * N + d_ffn)             # rough per-row intermediates
    cap = max(1, (8 * 1024 * 1024) // max(1, L * row_f32_bytes))
    bt = max(1, min(bt, cap, B))
    while B % bt:
        bt -= 1
    return max(1, bt)


def _encoder_layer_call(x, p, *, nhead, bt, single_buffer_weights):
    B, L, N = x.shape
    F_ = p['w1'].shape[1]
    itemsize = jnp.dtype(x.dtype).itemsize
    args = [p[k] for k in _WEIGHT_KEYS]

    # weight / bias specs: constant block index -> stay VMEM-resident.
    # Single-buffer them (they never change) to halve their VMEM footprint.
    def _const_spec(shape):
        if single_buffer_weights:
            return pl.BlockSpec(shape, lambda b: (0, 0),
                                pipeline_mode=pl.Buffered(1))
        return pl.BlockSpec(shape, lambda b: (0, 0))

    weight_shapes = [(N, 3 * N), (1, 3 * N), (N, N), (1, N), (1, N), (1, N),
                     (N, F_), (1, F_), (F_, N), (1, N), (1, N), (1, N)]
    w_specs = [_const_spec(s) for s in weight_shapes]

    grid_spec = pltpu.PrefetchScalarGridSpec(
        num_scalar_prefetch=0,
        grid=(B // bt,),
        in_specs=[pl.BlockSpec((bt, L, N), lambda b: (b, 0, 0))] + w_specs,
        out_specs=pl.BlockSpec((bt, L, N), lambda b: (b, 0, 0)),
    )

    # Advisory cost estimate for XLA's scheduler.
    flops = int(B * (2 * L * N * 3 * N + 2 * L * N * N
                     + 4 * L * L * N + 4 * L * N * F_))
    transcendentals = int(B * (nhead * L * L + 2 * L))
    wbytes = int(sum(a.size * a.dtype.itemsize for a in args))
    bytes_accessed = int(2 * B * L * N * itemsize + wbytes)

    # Generation-aware scoped VMEM: derived from the working set, capped so it
    # also fits v7x's 64 MiB physical VMEM (v5e/v6e have 128 MiB to spare).
    act_bytes = int(bt * L * (2 * N * itemsize + 4 * (3 * N + 4 * N + F_)))
    vmem_limit = int(min(64 * 1024 * 1024,
                         max(32 * 1024 * 1024,
                             2 * wbytes + 3 * act_bytes + (2 << 20))))

    return pl.pallas_call(
        partial(_encoder_layer_kernel, nhead=nhead),
        out_shape=jax.ShapeDtypeStruct((B, L, N), x.dtype),
        grid_spec=grid_spec,
        compiler_params=pltpu.CompilerParams(
            dimension_semantics=("parallel",),   # batch tiles split across TCs
            vmem_limit_bytes=vmem_limit,
        ),
        cost_estimate=pl.CostEstimate(
            flops=flops,
            transcendentals=transcendentals,
            bytes_accessed=bytes_accessed,
        ),
    )(x, *args)


def _encoder_layer(x, p, *, nhead, bt):
    try:
        return _encoder_layer_call(x, p, nhead=nhead, bt=bt,
                                   single_buffer_weights=True)
    except Exception:
        # pipeline_mode=pl.Buffered(1) unsupported on this jax build -> fall
        # back to default double-buffered weight specs (semantics identical).
        return _encoder_layer_call(x, p, nhead=nhead, bt=bt,
                                   single_buffer_weights=False)


def _positional_encoding(L, N, dtype):
    """Sinusoidal PE, identical construction to the PyTorch PositionalEncoding."""
    position = jnp.arange(L, dtype=jnp.float32)[:, None]
    div_term = jnp.exp(jnp.arange(0, N, 2, dtype=jnp.float32)
                       * (-math.log(10000.0) / N))
    pe = jnp.zeros((L, N), jnp.float32)
    pe = pe.at[:, 0::2].set(jnp.sin(position * div_term))
    pe = pe.at[:, 1::2].set(jnp.cos(position * div_term))
    return pe[None].astype(dtype)                       # (1, L, N)


def sb_transformer_block(x, layer_params, *, nhead,
                         use_positional_encoding=False, compute_dtype=None):
    """Equivalent of SBTransformerBlock.forward: x [B, L, N] -> [B, L, N].

    compute_dtype (e.g. jnp.bfloat16) selects the MXU feed precision for the
    big matmuls; accumulation, LayerNorm and softmax statistics stay in f32.
    """
    # TODO(synk): train-mode dropout and src/key-padding attention masks are
    # not implemented (the reference forward uses dropout=0.0 and no masks).
    B, L, N = x.shape
    if use_positional_encoding:
        x = x + _positional_encoding(L, N, x.dtype)
    if compute_dtype is not None:
        x = x.astype(compute_dtype)
    bt = _choose_bt(B, L, N, layer_params[0]['w1'].shape[1])
    for p in layer_params:
        if compute_dtype is not None:
            p = dict(p,
                     wqkv=p['wqkv'].astype(compute_dtype),
                     wo=p['wo'].astype(compute_dtype),
                     w1=p['w1'].astype(compute_dtype),
                     w2=p['w2'].astype(compute_dtype))
        x = _encoder_layer(x, p, nhead=nhead, bt=bt)
    return x


# ----------------------------------------------------------------------------
# Pure-JAX reference (mirrors the PyTorch post-norm encoder layer math).
# ----------------------------------------------------------------------------
def _layer_norm_ref(x, g, b):
    mu = jnp.mean(x, axis=-1, keepdims=True)
    var = jnp.mean((x - mu) ** 2, axis=-1, keepdims=True)
    return (x - mu) * jax.lax.rsqrt(var + LN_EPS) * g + b


def _sb_transformer_ref(x, layer_params, *, nhead, use_positional_encoding=False):
    x = x.astype(jnp.float32)
    if use_positional_encoding:
        x = x + _positional_encoding(x.shape[1], x.shape[2], jnp.float32)
    B, L, N = x.shape
    dh = N // nhead
    for p in layer_params:
        qkv = x @ p['wqkv'] + p['bqkv']
        q, k, v = qkv[..., :N], qkv[..., N:2 * N], qkv[..., 2 * N:]
        split = lambda t: t.reshape(B, L, nhead, dh).transpose(0, 2, 1, 3)
        q, k, v = split(q), split(k), split(v)
        s = jnp.einsum('bhld,bhmd->bhlm', q, k) / math.sqrt(dh)
        a = jax.nn.softmax(s, axis=-1)
        o = jnp.einsum('bhlm,bhmd->bhld', a, v).transpose(0, 2, 1, 3).reshape(B, L, N)
        x1 = _layer_norm_ref(x + (o @ p['wo'] + p['bo']), p['g1'], p['be1'])
        h = jax.nn.relu(x1 @ p['w1'] + p['bf1'])
        x = _layer_norm_ref(x1 + (h @ p['w2'] + p['bf2']), p['g2'], p['be2'])
    return x


# ----------------------------------------------------------------------------
# Demo / self-check
# ----------------------------------------------------------------------------
def _init_layer_params(key, num_layers, d_model, nhead, d_ffn):
    layers = []
    for _ in range(num_layers):
        key, *ks = jax.random.split(key, 9)
        s_m = 1.0 / math.sqrt(d_model)
        s_f = 1.0 / math.sqrt(d_ffn)
        layers.append(dict(
            wqkv=jax.random.normal(ks[0], (d_model, 3 * d_model), jnp.float32) * s_m,
            bqkv=jax.random.normal(ks[1], (1, 3 * d_model), jnp.float32) * 0.02,
            wo=jax.random.normal(ks[2], (d_model, d_model), jnp.float32) * s_m,
            bo=jax.random.normal(ks[3], (1, d_model), jnp.float32) * 0.02,
            g1=jnp.ones((1, d_model), jnp.float32),
            be1=jnp.zeros((1, d_model), jnp.float32),
            w1=jax.random.normal(ks[4], (d_model, d_ffn), jnp.float32) * s_m,
            bf1=jax.random.normal(ks[5], (1, d_ffn), jnp.float32) * 0.02,
            w2=jax.random.normal(ks[6], (d_ffn, d_model), jnp.float32) * s_f,
            bf2=jax.random.normal(ks[7], (1, d_model), jnp.float32) * 0.02,
            g2=jnp.ones((1, d_model), jnp.float32),
            be2=jnp.zeros((1, d_model), jnp.float32),
        ))
    return layers


if __name__ == "__main__":
    # Small, module-consistent shapes:
    #   SBTransformerBlock(num_layers=2, d_model=32, nhead=4, d_ffn=64)
    #   input x: [B=2, L=16, N=32]
    B, L, N = 2, 16, 32
    num_layers, nhead, d_ffn = 2, 4, 64

    key = jax.random.PRNGKey(0)
    k_x, k_p = jax.random.split(key)
    x = jax.random.normal(k_x, (B, L, N), dtype=jnp.float32)
    params = _init_layer_params(k_p, num_layers, N, nhead, d_ffn)

    out = jax.block_until_ready(
        sb_transformer_block(x, params, nhead=nhead,
                             use_positional_encoding=False))
    expected = jax.block_until_ready(
        _sb_transformer_ref(x, params, nhead=nhead,
                            use_positional_encoding=False))

    # Tolerance accommodates the EUP approx-reciprocal softmax denominator.
    np.testing.assert_allclose(np.asarray(out), np.asarray(expected),
                               rtol=1e-2, atol=1e-2)
    assert out.shape == (B, L, N)

    # bf16 MXU-feed path (production precision): smoke test that the
    # low-precision lowering compiles and produces finite outputs.
    out_bf16 = jax.block_until_ready(
        sb_transformer_block(x, params, nhead=nhead,
                             compute_dtype=jnp.bfloat16))
    assert out_bf16.shape == (B, L, N)
    assert np.all(np.isfinite(np.asarray(out_bf16.astype(jnp.float32))))

    print("KERNEL_OK")
</pallas_src>

<mosaic_0001>
module attributes {stable_mosaic.version = 11 : i64} {
  func.func @_encoder_layer_kernel(%arg0: i32, %arg1: memref<2x16x32xf32, #tpu.memory_space<vmem>>, %arg2: memref<32x96xf32, #tpu.memory_space<vmem>>, %arg3: memref<1x96xf32, #tpu.memory_space<vmem>>, %arg4: memref<32x32xf32, #tpu.memory_space<vmem>>, %arg5: memref<1x32xf32, #tpu.memory_space<vmem>>, %arg6: memref<1x32xf32, #tpu.memory_space<vmem>>, %arg7: memref<1x32xf32, #tpu.memory_space<vmem>>, %arg8: memref<32x64xf32, #tpu.memory_space<vmem>>, %arg9: memref<1x64xf32, #tpu.memory_space<vmem>>, %arg10: memref<64x32xf32, #tpu.memory_space<vmem>>, %arg11: memref<1x32xf32, #tpu.memory_space<vmem>>, %arg12: memref<1x32xf32, #tpu.memory_space<vmem>>, %arg13: memref<1x32xf32, #tpu.memory_space<vmem>>, %arg14: memref<2x16x32xf32, #tpu.memory_space<vmem>>) attributes {dimension_semantics = [#tpu.dimension_semantics<parallel>], iteration_bounds = array<i64: 1>, scalar_prefetch = 0 : i64, scratch_operands = 0 : i64, tpu.core_type = #tpu.core_type<tc>, window_params = [{transform_indices = @transform_0, window_bounds = array<i64: 2, 16, 32>}, {pipeline_mode = #tpu.pipeline_mode<synchronous>, transform_indices = @transform_1, window_bounds = array<i64: 32, 96>}, {pipeline_mode = #tpu.pipeline_mode<synchronous>, transform_indices = @transform_2, window_bounds = array<i64: 1, 96>}, {pipeline_mode = #tpu.pipeline_mode<synchronous>, transform_indices = @transform_3, window_bounds = array<i64: 32, 32>}, {pipeline_mode = #tpu.pipeline_mode<synchronous>, transform_indices = @transform_4, window_bounds = array<i64: 1, 32>}, {pipeline_mode = #tpu.pipeline_mode<synchronous>, transform_indices = @transform_5, window_bounds = array<i64: 1, 32>}, {pipeline_mode = #tpu.pipeline_mode<synchronous>, transform_indices = @transform_6, window_bounds = array<i64: 1, 32>}, {pipeline_mode = #tpu.pipeline_mode<synchronous>, transform_indices = @transform_7, window_bounds = array<i64: 32, 64>}, {pipeline_mode = #tpu.pipeline_mode<synchronous>, transform_indices = @transform_8, window_bounds = array<i64: 1, 64>}, {pipeline_mode = #tpu.pipeline_mode<synchronous>, transform_indices = @transform_9, window_bounds = array<i64: 64, 32>}, {pipeline_mode = #tpu.pipeline_mode<synchronous>, transform_indices = @transform_10, window_bounds = array<i64: 1, 32>}, {pipeline_mode = #tpu.pipeline_mode<synchronous>, transform_indices = @transform_11, window_bounds = array<i64: 1, 32>}, {pipeline_mode = #tpu.pipeline_mode<synchronous>, transform_indices = @transform_12, window_bounds = array<i64: 1, 32>}, {transform_indices = @transform_13, window_bounds = array<i64: 2, 16, 32>}]} {
    %c0 = arith.constant 0 : index
    %c0_0 = arith.constant 0 : index
    %c0_1 = arith.constant 0 : index
    %0 = vector.load %arg1[%c0, %c0_0, %c0_1] : memref<2x16x32xf32, #tpu.memory_space<vmem>>, vector<2x16x32xf32>
    %1 = vector.shape_cast %0 : vector<2x16x32xf32> to vector<32x32xf32>
    %c0_2 = arith.constant 0 : index
    %c0_3 = arith.constant 0 : index
    %2 = vector.load %arg2[%c0_2, %c0_3] : memref<32x96xf32, #tpu.memory_space<vmem>>, vector<32x96xf32>
    %cst = arith.constant dense<0.000000e+00> : vector<32x96xf32>
    %3 = tpu.matmul %1, %2, %cst {dimension_numbers = #tpu.dot_dimension_numbers<[1], [0], [0], [1], [0, 0, 1, 1], [], []>} : vector<32x32xf32>, vector<32x96xf32>, vector<32x96xf32> -> vector<32x96xf32>
    %c0_4 = arith.constant 0 : index
    %c0_5 = arith.constant 0 : index
    %4 = vector.load %arg3[%c0_4, %c0_5] : memref<1x96xf32, #tpu.memory_space<vmem>>, vector<1x96xf32>
    %5 = vector.broadcast %4 : vector<1x96xf32> to vector<32x96xf32>
    %6 = arith.addf %3, %5 : vector<32x96xf32>
    %7 = vector.extract_strided_slice %6 {offsets = [0, 0], sizes = [16, 96], strides = [1, 1]} : vector<32x96xf32> to vector<16x96xf32>
    %cst_6 = arith.constant 0.000000e+00 : f32
    %8 = vector.broadcast %cst_6 : f32 to vector<16x32xf32>
    %9 = vector.extract_strided_slice %7 {offsets = [0, 0], sizes = [16, 8], strides = [1, 1]} : vector<16x96xf32> to vector<16x8xf32>
    %10 = vector.extract_strided_slice %7 {offsets = [0, 32], sizes = [16, 8], strides = [1, 1]} : vector<16x96xf32> to vector<16x8xf32>
    %11 = vector.extract_strided_slice %7 {offsets = [0, 64], sizes = [16, 8], strides = [1, 1]} : vector<16x96xf32> to vector<16x8xf32>
    "tpu.trace_start"() <{level = 10 : i32, message = "ld,md->lm"}> : () -> ()
    %cst_7 = arith.constant dense<0.000000e+00> : vector<16x16xf32>
    %12 = tpu.matmul %9, %10, %cst_7 {dimension_numbers = #tpu.dot_dimension_numbers<[1], [1], [0], [0], [0, 0, 1, 0], [], []>} : vector<16x8xf32>, vector<16x8xf32>, vector<16x16xf32> -> vector<16x16xf32>
    "tpu.trace_stop"() : () -> ()
    %cst_8 = arith.constant 0.353553385 : f32
    %13 = vector.broadcast %cst_8 : f32 to vector<16x16xf32>
    %14 = arith.mulf %12, %13 : vector<16x16xf32>
    %cst_9 = arith.constant dense<0xFF800000> : vector<16xf32>
    %15 = vector.multi_reduction <maximumf>, %14, %cst_9 [1] : vector<16x16xf32> to vector<16xf32>
    %16 = vector.shape_cast %15 : vector<16xf32> to vector<16x1xf32>
    %17 = vector.broadcast %16 : vector<16x1xf32> to vector<16x16xf32>
    %18 = arith.subf %14, %17 : vector<16x16xf32>
    %19 = math.exp %18 : vector<16x16xf32>
    %cst_10 = arith.constant dense<0.000000e+00> : vector<16xf32>
    %20 = vector.multi_reduction <add>, %19, %cst_10 [1] : vector<16x16xf32> to vector<16xf32>
    %21 = vector.shape_cast %20 : vector<16xf32> to vector<16x1xf32>
    %22 = tpu.reciprocal %21 {approx = true} : vector<16x1xf32> -> vector<16x1xf32>
    %23 = vector.broadcast %22 : vector<16x1xf32> to vector<16x16xf32>
    %24 = arith.mulf %19, %23 : vector<16x16xf32>
    %cst_11 = arith.constant dense<0.000000e+00> : vector<16x8xf32>
    %25 = tpu.matmul %24, %11, %cst_11 {dimension_numbers = #tpu.dot_dimension_numbers<[1], [0], [0], [1], [0, 0, 1, 1], [], []>} : vector<16x16xf32>, vector<16x8xf32>, vector<16x8xf32> -> vector<16x8xf32>
    %c0_12 = arith.constant 0 : index
    %c0_13 = arith.constant 0 : index
    %26 = vector.load %arg4[%c0_12, %c0_13] : memref<32x32xf32, #tpu.memory_space<vmem>>, vector<8x32xf32>
    %cst_14 = arith.constant dense<0.000000e+00> : vector<16x32xf32>
    %27 = tpu.matmul %25, %26, %cst_14 {dimension_numbers = #tpu.dot_dimension_numbers<[1], [0], [0], [1], [0, 0, 1, 1], [], []>} : vector<16x8xf32>, vector<8x32xf32>, vector<16x32xf32> -> vector<16x32xf32>
    %28 = arith.addf %8, %27 : vector<16x32xf32>
    %29 = vector.extract_strided_slice %7 {offsets = [0, 8], sizes = [16, 8], strides = [1, 1]} : vector<16x96xf32> to vector<16x8xf32>
    %30 = vector.extract_strided_slice %7 {offsets = [0, 40], sizes = [16, 8], strides = [1, 1]} : vector<16x96xf32> to vector<16x8xf32>
    %31 = vector.extract_strided_slice %7 {offsets = [0, 72], sizes = [16, 8], strides = [1, 1]} : vector<16x96xf32> to vector<16x8xf32>
    "tpu.trace_start"() <{level = 10 : i32, message = "ld,md->lm"}> : () -> ()
    %cst_15 = arith.constant dense<0.000000e+00> : vector<16x16xf32>
    %32 = tpu.matmul %29, %30, %cst_15 {dimension_numbers = #tpu.dot_dimension_numbers<[1], [1], [0], [0], [0, 0, 1, 0], [], []>} : vector<16x8xf32>, vector<16x8xf32>, vector<16x16xf32> -> vector<16x16xf32>
    "tpu.trace_stop"() : () -> ()
    %cst_16 = arith.constant 0.353553385 : f32
    %33 = vector.broadcast %cst_16 : f32 to vector<16x16xf32>
    %34 = arith.mulf %32, %33 : vector<16x16xf32>
    %cst_17 = arith.constant dense<0xFF800000> : vector<16xf32>
    %35 = vector.multi_reduction <maximumf>, %34, %cst_17 [1] : vector<16x16xf32> to vector<16xf32>
    %36 = vector.shape_cast %35 : vector<16xf32> to vector<16x1xf32>
    %37 = vector.broadcast %36 : vector<16x1xf32> to vector<16x16xf32>
    %38 = arith.subf %34, %37 : vector<16x16xf32>
    %39 = math.exp %38 : vector<16x16xf32>
    %cst_18 = arith.constant dense<0.000000e+00> : vector<16xf32>
    %40 = vector.multi_reduction <add>, %39, %cst_18 [1] : vector<16x16xf32> to vector<16xf32>
    %41 = vector.shape_cast %40 : vector<16xf32> to vector<16x1xf32>
    %42 = tpu.reciprocal %41 {approx = true} : vector<16x1xf32> -> vector<16x1xf32>
    %43 = vector.broadcast %42 : vector<16x1xf32> to vector<16x16xf32>
    %44 = arith.mulf %39, %43 : vector<16x16xf32>
    %cst_19 = arith.constant dense<0.000000e+00> : vector<16x8xf32>
    %45 = tpu.matmul %44, %31, %cst_19 {dimension_numbers = #tpu.dot_dimension_numbers<[1], [0], [0], [1], [0, 0, 1, 1], [], []>} : vector<16x16xf32>, vector<16x8xf32>, vector<16x8xf32> -> vector<16x8xf32>
    %c8 = arith.constant 8 : index
    %c0_20 = arith.constant 0 : index
    %46 = vector.load %arg4[%c8, %c0_20] : memref<32x32xf32, #tpu.memory_space<vmem>>, vector<8x32xf32>
    %cst_21 = arith.constant dense<0.000000e+00> : vector<16x32xf32>
    %47 = tpu.matmul %45, %46, %cst_21 {dimension_numbers = #tpu.dot_dimension_numbers<[1], [0], [0], [1], [0, 0, 1, 1], [], []>} : vector<16x8xf32>, vector<8x32xf32>, vector<16x32xf32> -> vector<16x32xf32>
    %48 = arith.addf %28, %47 : vector<16x32xf32>
    %49 = vector.extract_strided_slice %7 {offsets = [0, 16], sizes = [16, 8], strides = [1, 1]} : vector<16x96xf32> to vector<16x8xf32>
    %50 = vector.extract_strided_slice %7 {offsets = [0, 48], sizes = [16, 8], strides = [1, 1]} : vector<16x96xf32> to vector<16x8xf32>
    %51 = vector.extract_strided_slice %7 {offsets = [0, 80], sizes = [16, 8], strides = [1, 1]} : vector<16x96xf32> to vector<16x8xf32>
    "tpu.trace_start"() <{level = 10 : i32, message = "ld,md->lm"}> : () -> ()
    %cst_22 = arith.constant dense<0.000000e+00> : vector<16x16xf32>
    %52 = tpu.matmul %49, %50, %cst_22 {dimension_numbers = #tpu.dot_dimension_numbers<[1], [1], [0], [0], [0, 0, 1, 0], [], []>} : vector<16x8xf32>, vector<16x8xf32>, vector<16x16xf32> -> vector<16x16xf32>
    "tpu.trace_stop"() : () -> ()
    %cst_23 = arith.constant 0.353553385 : f32
    %53 = vector.broadcast %cst_23 : f32 to vector<16x16xf32>
    %54 = arith.mulf %52, %53 : vector<16x16xf32>
    %cst_24 = arith.constant dense<0xFF800000> : vector<16xf32>
    %55 = vector.multi_reduction <maximumf>, %54, %cst_24 [1] : vector<16x16xf32> to vector<16xf32>
    %56 = vector.shape_cast %55 : vector<16xf32> to vector<16x1xf32>
    %57 = vector.broadcast %56 : vector<16x1xf32> to vector<16x16xf32>
    %58 = arith.subf %54, %57 : vector<16x16xf32>
    %59 = math.exp %58 : vector<16x16xf32>
    %cst_25 = arith.constant dense<0.000000e+00> : vector<16xf32>
    %60 = vector.multi_reduction <add>, %59, %cst_25 [1] : vector<16x16xf32> to vector<16xf32>
    %61 = vector.shape_cast %60 : vector<16xf32> to vector<16x1xf32>
    %62 = tpu.reciprocal %61 {approx = true} : vector<16x1xf32> -> vector<16x1xf32>
    %63 = vector.broadcast %62 : vector<16x1xf32> to vector<16x16xf32>
    %64 = arith.mulf %59, %63 : vector<16x16xf32>
    %cst_26 = arith.constant dense<0.000000e+00> : vector<16x8xf32>
    %65 = tpu.matmul %64, %51, %cst_26 {dimension_numbers = #tpu.dot_dimension_numbers<[1], [0], [0], [1], [0, 0, 1, 1], [], []>} : vector<16x16xf32>, vector<16x8xf32>, vector<16x8xf32> -> vector<16x8xf32>
    %c16 = arith.constant 16 : index
    %c0_27 = arith.constant 0 : index
    %66 = vector.load %arg4[%c16, %c0_27] : memref<32x32xf32, #tpu.memory_space<vmem>>, vector<8x32xf32>
    %cst_28 = arith.constant dense<0.000000e+00> : vector<16x32xf32>
    %67 = tpu.matmul %65, %66, %cst_28 {dimension_numbers = #tpu.dot_dimension_numbers<[1], [0], [0], [1], [0, 0, 1, 1], [], []>} : vector<16x8xf32>, vector<8x32xf32>, vector<16x32xf32> -> vector<16x32xf32>
    %68 = arith.addf %48, %67 : vector<16x32xf32>
    %69 = vector.extract_strided_slice %7 {offsets = [0, 24], sizes = [16, 8], strides = [1, 1]} : vector<16x96xf32> to vector<16x8xf32>
    %70 = vector.extract_strided_slice %7 {offsets = [0, 56], sizes = [16, 8], strides = [1, 1]} : vector<16x96xf32> to vector<16x8xf32>
    %71 = vector.extract_strided_slice %7 {offsets = [0, 88], sizes = [16, 8], strides = [1, 1]} : vector<16x96xf32> to vector<16x8xf32>
    "tpu.trace_start"() <{level = 10 : i32, message = "ld,md->lm"}> : () -> ()
    %cst_29 = arith.constant dense<0.000000e+00> : vector<16x16xf32>
    %72 = tpu.matmul %69, %70, %cst_29 {dimension_numbers = #tpu.dot_dimension_numbers<[1], [1], [0], [0], [0, 0, 1, 0], [], []>} : vector<16x8xf32>, vector<16x8xf32>, vector<16x16xf32> -> vector<16x16xf32>
    "tpu.trace_stop"() : () -> ()
    %cst_30 = arith.constant 0.353553385 : f32
    %73 = vector.broadcast %cst_30 : f32 to vector<16x16xf32>
    %74 = arith.mulf %72, %73 : vector<16x16xf32>
    %cst_31 = arith.constant dense<0xFF800000> : vector<16xf32>
    %75 = vector.multi_reduction <maximumf>, %74, %cst_31 [1] : vector<16x16xf32> to vector<16xf32>
    %76 = vector.shape_cast %75 : vector<16xf32> to vector<16x1xf32>
    %77 = vector.broadcast %76 : vector<16x1xf32> to vector<16x16xf32>
    %78 = arith.subf %74, %77 : vector<16x16xf32>
    %79 = math.exp %78 : vector<16x16xf32>
    %cst_32 = arith.constant dense<0.000000e+00> : vector<16xf32>
    %80 = vector.multi_reduction <add>, %79, %cst_32 [1] : vector<16x16xf32> to vector<16xf32>
    %81 = vector.shape_cast %80 : vector<16xf32> to vector<16x1xf32>
    %82 = tpu.reciprocal %81 {approx = true} : vector<16x1xf32> -> vector<16x1xf32>
    %83 = vector.broadcast %82 : vector<16x1xf32> to vector<16x16xf32>
    %84 = arith.mulf %79, %83 : vector<16x16xf32>
    %cst_33 = arith.constant dense<0.000000e+00> : vector<16x8xf32>
    %85 = tpu.matmul %84, %71, %cst_33 {dimension_numbers = #tpu.dot_dimension_numbers<[1], [0], [0], [1], [0, 0, 1, 1], [], []>} : vector<16x16xf32>, vector<16x8xf32>, vector<16x8xf32> -> vector<16x8xf32>
    %c24 = arith.constant 24 : index
    %c0_34 = arith.constant 0 : index
    %86 = vector.load %arg4[%c24, %c0_34] : memref<32x32xf32, #tpu.memory_space<vmem>>, vector<8x32xf32>
    %cst_35 = arith.constant dense<0.000000e+00> : vector<16x32xf32>
    %87 = tpu.matmul %85, %86, %cst_35 {dimension_numbers = #tpu.dot_dimension_numbers<[1], [0], [0], [1], [0, 0, 1, 1], [], []>} : vector<16x8xf32>, vector<8x32xf32>, vector<16x32xf32> -> vector<16x32xf32>
    %88 = arith.addf %68, %87 : vector<16x32xf32>
    %89 = vector.extract_strided_slice %6 {offsets = [16, 0], sizes = [16, 96], strides = [1, 1]} : vector<32x96xf32> to vector<16x96xf32>
    %cst_36 = arith.constant 0.000000e+00 : f32
    %90 = vector.broadcast %cst_36 : f32 to vector<16x32xf32>
    %91 = vector.extract_strided_slice %89 {offsets = [0, 0], sizes = [16, 8], strides = [1, 1]} : vector<16x96xf32> to vector<16x8xf32>
    %92 = vector.extract_strided_slice %89 {offsets = [0, 32], sizes = [16, 8], strides = [1, 1]} : vector<16x96xf32> to vector<16x8xf32>
    %93 = vector.extract_strided_slice %89 {offsets = [0, 64], sizes = [16, 8], strides = [1, 1]} : vector<16x96xf32> to vector<16x8xf32>
    "tpu.trace_start"() <{level = 10 : i32, message = "ld,md->lm"}> : () -> ()
    %cst_37 = arith.constant dense<0.000000e+00> : vector<16x16xf32>
    %94 = tpu.matmul %91, %92, %cst_37 {dimension_numbers = #tpu.dot_dimension_numbers<[1], [1], [0], [0], [0, 0, 1, 0], [], []>} : vector<16x8xf32>, vector<16x8xf32>, vector<16x16xf32> -> vector<16x16xf32>
    "tpu.trace_stop"() : () -> ()
    %cst_38 = arith.constant 0.353553385 : f32
    %95 = vector.broadcast %cst_38 : f32 to vector<16x16xf32>
    %96 = arith.mulf %94, %95 : vector<16x16xf32>
    %cst_39 = arith.constant dense<0xFF800000> : vector<16xf32>
    %97 = vector.multi_reduction <maximumf>, %96, %cst_39 [1] : vector<16x16xf32> to vector<16xf32>
    %98 = vector.shape_cast %97 : vector<16xf32> to vector<16x1xf32>
    %99 = vector.broadcast %98 : vector<16x1xf32> to vector<16x16xf32>
    %100 = arith.subf %96, %99 : vector<16x16xf32>
    %101 = math.exp %100 : vector<16x16xf32>
    %cst_40 = arith.constant dense<0.000000e+00> : vector<16xf32>
    %102 = vector.multi_reduction <add>, %101, %cst_40 [1] : vector<16x16xf32> to vector<16xf32>
    %103 = vector.shape_cast %102 : vector<16xf32> to vector<16x1xf32>
    %104 = tpu.reciprocal %103 {approx = true} : vector<16x1xf32> -> vector<16x1xf32>
    %105 = vector.broadcast %104 : vector<16x1xf32> to vector<16x16xf32>
    %106 = arith.mulf %101, %105 : vector<16x16xf32>
    %cst_41 = arith.constant dense<0.000000e+00> : vector<16x8xf32>
    %107 = tpu.matmul %106, %93, %cst_41 {dimension_numbers = #tpu.dot_dimension_numbers<[1], [0], [0], [1], [0, 0, 1, 1], [], []>} : vector<16x16xf32>, vector<16x8xf32>, vector<16x8xf32> -> vector<16x8xf32>
    %c0_42 = arith.constant 0 : index
    %c0_43 = arith.constant 0 : index
    %108 = vector.load %arg4[%c0_42, %c0_43] : memref<32x32xf32, #tpu.memory_space<vmem>>, vector<8x32xf32>
    %cst_44 = arith.constant dense<0.000000e+00> : vector<16x32xf32>
    %109 = tpu.matmul %107, %108, %cst_44 {dimension_numbers = #tpu.dot_dimension_numbers<[1], [0], [0], [1], [0, 0, 1, 1], [], []>} : vector<16x8xf32>, vector<8x32xf32>, vector<16x32xf32> -> vector<16x32xf32>
    %110 = arith.addf %90, %109 : vector<16x32xf32>
    %111 = vector.extract_strided_slice %89 {offsets = [0, 8], sizes = [16, 8], strides = [1, 1]} : vector<16x96xf32> to vector<16x8xf32>
    %112 = vector.extract_strided_slice %89 {offsets = [0, 40], sizes = [16, 8], strides = [1, 1]} : vector<16x96xf32> to vector<16x8xf32>
    %113 = vector.extract_strided_slice %89 {offsets = [0, 72], sizes = [16, 8], strides = [1, 1]} : vector<16x96xf32> to vector<16x8xf32>
    "tpu.trace_start"() <{level = 10 : i32, message = "ld,md->lm"}> : () -> ()
    %cst_45 = arith.constant dense<0.000000e+00> : vector<16x16xf32>
    %114 = tpu.matmul %111, %112, %cst_45 {dimension_numbers = #tpu.dot_dimension_numbers<[1], [1], [0], [0], [0, 0, 1, 0], [], []>} : vector<16x8xf32>, vector<16x8xf32>, vector<16x16xf32> -> vector<16x16xf32>
    "tpu.trace_stop"() : () -> ()
    %cst_46 = arith.constant 0.353553385 : f32
    %115 = vector.broadcast %cst_46 : f32 to vector<16x16xf32>
    %116 = arith.mulf %114, %115 : vector<16x16xf32>
    %cst_47 = arith.constant dense<0xFF800000> : vector<16xf32>
    %117 = vector.multi_reduction <maximumf>, %116, %cst_47 [1] : vector<16x16xf32> to vector<16xf32>
    %118 = vector.shape_cast %117 : vector<16xf32> to vector<16x1xf32>
    %119 = vector.broadcast %118 : vector<16x1xf32> to vector<16x16xf32>
    %120 = arith.subf %116, %119 : vector<16x16xf32>
    %121 = math.exp %120 : vector<16x16xf32>
    %cst_48 = arith.constant dense<0.000000e+00> : vector<16xf32>
    %122 = vector.multi_reduction <add>, %121, %cst_48 [1] : vector<16x16xf32> to vector<16xf32>
    %123 = vector.shape_cast %122 : vector<16xf32> to vector<16x1xf32>
    %124 = tpu.reciprocal %123 {approx = true} : vector<16x1xf32> -> vector<16x1xf32>
    %125 = vector.broadcast %124 : vector<16x1xf32> to vector<16x16xf32>
    %126 = arith.mulf %121, %125 : vector<16x16xf32>
    %cst_49 = arith.constant dense<0.000000e+00> : vector<16x8xf32>
    %127 = tpu.matmul %126, %113, %cst_49 {dimension_numbers = #tpu.dot_dimension_numbers<[1], [0], [0], [1], [0, 0, 1, 1], [], []>} : vector<16x16xf32>, vector<16x8xf32>, vector<16x8xf32> -> vector<16x8xf32>
    %c8_50 = arith.constant 8 : index
    %c0_51 = arith.constant 0 : index
    %128 = vector.load %arg4[%c8_50, %c0_51] : memref<32x32xf32, #tpu.memory_space<vmem>>, vector<8x32xf32>
    %cst_52 = arith.constant dense<0.000000e+00> : vector<16x32xf32>
    %129 = tpu.matmul %127, %128, %cst_52 {dimension_numbers = #tpu.dot_dimension_numbers<[1], [0], [0], [1], [0, 0, 1, 1], [], []>} : vector<16x8xf32>, vector<8x32xf32>, vector<16x32xf32> -> vector<16x32xf32>
    %130 = arith.addf %110, %129 : vector<16x32xf32>
    %131 = vector.extract_strided_slice %89 {offsets = [0, 16], sizes = [16, 8], strides = [1, 1]} : vector<16x96xf32> to vector<16x8xf32>
    %132 = vector.extract_strided_slice %89 {offsets = [0, 48], sizes = [16, 8], strides = [1, 1]} : vector<16x96xf32> to vector<16x8xf32>
    %133 = vector.extract_strided_slice %89 {offsets = [0, 80], sizes = [16, 8], strides = [1, 1]} : vector<16x96xf32> to vector<16x8xf32>
    "tpu.trace_start"() <{level = 10 : i32, message = "ld,md->lm"}> : () -> ()
    %cst_53 = arith.constant dense<0.000000e+00> : vector<16x16xf32>
    %134 = tpu.matmul %131, %132, %cst_53 {dimension_numbers = #tpu.dot_dimension_numbers<[1], [1], [0], [0], [0, 0, 1, 0], [], []>} : vector<16x8xf32>, vector<16x8xf32>, vector<16x16xf32> -> vector<16x16xf32>
    "tpu.trace_stop"() : () -> ()
    %cst_54 = arith.constant 0.353553385 : f32
    %135 = vector.broadcast %cst_54 : f32 to vector<16x16xf32>
    %136 = arith.mulf %134, %135 : vector<16x16xf32>
    %cst_55 = arith.constant dense<0xFF800000> : vector<16xf32>
    %137 = vector.multi_reduction <maximumf>, %136, %cst_55 [1] : vector<16x16xf32> to vector<16xf32>
    %138 = vector.shape_cast %137 : vector<16xf32> to vector<16x1xf32>
    %139 = vector.broadcast %138 : vector<16x1xf32> to vector<16x16xf32>
    %140 = arith.subf %136, %139 : vector<16x16xf32>
    %141 = math.exp %140 : vector<16x16xf32>
    %cst_56 = arith.constant dense<0.000000e+00> : vector<16xf32>
    %142 = vector.multi_reduction <add>, %141, %cst_56 [1] : vector<16x16xf32> to vector<16xf32>
    %143 = vector.shape_cast %142 : vector<16xf32> to vector<16x1xf32>
    %144 = tpu.reciprocal %143 {approx = true} : vector<16x1xf32> -> vector<16x1xf32>
    %145 = vector.broadcast %144 : vector<16x1xf32> to vector<16x16xf32>
    %146 = arith.mulf %141, %145 : vector<16x16xf32>
    %cst_57 = arith.constant dense<0.000000e+00> : vector<16x8xf32>
    %147 = tpu.matmul %146, %133, %cst_57 {dimension_numbers = #tpu.dot_dimension_numbers<[1], [0], [0], [1], [0, 0, 1, 1], [], []>} : vector<16x16xf32>, vector<16x8xf32>, vector<16x8xf32> -> vector<16x8xf32>
    %c16_58 = arith.constant 16 : index
    %c0_59 = arith.constant 0 : index
    %148 = vector.load %arg4[%c16_58, %c0_59] : memref<32x32xf32, #tpu.memory_space<vmem>>, vector<8x32xf32>
    %cst_60 = arith.constant dense<0.000000e+00> : vector<16x32xf32>
    %149 = tpu.matmul %147, %148, %cst_60 {dimension_numbers = #tpu.dot_dimension_numbers<[1], [0], [0], [1], [0, 0, 1, 1], [], []>} : vector<16x8xf32>, vector<8x32xf32>, vector<16x32xf32> -> vector<16x32xf32>
    %150 = arith.addf %130, %149 : vector<16x32xf32>
    %151 = vector.extract_strided_slice %89 {offsets = [0, 24], sizes = [16, 8], strides = [1, 1]} : vector<16x96xf32> to vector<16x8xf32>
    %152 = vector.extract_strided_slice %89 {offsets = [0, 56], sizes = [16, 8], strides = [1, 1]} : vector<16x96xf32> to vector<16x8xf32>
    %153 = vector.extract_strided_slice %89 {offsets = [0, 88], sizes = [16, 8], strides = [1, 1]} : vector<16x96xf32> to vector<16x8xf32>
    "tpu.trace_start"() <{level = 10 : i32, message = "ld,md->lm"}> : () -> ()
    %cst_61 = arith.constant dense<0.000000e+00> : vector<16x16xf32>
    %154 = tpu.matmul %151, %152, %cst_61 {dimension_numbers = #tpu.dot_dimension_numbers<[1], [1], [0], [0], [0, 0, 1, 0], [], []>} : vector<16x8xf32>, vector<16x8xf32>, vector<16x16xf32> -> vector<16x16xf32>
    "tpu.trace_stop"() : () -> ()
    %cst_62 = arith.constant 0.353553385 : f32
    %155 = vector.broadcast %cst_62 : f32 to vector<16x16xf32>
    %156 = arith.mulf %154, %155 : vector<16x16xf32>
    %cst_63 = arith.constant dense<0xFF800000> : vector<16xf32>
    %157 = vector.multi_reduction <maximumf>, %156, %cst_63 [1] : vector<16x16xf32> to vector<16xf32>
    %158 = vector.shape_cast %157 : vector<16xf32> to vector<16x1xf32>
    %159 = vector.broadcast %158 : vector<16x1xf32> to vector<16x16xf32>
    %160 = arith.subf %156, %159 : vector<16x16xf32>
    %161 = math.exp %160 : vector<16x16xf32>
    %cst_64 = arith.constant dense<0.000000e+00> : vector<16xf32>
    %162 = vector.multi_reduction <add>, %161, %cst_64 [1] : vector<16x16xf32> to vector<16xf32>
    %163 = vector.shape_cast %162 : vector<16xf32> to vector<16x1xf32>
    %164 = tpu.reciprocal %163 {approx = true} : vector<16x1xf32> -> vector<16x1xf32>
    %165 = vector.broadcast %164 : vector<16x1xf32> to vector<16x16xf32>
    %166 = arith.mulf %161, %165 : vector<16x16xf32>
    %cst_65 = arith.constant dense<0.000000e+00> : vector<16x8xf32>
    %167 = tpu.matmul %166, %153, %cst_65 {dimension_numbers = #tpu.dot_dimension_numbers<[1], [0], [0], [1], [0, 0, 1, 1], [], []>} : vector<16x16xf32>, vector<16x8xf32>, vector<16x8xf32> -> vector<16x8xf32>
    %c24_66 = arith.constant 24 : index
    %c0_67 = arith.constant 0 : index
    %168 = vector.load %arg4[%c24_66, %c0_67] : memref<32x32xf32, #tpu.memory_space<vmem>>, vector<8x32xf32>
    %cst_68 = arith.constant dense<0.000000e+00> : vector<16x32xf32>
    %169 = tpu.matmul %167, %168, %cst_68 {dimension_numbers = #tpu.dot_dimension_numbers<[1], [0], [0], [1], [0, 0, 1, 1], [], []>} : vector<16x8xf32>, vector<8x32xf32>, vector<16x32xf32> -> vector<16x32xf32>
    %170 = arith.addf %150, %169 : vector<16x32xf32>
    %171 = tpu.concatenate %88, %170 in 0 : vector<16x32xf32>, vector<16x32xf32> -> vector<32x32xf32>
    %c0_69 = arith.constant 0 : index
    %c0_70 = arith.constant 0 : index
    %172 = vector.load %arg5[%c0_69, %c0_70] : memref<1x32xf32, #tpu.memory_space<vmem>>, vector<1x32xf32>
    %173 = vector.broadcast %172 : vector<1x32xf32> to vector<32x32xf32>
    %174 = arith.addf %171, %173 : vector<32x32xf32>
    %175 = arith.addf %1, %174 : vector<32x32xf32>
    %cst_71 = arith.constant dense<0.000000e+00> : vector<32xf32>
    %176 = vector.multi_reduction <add>, %175, %cst_71 [1] : vector<32x32xf32> to vector<32xf32>
    %177 = vector.shape_cast %176 : vector<32xf32> to vector<32x1xf32>
    %cst_72 = arith.constant 3.200000e+01 : f32
    %178 = vector.broadcast %cst_72 : f32 to vector<32x1xf32>
    %179 = arith.divf %177, %178 : vector<32x1xf32>
    %180 = vector.broadcast %179 : vector<32x1xf32> to vector<32x32xf32>
    %181 = arith.subf %175, %180 : vector<32x32xf32>
    %182 = arith.mulf %181, %181 : vector<32x32xf32>
    %cst_73 = arith.constant dense<0.000000e+00> : vector<32xf32>
    %183 = vector.multi_reduction <add>, %182, %cst_73 [1] : vector<32x32xf32> to vector<32xf32>
    %184 = vector.shape_cast %183 : vector<32xf32> to vector<32x1xf32>
    %cst_74 = arith.constant 3.200000e+01 : f32
    %185 = vector.broadcast %cst_74 : f32 to vector<32x1xf32>
    %186 = arith.divf %184, %185 : vector<32x1xf32>
    %187 = vector.broadcast %179 : vector<32x1xf32> to vector<32x32xf32>
    %188 = arith.subf %175, %187 : vector<32x32xf32>
    %cst_75 = arith.constant 9.99999974E-6 : f32
    %189 = vector.broadcast %cst_75 : f32 to vector<32x1xf32>
    %190 = arith.addf %186, %189 : vector<32x1xf32>
    %191 = math.rsqrt %190 : vector<32x1xf32>
    %192 = vector.broadcast %191 : vector<32x1xf32> to vector<32x32xf32>
    %193 = arith.mulf %188, %192 : vector<32x32xf32>
    %c0_76 = arith.constant 0 : index
    %c0_77 = arith.constant 0 : index
    %194 = vector.load %arg6[%c0_76, %c0_77] : memref<1x32xf32, #tpu.memory_space<vmem>>, vector<1x32xf32>
    %195 = vector.broadcast %194 : vector<1x32xf32> to vector<32x32xf32>
    %196 = arith.mulf %193, %195 : vector<32x32xf32>
    %c0_78 = arith.constant 0 : index
    %c0_79 = arith.constant 0 : index
    %197 = vector.load %arg7[%c0_78, %c0_79] : memref<1x32xf32, #tpu.memory_space<vmem>>, vector<1x32xf32>
    %198 = vector.broadcast %197 : vector<1x32xf32> to vector<32x32xf32>
    %199 = arith.addf %196, %198 : vector<32x32xf32>
    %c0_80 = arith.constant 0 : index
    %c0_81 = arith.constant 0 : index
    %200 = vector.load %arg8[%c0_80, %c0_81] : memref<32x64xf32, #tpu.memory_space<vmem>>, vector<32x64xf32>
    %cst_82 = arith.constant dense<0.000000e+00> : vector<32x64xf32>
    %201 = tpu.matmul %199, %200, %cst_82 {dimension_numbers = #tpu.dot_dimension_numbers<[1], [0], [0], [1], [0, 0, 1, 1], [], []>} : vector<32x32xf32>, vector<32x64xf32>, vector<32x64xf32> -> vector<32x64xf32>
    %c0_83 = arith.constant 0 : index
    %c0_84 = arith.constant 0 : index
    %202 = vector.load %arg9[%c0_83, %c0_84] : memref<1x64xf32, #tpu.memory_space<vmem>>, vector<1x64xf32>
    %203 = vector.broadcast %202 : vector<1x64xf32> to vector<32x64xf32>
    %204 = arith.addf %201, %203 : vector<32x64xf32>
    %cst_85 = arith.constant 0.000000e+00 : f32
    %205 = vector.broadcast %cst_85 : f32 to vector<32x64xf32>
    %206 = arith.maximumf %204, %205 : vector<32x64xf32>
    %c0_86 = arith.constant 0 : index
    %c0_87 = arith.constant 0 : index
    %207 = vector.load %arg10[%c0_86, %c0_87] : memref<64x32xf32, #tpu.memory_space<vmem>>, vector<64x32xf32>
    %cst_88 = arith.constant dense<0.000000e+00> : vector<32x32xf32>
    %208 = tpu.matmul %206, %207, %cst_88 {dimension_numbers = #tpu.dot_dimension_numbers<[1], [0], [0], [1], [0, 0, 1, 1], [], []>} : vector<32x64xf32>, vector<64x32xf32>, vector<32x32xf32> -> vector<32x32xf32>
    %c0_89 = arith.constant 0 : index
    %c0_90 = arith.constant 0 : index
    %209 = vector.load %arg11[%c0_89, %c0_90] : memref<1x32xf32, #tpu.memory_space<vmem>>, vector<1x32xf32>
    %210 = vector.broadcast %209 : vector<1x32xf32> to vector<32x32xf32>
    %211 = arith.addf %208, %210 : vector<32x32xf32>
    %212 = arith.addf %199, %211 : vector<32x32xf32>
    %cst_91 = arith.constant dense<0.000000e+00> : vector<32xf32>
    %213 = vector.multi_reduction <add>, %212, %cst_91 [1] : vector<32x32xf32> to vector<32xf32>
    %214 = vector.shape_cast %213 : vector<32xf32> to vector<32x1xf32>
    %cst_92 = arith.constant 3.200000e+01 : f32
    %215 = vector.broadcast %cst_92 : f32 to vector<32x1xf32>
    %216 = arith.divf %214, %215 : vector<32x1xf32>
    %217 = vector.broadcast %216 : vector<32x1xf32> to vector<32x32xf32>
    %218 = arith.subf %212, %217 : vector<32x32xf32>
    %219 = arith.mulf %218, %218 : vector<32x32xf32>
    %cst_93 = arith.constant dense<0.000000e+00> : vector<32xf32>
    %220 = vector.multi_reduction <add>, %219, %cst_93 [1] : vector<32x32xf32> to vector<32xf32>
    %221 = vector.shape_cast %220 : vector<32xf32> to vector<32x1xf32>
    %cst_94 = arith.constant 3.200000e+01 : f32
    %222 = vector.broadcast %cst_94 : f32 to vector<32x1xf32>
    %223 = arith.divf %221, %222 : vector<32x1xf32>
    %224 = vector.broadcast %216 : vector<32x1xf32> to vector<32x32xf32>
    %225 = arith.subf %212, %224 : vector<32x32xf32>
    %cst_95 = arith.constant 9.99999974E-6 : f32
    %226 = vector.broadcast %cst_95 : f32 to vector<32x1xf32>
    %227 = arith.addf %223, %226 : vector<32x1xf32>
    %228 = math.rsqrt %227 : vector<32x1xf32>
    %229 = vector.broadcast %228 : vector<32x1xf32> to vector<32x32xf32>
    %230 = arith.mulf %225, %229 : vector<32x32xf32>
    %c0_96 = arith.constant 0 : index
    %c0_97 = arith.constant 0 : index
    %231 = vector.load %arg12[%c0_96, %c0_97] : memref<1x32xf32, #tpu.memory_space<vmem>>, vector<1x32xf32>
    %232 = vector.broadcast %231 : vector<1x32xf32> to vector<32x32xf32>
    %233 = arith.mulf %230, %232 : vector<32x32xf32>
    %c0_98 = arith.constant 0 : index
    %c0_99 = arith.constant 0 : index
    %234 = vector.load %arg13[%c0_98, %c0_99] : memref<1x32xf32, #tpu.memory_space<vmem>>, vector<1x32xf32>
    %235 = vector.broadcast %234 : vector<1x32xf32> to vector<32x32xf32>
    %236 = arith.addf %233, %235 : vector<32x32xf32>
    %237 = vector.shape_cast %236 : vector<32x32xf32> to vector<2x16x32xf32>
    %c0_100 = arith.constant 0 : index
    %c0_101 = arith.constant 0 : index
    %c0_102 = arith.constant 0 : index
    %238 = vector.load %arg14[%c0_100, %c0_101, %c0_102] : memref<2x16x32xf32, #tpu.memory_space<vmem>>, vector<2x16x32xf32>
    tpu.vector_store %arg14[%c0_100, %c0_101, %c0_102], %237 {strides = array<i32>} : memref<2x16x32xf32, #tpu.memory_space<vmem>>, vector<2x16x32xf32>,
    return
  }
  func.func @transform_0(%arg0: i32) -> (i32, i32, i32) {
    %c0_i32 = arith.constant 0 : i32
    %c0_i32_0 = arith.constant 0 : i32
    %c0_i32_1 = arith.constant 0 : i32
    return %arg0, %c0_i32, %c0_i32_0 : i32, i32, i32
  }
  func.func @transform_1(%arg0: i32) -> (i32, i32) {
    %c0_i32 = arith.constant 0 : i32
    %c0_i32_0 = arith.constant 0 : i32
    %c0_i32_1 = arith.constant 0 : i32
    return %c0_i32, %c0_i32_0 : i32, i32
  }
  func.func @transform_2(%arg0: i32) -> (i32, i32) {
    %c0_i32 = arith.constant 0 : i32
    %c0_i32_0 = arith.constant 0 : i32
    %c0_i32_1 = arith.constant 0 : i32
    return %c0_i32, %c0_i32_0 : i32, i32
  }
  func.func @transform_3(%arg0: i32) -> (i32, i32) {
    %c0_i32 = arith.constant 0 : i32
    %c0_i32_0 = arith.constant 0 : i32
    %c0_i32_1 = arith.constant 0 : i32
    return %c0_i32, %c0_i32_0 : i32, i32
  }
  func.func @transform_4(%arg0: i32) -> (i32, i32) {
    %c0_i32 = arith.constant 0 : i32
    %c0_i32_0 = arith.constant 0 : i32
    %c0_i32_1 = arith.constant 0 : i32
    return %c0_i32, %c0_i32_0 : i32, i32
  }
  func.func @transform_5(%arg0: i32) -> (i32, i32) {
    %c0_i32 = arith.constant 0 : i32
    %c0_i32_0 = arith.constant 0 : i32
    %c0_i32_1 = arith.constant 0 : i32
    return %c0_i32, %c0_i32_0 : i32, i32
  }
  func.func @transform_6(%arg0: i32) -> (i32, i32) {
    %c0_i32 = arith.constant 0 : i32
    %c0_i32_0 = arith.constant 0 : i32
    %c0_i32_1 = arith.constant 0 : i32
    return %c0_i32, %c0_i32_0 : i32, i32
  }
  func.func @transform_7(%arg0: i32) -> (i32, i32) {
    %c0_i32 = arith.constant 0 : i32
    %c0_i32_0 = arith.constant 0 : i32
    %c0_i32_1 = arith.constant 0 : i32
    return %c0_i32, %c0_i32_0 : i32, i32
  }
  func.func @transform_8(%arg0: i32) -> (i32, i32) {
    %c0_i32 = arith.constant 0 : i32
    %c0_i32_0 = arith.constant 0 : i32
    %c0_i32_1 = arith.constant 0 : i32
    return %c0_i32, %c0_i32_0 : i32, i32
  }
  func.func @transform_9(%arg0: i32) -> (i32, i32) {
    %c0_i32 = arith.constant 0 : i32
    %c0_i32_0 = arith.constant 0 : i32
    %c0_i32_1 = arith.constant 0 : i32
    return %c0_i32, %c0_i32_0 : i32, i32
  }
  func.func @transform_10(%arg0: i32) -> (i32, i32) {
    %c0_i32 = arith.constant 0 : i32
    %c0_i32_0 = arith.constant 0 : i32
    %c0_i32_1 = arith.constant 0 : i32
    return %c0_i32, %c0_i32_0 : i32, i32
  }
  func.func @transform_11(%arg0: i32) -> (i32, i32) {
    %c0_i32 = arith.constant 0 : i32
    %c0_i32_0 = arith.constant 0 : i32
    %c0_i32_1 = arith.constant 0 : i32
    return %c0_i32, %c0_i32_0 : i32, i32
  }
  func.func @transform_12(%arg0: i32) -> (i32, i32) {
    %c0_i32 = arith.constant 0 : i32
    %c0_i32_0 = arith.constant 0 : i32
    %c0_i32_1 = arith.constant 0 : i32
    return %c0_i32, %c0_i32_0 : i32, i32
  }
  func.func @transform_13(%arg0: i32) -> (i32, i32, i32) {
    %c0_i32 = arith.constant 0 : i32
    %c0_i32_0 = arith.constant 0 : i32
    %c0_i32_1 = arith.constant 0 : i32
    return %arg0, %c0_i32, %c0_i32_0 : i32, i32, i32
  }
}

module attributes {stable_mosaic.version = 11 : i64} {
  func.func @_encoder_layer_kernel(%arg0: i32, %arg1: memref<2x16x32xf32, #tpu.memory_space<vmem>>, %arg2: memref<32x96xf32, #tpu.memory_space<vmem>>, %arg3: memref<1x96xf32, #tpu.memory_space<vmem>>, %arg4: memref<32x32xf32, #tpu.memory_space<vmem>>, %arg5: memref<1x32xf32, #tpu.memory_space<vmem>>, %arg6: memref<1x32xf32, #tpu.memory_space<vmem>>, %arg7: memref<1x32xf32, #tpu.memory_space<vmem>>, %arg8: memref<32x64xf32, #tpu.memory_space<vmem>>, %arg9: memref<1x64xf32, #tpu.memory_space<vmem>>, %arg10: memref<64x32xf32, #tpu.memory_space<vmem>>, %arg11: memref<1x32xf32, #tpu.memory_space<vmem>>, %arg12: memref<1x32xf32, #tpu.memory_space<vmem>>, %arg13: memref<1x32xf32, #tpu.memory_space<vmem>>, %arg14: memref<2x16x32xf32, #tpu.memory_space<vmem>>) attributes {dimension_semantics = [#tpu.dimension_semantics<parallel>], iteration_bounds = array<i64: 1>, scalar_prefetch = 0 : i64, scratch_operands = 0 : i64, tpu.core_type = #tpu.core_type<tc>, window_params = [{transform_indices = @transform_0, window_bounds = array<i64: 2, 16, 32>}, {pipeline_mode = #tpu.pipeline_mode<synchronous>, transform_indices = @transform_1, window_bounds = array<i64: 32, 96>}, {pipeline_mode = #tpu.pipeline_mode<synchronous>, transform_indices = @transform_2, window_bounds = array<i64: 1, 96>}, {pipeline_mode = #tpu.pipeline_mode<synchronous>, transform_indices = @transform_3, window_bounds = array<i64: 32, 32>}, {pipeline_mode = #tpu.pipeline_mode<synchronous>, transform_indices = @transform_4, window_bounds = array<i64: 1, 32>}, {pipeline_mode = #tpu.pipeline_mode<synchronous>, transform_indices = @transform_5, window_bounds = array<i64: 1, 32>}, {pipeline_mode = #tpu.pipeline_mode<synchronous>, transform_indices = @transform_6, window_bounds = array<i64: 1, 32>}, {pipeline_mode = #tpu.pipeline_mode<synchronous>, transform_indices = @transform_7, window_bounds = array<i64: 32, 64>}, {pipeline_mode = #tpu.pipeline_mode<synchronous>, transform_indices = @transform_8, window_bounds = array<i64: 1, 64>}, {pipeline_mode = #tpu.pipeline_mode<synchronous>, transform_indices = @transform_9, window_bounds = array<i64: 64, 32>}, {pipeline_mode = #tpu.pipeline_mode<synchronous>, transform_indices = @transform_10, window_bounds = array<i64: 1, 32>}, {pipeline_mode = #tpu.pipeline_mode<synchronous>, transform_indices = @transform_11, window_bounds = array<i64: 1, 32>}, {pipeline_mode = #tpu.pipeline_mode<synchronous>, transform_indices = @transform_12, window_bounds = array<i64: 1, 32>}, {transform_indices = @transform_13, window_bounds = array<i64: 2, 16, 32>}]} {
    %c0 = arith.constant 0 : index
    %c0_0 = arith.constant 0 : index
    %c0_1 = arith.constant 0 : index
    %0 = vector.load %arg1[%c0, %c0_0, %c0_1] : memref<2x16x32xf32, #tpu.memory_space<vmem>>, vector<2x16x32xf32>
    %1 = vector.shape_cast %0 : vector<2x16x32xf32> to vector<32x32xf32>
    %c0_2 = arith.constant 0 : index
    %c0_3 = arith.constant 0 : index
    %2 = vector.load %arg2[%c0_2, %c0_3] : memref<32x96xf32, #tpu.memory_space<vmem>>, vector<32x96xf32>
    %cst = arith.constant dense<0.000000e+00> : vector<32x96xf32>
    %3 = tpu.matmul %1, %2, %cst {dimension_numbers = #tpu.dot_dimension_numbers<[1], [0], [0], [1], [0, 0, 1, 1], [], []>} : vector<32x32xf32>, vector<32x96xf32>, vector<32x96xf32> -> vector<32x96xf32>
    %c0_4 = arith.constant 0 : index
    %c0_5 = arith.constant 0 : index
    %4 = vector.load %arg3[%c0_4, %c0_5] : memref<1x96xf32, #tpu.memory_space<vmem>>, vector<1x96xf32>
    %5 = vector.broadcast %4 : vector<1x96xf32> to vector<32x96xf32>
    %6 = arith.addf %3, %5 : vector<32x96xf32>
    %7 = vector.extract_strided_slice %6 {offsets = [0, 0], sizes = [16, 96], strides = [1, 1]} : vector<32x96xf32> to vector<16x96xf32>
    %cst_6 = arith.constant 0.000000e+00 : f32
    %8 = vector.broadcast %cst_6 : f32 to vector<16x32xf32>
    %9 = vector.extract_strided_slice %7 {offsets = [0, 0], sizes = [16, 8], strides = [1, 1]} : vector<16x96xf32> to vector<16x8xf32>
    %10 = vector.extract_strided_slice %7 {offsets = [0, 32], sizes = [16, 8], strides = [1, 1]} : vector<16x96xf32> to vector<16x8xf32>
    %11 = vector.extract_strided_slice %7 {offsets = [0, 64], sizes = [16, 8], strides = [1, 1]} : vector<16x96xf32> to vector<16x8xf32>
    "tpu.trace_start"() <{level = 10 : i32, message = "ld,md->lm"}> : () -> ()
    %cst_7 = arith.constant dense<0.000000e+00> : vector<16x16xf32>
    %12 = tpu.matmul %9, %10, %cst_7 {dimension_numbers = #tpu.dot_dimension_numbers<[1], [1], [0], [0], [0, 0, 1, 0], [], []>} : vector<16x8xf32>, vector<16x8xf32>, vector<16x16xf32> -> vector<16x16xf32>
    "tpu.trace_stop"() : () -> ()
    %cst_8 = arith.constant 0.353553385 : f32
    %13 = vector.broadcast %cst_8 : f32 to vector<16x16xf32>
    %14 = arith.mulf %12, %13 : vector<16x16xf32>
    %cst_9 = arith.constant dense<0xFF800000> : vector<16xf32>
    %15 = vector.multi_reduction <maximumf>, %14, %cst_9 [1] : vector<16x16xf32> to vector<16xf32>
    %16 = vector.shape_cast %15 : vector<16xf32> to vector<16x1xf32>
    %17 = vector.broadcast %16 : vector<16x1xf32> to vector<16x16xf32>
    %18 = arith.subf %14, %17 : vector<16x16xf32>
    %19 = math.exp %18 : vector<16x16xf32>
    %cst_10 = arith.constant dense<0.000000e+00> : vector<16xf32>
    %20 = vector.multi_reduction <add>, %19, %cst_10 [1] : vector<16x16xf32> to vector<16xf32>
    %21 = vector.shape_cast %20 : vector<16xf32> to vector<16x1xf32>
    %22 = tpu.reciprocal %21 {approx = true} : vector<16x1xf32> -> vector<16x1xf32>
    %23 = vector.broadcast %22 : vector<16x1xf32> to vector<16x16xf32>
    %24 = arith.mulf %19, %23 : vector<16x16xf32>
    %cst_11 = arith.constant dense<0.000000e+00> : vector<16x8xf32>
    %25 = tpu.matmul %24, %11, %cst_11 {dimension_numbers = #tpu.dot_dimension_numbers<[1], [0], [0], [1], [0, 0, 1, 1], [], []>} : vector<16x16xf32>, vector<16x8xf32>, vector<16x8xf32> -> vector<16x8xf32>
    %c0_12 = arith.constant 0 : index
    %c0_13 = arith.constant 0 : index
    %26 = vector.load %arg4[%c0_12, %c0_13] : memref<32x32xf32, #tpu.memory_space<vmem>>, vector<8x32xf32>
    %cst_14 = arith.constant dense<0.000000e+00> : vector<16x32xf32>
    %27 = tpu.matmul %25, %26, %cst_14 {dimension_numbers = #tpu.dot_dimension_numbers<[1], [0], [0], [1], [0, 0, 1, 1], [], []>} : vector<16x8xf32>, vector<8x32xf32>, vector<16x32xf32> -> vector<16x32xf32>
    %28 = arith.addf %8, %27 : vector<16x32xf32>
    %29 = vector.extract_strided_slice %7 {offsets = [0, 8], sizes = [16, 8], strides = [1, 1]} : vector<16x96xf32> to vector<16x8xf32>
    %30 = vector.extract_strided_slice %7 {offsets = [0, 40], sizes = [16, 8], strides = [1, 1]} : vector<16x96xf32> to vector<16x8xf32>
    %31 = vector.extract_strided_slice %7 {offsets = [0, 72], sizes = [16, 8], strides = [1, 1]} : vector<16x96xf32> to vector<16x8xf32>
    "tpu.trace_start"() <{level = 10 : i32, message = "ld,md->lm"}> : () -> ()
    %cst_15 = arith.constant dense<0.000000e+00> : vector<16x16xf32>
    %32 = tpu.matmul %29, %30, %cst_15 {dimension_numbers = #tpu.dot_dimension_numbers<[1], [1], [0], [0], [0, 0, 1, 0], [], []>} : vector<16x8xf32>, vector<16x8xf32>, vector<16x16xf32> -> vector<16x16xf32>
    "tpu.trace_stop"() : () -> ()
    %cst_16 = arith.constant 0.353553385 : f32
    %33 = vector.broadcast %cst_16 : f32 to vector<16x16xf32>
    %34 = arith.mulf %32, %33 : vector<16x16xf32>
    %cst_17 = arith.constant dense<0xFF800000> : vector<16xf32>
    %35 = vector.multi_reduction <maximumf>, %34, %cst_17 [1] : vector<16x16xf32> to vector<16xf32>
    %36 = vector.shape_cast %35 : vector<16xf32> to vector<16x1xf32>
    %37 = vector.broadcast %36 : vector<16x1xf32> to vector<16x16xf32>
    %38 = arith.subf %34, %37 : vector<16x16xf32>
    %39 = math.exp %38 : vector<16x16xf32>
    %cst_18 = arith.constant dense<0.000000e+00> : vector<16xf32>
    %40 = vector.multi_reduction <add>, %39, %cst_18 [1] : vector<16x16xf32> to vector<16xf32>
    %41 = vector.shape_cast %40 : vector<16xf32> to vector<16x1xf32>
    %42 = tpu.reciprocal %41 {approx = true} : vector<16x1xf32> -> vector<16x1xf32>
    %43 = vector.broadcast %42 : vector<16x1xf32> to vector<16x16xf32>
    %44 = arith.mulf %39, %43 : vector<16x16xf32>
    %cst_19 = arith.constant dense<0.000000e+00> : vector<16x8xf32>
    %45 = tpu.matmul %44, %31, %cst_19 {dimension_numbers = #tpu.dot_dimension_numbers<[1], [0], [0], [1], [0, 0, 1, 1], [], []>} : vector<16x16xf32>, vector<16x8xf32>, vector<16x8xf32> -> vector<16x8xf32>
    %c8 = arith.constant 8 : index
    %c0_20 = arith.constant 0 : index
    %46 = vector.load %arg4[%c8, %c0_20] : memref<32x32xf32, #tpu.memory_space<vmem>>, vector<8x32xf32>
    %cst_21 = arith.constant dense<0.000000e+00> : vector<16x32xf32>
    %47 = tpu.matmul %45, %46, %cst_21 {dimension_numbers = #tpu.dot_dimension_numbers<[1], [0], [0], [1], [0, 0, 1, 1], [], []>} : vector<16x8xf32>, vector<8x32xf32>, vector<16x32xf32> -> vector<16x32xf32>
    %48 = arith.addf %28, %47 : vector<16x32xf32>
    %49 = vector.extract_strided_slice %7 {offsets = [0, 16], sizes = [16, 8], strides = [1, 1]} : vector<16x96xf32> to vector<16x8xf32>
    %50 = vector.extract_strided_slice %7 {offsets = [0, 48], sizes = [16, 8], strides = [1, 1]} : vector<16x96xf32> to vector<16x8xf32>
    %51 = vector.extract_strided_slice %7 {offsets = [0, 80], sizes = [16, 8], strides = [1, 1]} : vector<16x96xf32> to vector<16x8xf32>
    "tpu.trace_start"() <{level = 10 : i32, message = "ld,md->lm"}> : () -> ()
    %cst_22 = arith.constant dense<0.000000e+00> : vector<16x16xf32>
    %52 = tpu.matmul %49, %50, %cst_22 {dimension_numbers = #tpu.dot_dimension_numbers<[1], [1], [0], [0], [0, 0, 1, 0], [], []>} : vector<16x8xf32>, vector<16x8xf32>, vector<16x16xf32> -> vector<16x16xf32>
    "tpu.trace_stop"() : () -> ()
    %cst_23 = arith.constant 0.353553385 : f32
    %53 = vector.broadcast %cst_23 : f32 to vector<16x16xf32>
    %54 = arith.mulf %52, %53 : vector<16x16xf32>
    %cst_24 = arith.constant dense<0xFF800000> : vector<16xf32>
    %55 = vector.multi_reduction <maximumf>, %54, %cst_24 [1] : vector<16x16xf32> to vector<16xf32>
    %56 = vector.shape_cast %55 : vector<16xf32> to vector<16x1xf32>
    %57 = vector.broadcast %56 : vector<16x1xf32> to vector<16x16xf32>
    %58 = arith.subf %54, %57 : vector<16x16xf32>
    %59 = math.exp %58 : vector<16x16xf32>
    %cst_25 = arith.constant dense<0.000000e+00> : vector<16xf32>
    %60 = vector.multi_reduction <add>, %59, %cst_25 [1] : vector<16x16xf32> to vector<16xf32>
    %61 = vector.shape_cast %60 : vector<16xf32> to vector<16x1xf32>
    %62 = tpu.reciprocal %61 {approx = true} : vector<16x1xf32> -> vector<16x1xf32>
    %63 = vector.broadcast %62 : vector<16x1xf32> to vector<16x16xf32>
    %64 = arith.mulf %59, %63 : vector<16x16xf32>
    %cst_26 = arith.constant dense<0.000000e+00> : vector<16x8xf32>
    %65 = tpu.matmul %64, %51, %cst_26 {dimension_numbers = #tpu.dot_dimension_numbers<[1], [0], [0], [1], [0, 0, 1, 1], [], []>} : vector<16x16xf32>, vector<16x8xf32>, vector<16x8xf32> -> vector<16x8xf32>
    %c16 = arith.constant 16 : index
    %c0_27 = arith.constant 0 : index
    %66 = vector.load %arg4[%c16, %c0_27] : memref<32x32xf32, #tpu.memory_space<vmem>>, vector<8x32xf32>
    %cst_28 = arith.constant dense<0.000000e+00> : vector<16x32xf32>
    %67 = tpu.matmul %65, %66, %cst_28 {dimension_numbers = #tpu.dot_dimension_numbers<[1], [0], [0], [1], [0, 0, 1, 1], [], []>} : vector<16x8xf32>, vector<8x32xf32>, vector<16x32xf32> -> vector<16x32xf32>
    %68 = arith.addf %48, %67 : vector<16x32xf32>
    %69 = vector.extract_strided_slice %7 {offsets = [0, 24], sizes = [16, 8], strides = [1, 1]} : vector<16x96xf32> to vector<16x8xf32>
    %70 = vector.extract_strided_slice %7 {offsets = [0, 56], sizes = [16, 8], strides = [1, 1]} : vector<16x96xf32> to vector<16x8xf32>
    %71 = vector.extract_strided_slice %7 {offsets = [0, 88], sizes = [16, 8], strides = [1, 1]} : vector<16x96xf32> to vector<16x8xf32>
    "tpu.trace_start"() <{level = 10 : i32, message = "ld,md->lm"}> : () -> ()
    %cst_29 = arith.constant dense<0.000000e+00> : vector<16x16xf32>
    %72 = tpu.matmul %69, %70, %cst_29 {dimension_numbers = #tpu.dot_dimension_numbers<[1], [1], [0], [0], [0, 0, 1, 0], [], []>} : vector<16x8xf32>, vector<16x8xf32>, vector<16x16xf32> -> vector<16x16xf32>
    "tpu.trace_stop"() : () -> ()
    %cst_30 = arith.constant 0.353553385 : f32
    %73 = vector.broadcast %cst_30 : f32 to vector<16x16xf32>
    %74 = arith.mulf %72, %73 : vector<16x16xf32>
    %cst_31 = arith.constant dense<0xFF800000> : vector<16xf32>
    %75 = vector.multi_reduction <maximumf>, %74, %cst_31 [1] : vector<16x16xf32> to vector<16xf32>
    %76 = vector.shape_cast %75 : vector<16xf32> to vector<16x1xf32>
    %77 = vector.broadcast %76 : vector<16x1xf32> to vector<16x16xf32>
    %78 = arith.subf %74, %77 : vector<16x16xf32>
    %79 = math.exp %78 : vector<16x16xf32>
    %cst_32 = arith.constant dense<0.000000e+00> : vector<16xf32>
    %80 = vector.multi_reduction <add>, %79, %cst_32 [1] : vector<16x16xf32> to vector<16xf32>
    %81 = vector.shape_cast %80 : vector<16xf32> to vector<16x1xf32>
    %82 = tpu.reciprocal %81 {approx = true} : vector<16x1xf32> -> vector<16x1xf32>
    %83 = vector.broadcast %82 : vector<16x1xf32> to vector<16x16xf32>
    %84 = arith.mulf %79, %83 : vector<16x16xf32>
    %cst_33 = arith.constant dense<0.000000e+00> : vector<16x8xf32>
    %85 = tpu.matmul %84, %71, %cst_33 {dimension_numbers = #tpu.dot_dimension_numbers<[1], [0], [0], [1], [0, 0, 1, 1], [], []>} : vector<16x16xf32>, vector<16x8xf32>, vector<16x8xf32> -> vector<16x8xf32>
    %c24 = arith.constant 24 : index
    %c0_34 = arith.constant 0 : index
    %86 = vector.load %arg4[%c24, %c0_34] : memref<32x32xf32, #tpu.memory_space<vmem>>, vector<8x32xf32>
    %cst_35 = arith.constant dense<0.000000e+00> : vector<16x32xf32>
    %87 = tpu.matmul %85, %86, %cst_35 {dimension_numbers = #tpu.dot_dimension_numbers<[1], [0], [0], [1], [0, 0, 1, 1], [], []>} : vector<16x8xf32>, vector<8x32xf32>, vector<16x32xf32> -> vector<16x32xf32>
    %88 = arith.addf %68, %87 : vector<16x32xf32>
    %89 = vector.extract_strided_slice %6 {offsets = [16, 0], sizes = [16, 96], strides = [1, 1]} : vector<32x96xf32> to vector<16x96xf32>
    %cst_36 = arith.constant 0.000000e+00 : f32
    %90 = vector.broadcast %cst_36 : f32 to vector<16x32xf32>
    %91 = vector.extract_strided_slice %89 {offsets = [0, 0], sizes = [16, 8], strides = [1, 1]} : vector<16x96xf32> to vector<16x8xf32>
    %92 = vector.extract_strided_slice %89 {offsets = [0, 32], sizes = [16, 8], strides = [1, 1]} : vector<16x96xf32> to vector<16x8xf32>
    %93 = vector.extract_strided_slice %89 {offsets = [0, 64], sizes = [16, 8], strides = [1, 1]} : vector<16x96xf32> to vector<16x8xf32>
    "tpu.trace_start"() <{level = 10 : i32, message = "ld,md->lm"}> : () -> ()
    %cst_37 = arith.constant dense<0.000000e+00> : vector<16x16xf32>
    %94 = tpu.matmul %91, %92, %cst_37 {dimension_numbers = #tpu.dot_dimension_numbers<[1], [1], [0], [0], [0, 0, 1, 0], [], []>} : vector<16x8xf32>, vector<16x8xf32>, vector<16x16xf32> -> vector<16x16xf32>
    "tpu.trace_stop"() : () -> ()
    %cst_38 = arith.constant 0.353553385 : f32
    %95 = vector.broadcast %cst_38 : f32 to vector<16x16xf32>
    %96 = arith.mulf %94, %95 : vector<16x16xf32>
    %cst_39 = arith.constant dense<0xFF800000> : vector<16xf32>
    %97 = vector.multi_reduction <maximumf>, %96, %cst_39 [1] : vector<16x16xf32> to vector<16xf32>
    %98 = vector.shape_cast %97 : vector<16xf32> to vector<16x1xf32>
    %99 = vector.broadcast %98 : vector<16x1xf32> to vector<16x16xf32>
    %100 = arith.subf %96, %99 : vector<16x16xf32>
    %101 = math.exp %100 : vector<16x16xf32>
    %cst_40 = arith.constant dense<0.000000e+00> : vector<16xf32>
    %102 = vector.multi_reduction <add>, %101, %cst_40 [1] : vector<16x16xf32> to vector<16xf32>
    %103 = vector.shape_cast %102 : vector<16xf32> to vector<16x1xf32>
    %104 = tpu.reciprocal %103 {approx = true} : vector<16x1xf32> -> vector<16x1xf32>
    %105 = vector.broadcast %104 : vector<16x1xf32> to vector<16x16xf32>
    %106 = arith.mulf %101, %105 : vector<16x16xf32>
    %cst_41 = arith.constant dense<0.000000e+00> : vector<16x8xf32>
    %107 = tpu.matmul %106, %93, %cst_41 {dimension_numbers = #tpu.dot_dimension_numbers<[1], [0], [0], [1], [0, 0, 1, 1], [], []>} : vector<16x16xf32>, vector<16x8xf32>, vector<16x8xf32> -> vector<16x8xf32>
    %c0_42 = arith.constant 0 : index
    %c0_43 = arith.constant 0 : index
    %108 = vector.load %arg4[%c0_42, %c0_43] : memref<32x32xf32, #tpu.memory_space<vmem>>, vector<8x32xf32>
    %cst_44 = arith.constant dense<0.000000e+00> : vector<16x32xf32>
    %109 = tpu.matmul %107, %108, %cst_44 {dimension_numbers = #tpu.dot_dimension_numbers<[1], [0], [0], [1], [0, 0, 1, 1], [], []>} : vector<16x8xf32>, vector<8x32xf32>, vector<16x32xf32> -> vector<16x32xf32>
    %110 = arith.addf %90, %109 : vector<16x32xf32>
    %111 = vector.extract_strided_slice %89 {offsets = [0, 8], sizes = [16, 8], strides = [1, 1]} : vector<16x96xf32> to vector<16x8xf32>
    %112 = vector.extract_strided_slice %89 {offsets = [0, 40], sizes = [16, 8], strides = [1, 1]} : vector<16x96xf32> to vector<16x8xf32>
    %113 = vector.extract_strided_slice %89 {offsets = [0, 72], sizes = [16, 8], strides = [1, 1]} : vector<16x96xf32> to vector<16x8xf32>
    "tpu.trace_start"() <{level = 10 : i32, message = "ld,md->lm"}> : () -> ()
    %cst_45 = arith.constant dense<0.000000e+00> : vector<16x16xf32>
    %114 = tpu.matmul %111, %112, %cst_45 {dimension_numbers = #tpu.dot_dimension_numbers<[1], [1], [0], [0], [0, 0, 1, 0], [], []>} : vector<16x8xf32>, vector<16x8xf32>, vector<16x16xf32> -> vector<16x16xf32>
    "tpu.trace_stop"() : () -> ()
    %cst_46 = arith.constant 0.353553385 : f32
    %115 = vector.broadcast %cst_46 : f32 to vector<16x16xf32>
    %116 = arith.mulf %114, %115 : vector<16x16xf32>
    %cst_47 = arith.constant dense<0xFF800000> : vector<16xf32>
    %117 = vector.multi_reduction <maximumf>, %116, %cst_47 [1] : vector<16x16xf32> to vector<16xf32>
    %118 = vector.shape_cast %117 : vector<16xf32> to vector<16x1xf32>
    %119 = vector.broadcast %118 : vector<16x1xf32> to vector<16x16xf32>
    %120 = arith.subf %116, %119 : vector<16x16xf32>
    %121 = math.exp %120 : vector<16x16xf32>
    %cst_48 = arith.constant dense<0.000000e+00> : vector<16xf32>
    %122 = vector.multi_reduction <add>, %121, %cst_48 [1] : vector<16x16xf32> to vector<16xf32>
    %123 = vector.shape_cast %122 : vector<16xf32> to vector<16x1xf32>
    %124 = tpu.reciprocal %123 {approx = true} : vector<16x1xf32> -> vector<16x1xf32>
    %125 = vector.broadcast %124 : vector<16x1xf32> to vector<16x16xf32>
    %126 = arith.mulf %121, %125 : vector<16x16xf32>
    %cst_49 = arith.constant dense<0.000000e+00> : vector<16x8xf32>
    %127 = tpu.matmul %126, %113, %cst_49 {dimension_numbers = #tpu.dot_dimension_numbers<[1], [0], [0], [1], [0, 0, 1, 1], [], []>} : vector<16x16xf32>, vector<16x8xf32>, vector<16x8xf32> -> vector<16x8xf32>
    %c8_50 = arith.constant 8 : index
    %c0_51 = arith.constant 0 : index
    %128 = vector.load %arg4[%c8_50, %c0_51] : memref<32x32xf32, #tpu.memory_space<vmem>>, vector<8x32xf32>
    %cst_52 = arith.constant dense<0.000000e+00> : vector<16x32xf32>
    %129 = tpu.matmul %127, %128, %cst_52 {dimension_numbers = #tpu.dot_dimension_numbers<[1], [0], [0], [1], [0, 0, 1, 1], [], []>} : vector<16x8xf32>, vector<8x32xf32>, vector<16x32xf32> -> vector<16x32xf32>
    %130 = arith.addf %110, %129 : vector<16x32xf32>
    %131 = vector.extract_strided_slice %89 {offsets = [0, 16], sizes = [16, 8], strides = [1, 1]} : vector<16x96xf32> to vector<16x8xf32>
    %132 = vector.extract_strided_slice %89 {offsets = [0, 48], sizes = [16, 8], strides = [1, 1]} : vector<16x96xf32> to vector<16x8xf32>
    %133 = vector.extract_strided_slice %89 {offsets = [0, 80], sizes = [16, 8], strides = [1, 1]} : vector<16x96xf32> to vector<16x8xf32>
    "tpu.trace_start"() <{level = 10 : i32, message = "ld,md->lm"}> : () -> ()
    %cst_53 = arith.constant dense<0.000000e+00> : vector<16x16xf32>
    %134 = tpu.matmul %131, %132, %cst_53 {dimension_numbers = #tpu.dot_dimension_numbers<[1], [1], [0], [0], [0, 0, 1, 0], [], []>} : vector<16x8xf32>, vector<16x8xf32>, vector<16x16xf32> -> vector<16x16xf32>
    "tpu.trace_stop"() : () -> ()
    %cst_54 = arith.constant 0.353553385 : f32
    %135 = vector.broadcast %cst_54 : f32 to vector<16x16xf32>
    %136 = arith.mulf %134, %135 : vector<16x16xf32>
    %cst_55 = arith.constant dense<0xFF800000> : vector<16xf32>
    %137 = vector.multi_reduction <maximumf>, %136, %cst_55 [1] : vector<16x16xf32> to vector<16xf32>
    %138 = vector.shape_cast %137 : vector<16xf32> to vector<16x1xf32>
    %139 = vector.broadcast %138 : vector<16x1xf32> to vector<16x16xf32>
    %140 = arith.subf %136, %139 : vector<16x16xf32>
    %141 = math.exp %140 : vector<16x16xf32>
    %cst_56 = arith.constant dense<0.000000e+00> : vector<16xf32>
    %142 = vector.multi_reduction <add>, %141, %cst_56 [1] : vector<16x16xf32> to vector<16xf32>
    %143 = vector.shape_cast %142 : vector<16xf32> to vector<16x1xf32>
    %144 = tpu.reciprocal %143 {approx = true} : vector<16x1xf32> -> vector<16x1xf32>
    %145 = vector.broadcast %144 : vector<16x1xf32> to vector<16x16xf32>
    %146 = arith.mulf %141, %145 : vector<16x16xf32>
    %cst_57 = arith.constant dense<0.000000e+00> : vector<16x8xf32>
    %147 = tpu.matmul %146, %133, %cst_57 {dimension_numbers = #tpu.dot_dimension_numbers<[1], [0], [0], [1], [0, 0, 1, 1], [], []>} : vector<16x16xf32>, vector<16x8xf32>, vector<16x8xf32> -> vector<16x8xf32>
    %c16_58 = arith.constant 16 : index
    %c0_59 = arith.constant 0 : index
    %148 = vector.load %arg4[%c16_58, %c0_59] : memref<32x32xf32, #tpu.memory_space<vmem>>, vector<8x32xf32>
    %cst_60 = arith.constant dense<0.000000e+00> : vector<16x32xf32>
    %149 = tpu.matmul %147, %148, %cst_60 {dimension_numbers = #tpu.dot_dimension_numbers<[1], [0], [0], [1], [0, 0, 1, 1], [], []>} : vector<16x8xf32>, vector<8x32xf32>, vector<16x32xf32> -> vector<16x32xf32>
    %150 = arith.addf %130, %149 : vector<16x32xf32>
    %151 = vector.extract_strided_slice %89 {offsets = [0, 24], sizes = [16, 8], strides = [1, 1]} : vector<16x96xf32> to vector<16x8xf32>
    %152 = vector.extract_strided_slice %89 {offsets = [0, 56], sizes = [16, 8], strides = [1, 1]} : vector<16x96xf32> to vector<16x8xf32>
    %153 = vector.extract_strided_slice %89 {offsets = [0, 88], sizes = [16, 8], strides = [1, 1]} : vector<16x96xf32> to vector<16x8xf32>
    "tpu.trace_start"() <{level = 10 : i32, message = "ld,md->lm"}> : () -> ()
    %cst_61 = arith.constant dense<0.000000e+00> : vector<16x16xf32>
    %154 = tpu.matmul %151, %152, %cst_61 {dimension_numbers = #tpu.dot_dimension_numbers<[1], [1], [0], [0], [0, 0, 1, 0], [], []>} : vector<16x8xf32>, vector<16x8xf32>, vector<16x16xf32> -> vector<16x16xf32>
    "tpu.trace_stop"() : () -> ()
    %cst_62 = arith.constant 0.353553385 : f32
    %155 = vector.broadcast %cst_62 : f32 to vector<16x16xf32>
    %156 = arith.mulf %154, %155 : vector<16x16xf32>
    %cst_63 = arith.constant dense<0xFF800000> : vector<16xf32>
    %157 = vector.multi_reduction <maximumf>, %156, %cst_63 [1] : vector<16x16xf32> to vector<16xf32>
    %158 = vector.shape_cast %157 : vector<16xf32> to vector<16x1xf32>
    %159 = vector.broadcast %158 : vector<16x1xf32> to vector<16x16xf32>
    %160 = arith.subf %156, %159 : vector<16x16xf32>
    %161 = math.exp %160 : vector<16x16xf32>
    %cst_64 = arith.constant dense<0.000000e+00> : vector<16xf32>
    %162 = vector.multi_reduction <add>, %161, %cst_64 [1] : vector<16x16xf32> to vector<16xf32>
    %163 = vector.shape_cast %162 : vector<16xf32> to vector<16x1xf32>
    %164 = tpu.reciprocal %163 {approx = true} : vector<16x1xf32> -> vector<16x1xf32>
    %165 = vector.broadcast %164 : vector<16x1xf32> to vector<16x16xf32>
    %166 = arith.mulf %161, %165 : vector<16x16xf32>
    %cst_65 = arith.constant dense<0.000000e+00> : vector<16x8xf32>
    %167 = tpu.matmul %166, %153, %cst_65 {dimension_numbers = #tpu.dot_dimension_numbers<[1], [0], [0], [1], [0, 0, 1, 1], [], []>} : vector<16x16xf32>, vector<16x8xf32>, vector<16x8xf32> -> vector<16x8xf32>
    %c24_66 = arith.constant 24 : index
    %c0_67 = arith.constant 0 : index
    %168 = vector.load %arg4[%c24_66, %c0_67] : memref<32x32xf32, #tpu.memory_space<vmem>>, vector<8x32xf32>
    %cst_68 = arith.constant dense<0.000000e+00> : vector<16x32xf32>
    %169 = tpu.matmul %167, %168, %cst_68 {dimension_numbers = #tpu.dot_dimension_numbers<[1], [0], [0], [1], [0, 0, 1, 1], [], []>} : vector<16x8xf32>, vector<8x32xf32>, vector<16x32xf32> -> vector<16x32xf32>
    %170 = arith.addf %150, %169 : vector<16x32xf32>
    %171 = tpu.concatenate %88, %170 in 0 : vector<16x32xf32>, vector<16x32xf32> -> vector<32x32xf32>
    %c0_69 = arith.constant 0 : index
    %c0_70 = arith.constant 0 : index
    %172 = vector.load %arg5[%c0_69, %c0_70] : memref<1x32xf32, #tpu.memory_space<vmem>>, vector<1x32xf32>
    %173 = vector.broadcast %172 : vector<1x32xf32> to vector<32x32xf32>
    %174 = arith.addf %171, %173 : vector<32x32xf32>
    %175 = arith.addf %1, %174 : vector<32x32xf32>
    %cst_71 = arith.constant dense<0.000000e+00> : vector<32xf32>
    %176 = vector.multi_reduction <add>, %175, %cst_71 [1] : vector<32x32xf32> to vector<32xf32>
    %177 = vector.shape_cast %176 : vector<32xf32> to vector<32x1xf32>
    %cst_72 = arith.constant 3.200000e+01 : f32
    %178 = vector.broadcast %cst_72 : f32 to vector<32x1xf32>
    %179 = arith.divf %177, %178 : vector<32x1xf32>
    %180 = vector.broadcast %179 : vector<32x1xf32> to vector<32x32xf32>
    %181 = arith.subf %175, %180 : vector<32x32xf32>
    %182 = arith.mulf %181, %181 : vector<32x32xf32>
    %cst_73 = arith.constant dense<0.000000e+00> : vector<32xf32>
    %183 = vector.multi_reduction <add>, %182, %cst_73 [1] : vector<32x32xf32> to vector<32xf32>
    %184 = vector.shape_cast %183 : vector<32xf32> to vector<32x1xf32>
    %cst_74 = arith.constant 3.200000e+01 : f32
    %185 = vector.broadcast %cst_74 : f32 to vector<32x1xf32>
    %186 = arith.divf %184, %185 : vector<32x1xf32>
    %187 = vector.broadcast %179 : vector<32x1xf32> to vector<32x32xf32>
    %188 = arith.subf %175, %187 : vector<32x32xf32>
    %cst_75 = arith.constant 9.99999974E-6 : f32
    %189 = vector.broadcast %cst_75 : f32 to vector<32x1xf32>
    %190 = arith.addf %186, %189 : vector<32x1xf32>
    %191 = math.rsqrt %190 : vector<32x1xf32>
    %192 = vector.broadcast %191 : vector<32x1xf32> to vector<32x32xf32>
    %193 = arith.mulf %188, %192 : vector<32x32xf32>
    %c0_76 = arith.constant 0 : index
    %c0_77 = arith.constant 0 : index
    %194 = vector.load %arg6[%c0_76, %c0_77] : memref<1x32xf32, #tpu.memory_space<vmem>>, vector<1x32xf32>
    %195 = vector.broadcast %194 : vector<1x32xf32> to vector<32x32xf32>
    %196 = arith.mulf %193, %195 : vector<32x32xf32>
    %c0_78 = arith.constant 0 : index
    %c0_79 = arith.constant 0 : index
    %197 = vector.load %arg7[%c0_78, %c0_79] : memref<1x32xf32, #tpu.memory_space<vmem>>, vector<1x32xf32>
    %198 = vector.broadcast %197 : vector<1x32xf32> to vector<32x32xf32>
    %199 = arith.addf %196, %198 : vector<32x32xf32>
    %c0_80 = arith.constant 0 : index
    %c0_81 = arith.constant 0 : index
    %200 = vector.load %arg8[%c0_80, %c0_81] : memref<32x64xf32, #tpu.memory_space<vmem>>, vector<32x64xf32>
    %cst_82 = arith.constant dense<0.000000e+00> : vector<32x64xf32>
    %201 = tpu.matmul %199, %200, %cst_82 {dimension_numbers = #tpu.dot_dimension_numbers<[1], [0], [0], [1], [0, 0, 1, 1], [], []>} : vector<32x32xf32>, vector<32x64xf32>, vector<32x64xf32> -> vector<32x64xf32>
    %c0_83 = arith.constant 0 : index
    %c0_84 = arith.constant 0 : index
    %202 = vector.load %arg9[%c0_83, %c0_84] : memref<1x64xf32, #tpu.memory_space<vmem>>, vector<1x64xf32>
    %203 = vector.broadcast %202 : vector<1x64xf32> to vector<32x64xf32>
    %204 = arith.addf %201, %203 : vector<32x64xf32>
    %cst_85 = arith.constant 0.000000e+00 : f32
    %205 = vector.broadcast %cst_85 : f32 to vector<32x64xf32>
    %206 = arith.maximumf %204, %205 : vector<32x64xf32>
    %c0_86 = arith.constant 0 : index
    %c0_87 = arith.constant 0 : index
    %207 = vector.load %arg10[%c0_86, %c0_87] : memref<64x32xf32, #tpu.memory_space<vmem>>, vector<64x32xf32>
    %cst_88 = arith.constant dense<0.000000e+00> : vector<32x32xf32>
    %208 = tpu.matmul %206, %207, %cst_88 {dimension_numbers = #tpu.dot_dimension_numbers<[1], [0], [0], [1], [0, 0, 1, 1], [], []>} : vector<32x64xf32>, vector<64x32xf32>, vector<32x32xf32> -> vector<32x32xf32>
    %c0_89 = arith.constant 0 : index
    %c0_90 = arith.constant 0 : index
    %209 = vector.load %arg11[%c0_89, %c0_90] : memref<1x32xf32, #tpu.memory_space<vmem>>, vector<1x32xf32>
    %210 = vector.broadcast %209 : vector<1x32xf32> to vector<32x32xf32>
    %211 = arith.addf %208, %210 : vector<32x32xf32>
    %212 = arith.addf %199, %211 : vector<32x32xf32>
    %cst_91 = arith.constant dense<0.000000e+00> : vector<32xf32>
    %213 = vector.multi_reduction <add>, %212, %cst_91 [1] : vector<32x32xf32> to vector<32xf32>
    %214 = vector.shape_cast %213 : vector<32xf32> to vector<32x1xf32>
    %cst_92 = arith.constant 3.200000e+01 : f32
    %215 = vector.broadcast %cst_92 : f32 to vector<32x1xf32>
    %216 = arith.divf %214, %215 : vector<32x1xf32>
    %217 = vector.broadcast %216 : vector<32x1xf32> to vector<32x32xf32>
    %218 = arith.subf %212, %217 : vector<32x32xf32>
    %219 = arith.mulf %218, %218 : vector<32x32xf32>
    %cst_93 = arith.constant dense<0.000000e+00> : vector<32xf32>
    %220 = vector.multi_reduction <add>, %219, %cst_93 [1] : vector<32x32xf32> to vector<32xf32>
    %221 = vector.shape_cast %220 : vector<32xf32> to vector<32x1xf32>
    %cst_94 = arith.constant 3.200000e+01 : f32
    %222 = vector.broadcast %cst_94 : f32 to vector<32x1xf32>
    %223 = arith.divf %221, %222 : vector<32x1xf32>
    %224 = vector.broadcast %216 : vector<32x1xf32> to vector<32x32xf32>
    %225 = arith.subf %212, %224 : vector<32x32xf32>
    %cst_95 = arith.constant 9.99999974E-6 : f32
    %226 = vector.broadcast %cst_95 : f32 to vector<32x1xf32>
    %227 = arith.addf %223, %226 : vector<32x1xf32>
    %228 = math.rsqrt %227 : vector<32x1xf32>
    %229 = vector.broadcast %228 : vector<32x1xf32> to vector<32x32xf32>
    %230 = arith.mulf %225, %229 : vector<32x32xf32>
    %c0_96 = arith.constant 0 : index
    %c0_97 = arith.constant 0 : index
    %231 = vector.load %arg12[%c0_96, %c0_97] : memref<1x32xf32, #tpu.memory_space<vmem>>, vector<1x32xf32>
    %232 = vector.broadcast %231 : vector<1x32xf32> to vector<32x32xf32>
    %233 = arith.mulf %230, %232 : vector<32x32xf32>
    %c0_98 = arith.constant 0 : index
    %c0_99 = arith.constant 0 : index
    %234 = vector.load %arg13[%c0_98, %c0_99] : memref<1x32xf32, #tpu.memory_space<vmem>>, vector<1x32xf32>
    %235 = vector.broadcast %234 : vector<1x32xf32> to vector<32x32xf32>
    %236 = arith.addf %233, %235 : vector<32x32xf32>
    %237 = vector.shape_cast %236 : vector<32x32xf32> to vector<2x16x32xf32>
    %c0_100 = arith.constant 0 : index
    %c0_101 = arith.constant 0 : index
    %c0_102 = arith.constant 0 : index
    %238 = vector.load %arg14[%c0_100, %c0_101, %c0_102] : memref<2x16x32xf32, #tpu.memory_space<vmem>>, vector<2x16x32xf32>
    tpu.vector_store %arg14[%c0_100, %c0_101, %c0_102], %237 {strides = array<i32>} : memref<2x16x32xf32, #tpu.memory_space<vmem>>, vector<2x16x32xf32>,
    return
  }
  func.func @transform_0(%arg0: i32) -> (i32, i32, i32) {
    %c0_i32 = arith.constant 0 : i32
    %c0_i32_0 = arith.constant 0 : i32
    %c0_i32_1 = arith.constant 0 : i32
    return %arg0, %c0_i32, %c0_i32_0 : i32, i32, i32
  }
  func.func @transform_1(%arg0: i32) -> (i32, i32) {
    %c0_i32 = arith.constant 0 : i32
    %c0_i32_0 = arith.constant 0 : i32
    %c0_i32_1 = arith.constant 0 : i32
    return %c0_i32, %c0_i32_0 : i32, i32
  }
  func.func @transform_2(%arg0: i32) -> (i32, i32) {
    %c0_i32 = arith.constant 0 : i32
    %c0_i32_0 = arith.constant 0 : i32
    %c0_i32_1 = arith.constant 0 : i32
    return %c0_i32, %c0_i32_0 : i32, i32
  }
  func.func @transform_3(%arg0: i32) -> (i32, i32) {
    %c0_i32 = arith.constant 0 : i32
    %c0_i32_0 = arith.constant 0 : i32
    %c0_i32_1 = arith.constant 0 : i32
    return %c0_i32, %c0_i32_0 : i32, i32
  }
  func.func @transform_4(%arg0: i32) -> (i32, i32) {
    %c0_i32 = arith.constant 0 : i32
    %c0_i32_0 = arith.constant 0 : i32
    %c0_i32_1 = arith.constant 0 : i32
    return %c0_i32, %c0_i32_0 : i32, i32
  }
  func.func @transform_5(%arg0: i32) -> (i32, i32) {
    %c0_i32 = arith.constant 0 : i32
    %c0_i32_0 = arith.constant 0 : i32
    %c0_i32_1 = arith.constant 0 : i32
    return %c0_i32, %c0_i32_0 : i32, i32
  }
  func.func @transform_6(%arg0: i32) -> (i32, i32) {
    %c0_i32 = arith.constant 0 : i32
    %c0_i32_0 = arith.constant 0 : i32
    %c0_i32_1 = arith.constant 0 : i32
    return %c0_i32, %c0_i32_0 : i32, i32
  }
  func.func @transform_7(%arg0: i32) -> (i32, i32) {
    %c0_i32 = arith.constant 0 : i32
    %c0_i32_0 = arith.constant 0 : i32
    %c0_i32_1 = arith.constant 0 : i32
    return %c0_i32, %c0_i32_0 : i32, i32
  }
  func.func @transform_8(%arg0: i32) -> (i32, i32) {
    %c0_i32 = arith.constant 0 : i32
    %c0_i32_0 = arith.constant 0 : i32
    %c0_i32_1 = arith.constant 0 : i32
    return %c0_i32, %c0_i32_0 : i32, i32
  }
  func.func @transform_9(%arg0: i32) -> (i32, i32) {
    %c0_i32 = arith.constant 0 : i32
    %c0_i32_0 = arith.constant 0 : i32
    %c0_i32_1 = arith.constant 0 : i32
    return %c0_i32, %c0_i32_0 : i32, i32
  }
  func.func @transform_10(%arg0: i32) -> (i32, i32) {
    %c0_i32 = arith.constant 0 : i32
    %c0_i32_0 = arith.constant 0 : i32
    %c0_i32_1 = arith.constant 0 : i32
    return %c0_i32, %c0_i32_0 : i32, i32
  }
  func.func @transform_11(%arg0: i32) -> (i32, i32) {
    %c0_i32 = arith.constant 0 : i32
    %c0_i32_0 = arith.constant 0 : i32
    %c0_i32_1 = arith.constant 0 : i32
    return %c0_i32, %c0_i32_0 : i32, i32
  }
  func.func @transform_12(%arg0: i32) -> (i32, i32) {
    %c0_i32 = arith.constant 0 : i32
    %c0_i32_0 = arith.constant 0 : i32
    %c0_i32_1 = arith.constant 0 : i32
    return %c0_i32, %c0_i32_0 : i32, i32
  }
  func.func @transform_13(%arg0: i32) -> (i32, i32, i32) {
    %c0_i32 = arith.constant 0 : i32
    %c0_i32_0 = arith.constant 0 : i32
    %c0_i32_1 = arith.constant 0 : i32
    return %arg0, %c0_i32, %c0_i32_0 : i32, i32, i32
  }
}

</mosaic_0001>

<bundles_post_ra>
// kernel: tpu_custom_call.1
= control target key start
LH: loop header
LB: loop body
LE: loop exit
PB: predicated region body
PF: predicated region fallthrough
CT: control target
= control target key end

     0   :  { %18 = vsyncpa [#allocation3], 0  ;;  %s4252_s0 = inlined_call_operand.vmem [shape: f32[2,16,32], index: 0, kind: input, shape index: {}]   ;;  %s4253_s1 = inlined_call_operand.vmem [shape: f32[32,96], index: 1, kind: input, shape index: {}]   ;;  %s4254_s2 = inlined_call_operand.vmem [shape: f32[1,96], index: 2, kind: input, shape index: {}]   ;;  %s4255_s3 = inlined_call_operand.vmem [shape: f32[32,32], index: 3, kind: input, shape index: {}]   ;;  %s4256_s4 = inlined_call_operand.vmem [shape: f32[1,32], index: 4, kind: input, shape index: {}]   ;;  %s4257_s5 = inlined_call_operand.hbm [shape: f32[1,32], index: 5, kind: input, shape index: {}]   ;;  %s4258_s6 = inlined_call_operand.hbm [shape: f32[1,32], index: 6, kind: input, shape index: {}]   ;;  %s4259_s7 = inlined_call_operand.hbm [shape: f32[32,64], index: 7, kind: input, shape index: {}]   ;;  %s4260_s8 = inlined_call_operand.hbm [shape: f32[1,64], index: 8, kind: input, shape index: {}]   ;;  %s4261_s9 = inlined_call_operand.vmem [shape: f32[64,32], index: 9, kind: input, shape index: {}]   ;;  %s4262_s10 = inlined_call_operand.vmem [shape: f32[1,32], index: 10, kind: input, shape index: {}]   ;;  %s4263_s11 = inlined_call_operand.vmem [shape: f32[1,32], index: 11, kind: input, shape index: {}]   ;;  %s4264_s12 = inlined_call_operand.vmem [shape: f32[1,32], index: 12, kind: input, shape index: {}]   ;;  %s4265_s13 = inlined_call_operand.hbm [shape: f32[2,16,32], index: 13, kind: output, shape index: {}]  }
   0x1   :  { %19 = vsyncpa [#allocation6], 0 }
   0x2   :  { %20 = vsyncpa [#allocation9], 0 }
   0x3   :  { %21 = vsyncpa [#allocation4], 0  ;;  %s3725_s25 = smov [#allocation5]   ;;  %s3726_s27 = smov [#allocation2]  }
   0x4   :  { %s48_s26 = sshll.u32 %s3725_s25, 4  ;;  %s38_s28 = sshll.u32 %s3726_s27, 4  ;;  %s49_s26 = int_to_ptr.vmem [resolvable:$true] %s48_s26  ;;  %s39_s28 = int_to_ptr.vmem [resolvable:$true] %s38_s28 }
   0x5   :  { %s3607_s14 = scalar_lea.hbm %s4258_s6, 16 }
   0x6   :  { %p3608_p0 = scmp.ne.s32.totalorder %s4258_s6, %s3607_s14  ;;  %p3611_p1 = scmp.lt.u32.totalorder %s3607_s14, %s4258_s6 }
   0x8   :  { %p3613_p2 = pnand %p3611_p1, %p3608_p0 }
   0xa   :  { %3616 = shalt.err (!%p3613_p2)
}
   0xb   :  { %s3617_s19 = scalar_lea.vmem %s49_s26, 16  ;;  %s3621_s20 = scalar_lea.vmem %s49_s26, 32 }
   0xc   :  { %p3618_p3 = scmp.ne.s32.totalorder %s49_s26, %s3617_s19  ;;  %p3622_p4 = scmp.lt.s32.totalorder %s49_s26, %s49_s26 }
   0xd   :  { %p3623_p5 = scmp.lt.s32.totalorder %s3621_s20, %s3617_s19 }
   0xf   :  { %p3624_p6 = por %p3623_p5, %p3622_p4 }
  0x11   :  { %p3625_p7 = pnand %p3624_p6, %p3618_p3 }
  0x13   :  { %3628 = shalt.err (!%p3625_p7)
}
  0x14   :  { %51 = dma.hbm_to_vmem [thread:$0]  %s4258_s6, 16, %s49_s26, [#allocation6]  }
  0x15   :  { %s3629_s25 = scalar_lea.hbm %s4257_s5, 16 }
  0x16   :  { %p3630_p8 = scmp.ne.s32.totalorder %s4257_s5, %s3629_s25  ;;  %p3633_p9 = scmp.lt.u32.totalorder %s3629_s25, %s4257_s5 }
  0x18   :  { %p3635_p10 = pnand %p3633_p9, %p3630_p8 }
  0x1a   :  { %3638 = shalt.err (!%p3635_p10)
}
  0x1b   :  { %s3639_s15 = scalar_lea.vmem %s39_s28, 16  ;;  %s3643_s16 = scalar_lea.vmem %s39_s28, 32 }
  0x1c   :  { %p3640_p11 = scmp.ne.s32.totalorder %s39_s28, %s3639_s15  ;;  %p3644_p12 = scmp.lt.s32.totalorder %s39_s28, %s39_s28 }
  0x1d   :  { %p3645_p13 = scmp.lt.s32.totalorder %s3643_s16, %s3639_s15 }
  0x1f   :  { %p3646_p0 = por %p3645_p13, %p3644_p12 }
  0x21   :  { %p3647_p1 = pnand %p3646_p0, %p3640_p11 }
  0x23   :  { %3650 = shalt.err (!%p3647_p1)
}
  0x24   :  { %41 = dma.hbm_to_vmem [thread:$0]  %s4257_s5, 16, %s39_s28, [#allocation3]  }
  0x25   :  { %s3727_s17 = smov [#allocation7]   ;;  %s3651_s21 = scalar_lea.hbm %s4259_s7, 512 }
  0x26   :  { %s57_s18 = sshll.u32 %s3727_s17, 4  ;;  %p3652_p2 = scmp.ne.s32.totalorder %s4259_s7, %s3651_s21  ;;  %s58_s18 = int_to_ptr.vmem [resolvable:$true] %s57_s18 }
  0x27   :  { %p3655_p3 = scmp.lt.u32.totalorder %s3651_s21, %s4259_s7 }
  0x29   :  { %p3657_p4 = pnand %p3655_p3, %p3652_p2 }
  0x2b   :  { %3660 = shalt.err (!%p3657_p4)
}
  0x2c   :  { %s3661_s27 = scalar_lea.vmem %s58_s18, 512  ;;  %p3666_p6 = scmp.lt.s32.totalorder %s58_s18, %s58_s18 }
  0x2d   :  { %p3662_p5 = scmp.ne.s32.totalorder %s58_s18, %s3661_s27  ;;  %p3667_p7 = scmp.lt.s32.totalorder %s3661_s27, %s3661_s27 }
  0x2f   :  { %p3668_p8 = por %p3667_p7, %p3666_p6 }
  0x31   :  { %p3669_p9 = pnand %p3668_p8, %p3662_p5 }
  0x33   :  { %3672 = shalt.err (!%p3669_p9)
}
  0x34   :  { %s3728_s5 = smov 128   ;;  %s3729_s28 = smov 8  }
  0x35   :  { %63 = dma.hbm_to_vmem [thread:$0]  %s4259_s7, 512, %s58_s18, [#allocation6], %s3728_s5, %s3728_s5, %s3729_s28  }
  0x36   :  { %s3730_s14 = smov [#allocation8]   ;;  %s3673_s26 = scalar_lea.hbm %s4260_s8, 16 }
  0x37   :  { %s70_s15 = sshll.u32 %s3730_s14, 4  ;;  %p3674_p10 = scmp.ne.s32.totalorder %s4260_s8, %s3673_s26  ;;  %s71_s15 = int_to_ptr.vmem [resolvable:$true] %s70_s15 }
  0x38   :  { %p3677_p11 = scmp.lt.u32.totalorder %s3673_s26, %s4260_s8 }
  0x3a   :  { %p3679_p12 = pnand %p3677_p11, %p3674_p10 }
  0x3c   :  { %3682 = shalt.err (!%p3679_p12)
}
  0x3d   :  { %s3683_s22 = scalar_lea.vmem %s71_s15, 16  ;;  %s3687_s7 = scalar_lea.vmem %s71_s15, 32 }
  0x3e   :  { %p3684_p13 = scmp.ne.s32.totalorder %s71_s15, %s3683_s22  ;;  %p3688_p0 = scmp.lt.s32.totalorder %s71_s15, %s71_s15 }
  0x3f   :  { %p3689_p1 = scmp.lt.s32.totalorder %s3687_s7, %s3683_s22 }
  0x41   :  { %p3690_p2 = por %p3689_p1, %p3688_p0 }
  0x43   :  { %p3691_p3 = pnand %p3690_p2, %p3684_p13 }
  0x45   :  { %3694 = shalt.err (!%p3691_p3)
}
  0x46   :  { %73 = dma.hbm_to_vmem [thread:$0]  %s4260_s8, 16, %s71_s15, [#allocation9]  }
  0x47   :  { %3717 = dma.done.wait [#allocation3], 16  }
  0x48   :  { %3718 = vsyncadd [#allocation3], 4294967280 }
  0x49   :  { %3719 = dma.done.wait [#allocation6], 528  }
  0x4a   :  { %3720 = vsyncadd [#allocation6], 4294966768 }
  0x4b   :  { %3721 = dma.done.wait [#allocation9], 16  }
  0x4c   :  { %3722 = vsyncadd [#allocation9], 4294967280  ;;  %vm109_vm0 = vcmask 261120   ;;  %v98_v0 = vld [vmem:[%s4253_s1] sm:$0xff]  ;;  %v99_v1 = vld [vmem:[%s4253_s1 + $0x8] sm:$0xff]  ;;  %vm213_vm1 = vcmask 64512  }
  0x4d   :  { %v100_v2 = vld [vmem:[%s4253_s1 + $0x10] sm:$0xff]  ;;  %v3303_v3 = vpack.c.bf16 %v99_v1, %v98_v0  ;;  %v101_v4 = vld [vmem:[%s4253_s1 + $0x18] sm:$0xff]  ;;  %v3879_v5 = vld [vmem:[%s4252_s0] sm:$0xff]  ;;  %s3731_s18 = smov 120   ;;  %s3733_s23 = smov 88   ;;  %vm299_vm3 = vcmask 130048  }
  0x4e   :  { %v3307_v6 = vpack.c.bf16 %v101_v4, %v100_v2  ;;  %3109 = vmatprep.mubr.msk.f32.mxu1 %vm109_vm0, %v3879_v5  ;;  %v3886_v7 = vld [vmem:[%s4252_s0 + $0x8] sm:$0xff]  ;;  %v96_v8 = vld [vmem:[%s4252_s0 + $0x10] sm:$0xff]  ;;  %v97_v9 = vld [vmem:[%s4252_s0 + $0x18] sm:$0xff]  ;;  %s3734_s24 = smov 64   ;;  %s3735_s25 = smov 80   ;;  %vm2702_vm4 = vcmask 523264  }
  0x4f   :  { %3304 = vmatprep.subr.bf16.mxu1 %v3303_v3  ;;  %v3901_v10 = vld [vmem:[%s4254_s2] ss:$0 sm:$0xff]  ;;  %s3732_s2 = smov 96   ;;  %vm3930_vm2 = vmpackc.low %vm213_vm1, %vm213_vm1  ;;  %s3736_s27 = smov 56  }
  0x50   :  { %3306 = vmatpush3.bf16.msra.mxu1 %v3303_v3  ;;  %s3737_s29 = smov 112   ;;  %s3738_s30 = smov 104  }
  0x51   :  { %3308 = vmatprep.subr.bf16.mxu1 %v3307_v6  ;;  %s3739_s14 = smov 72   ;;  %s3740_s26 = smov 48  }
  0x52   :  { %s3741_s19 = smov 40  }
  0x54   :  { %3310 = vmatpush3.bf16.msra.mxu1 %v3307_v6 }
  0x57   :  { %3110 = vmatmul.mubr.msk.f32.vlgmr.msra.gmra.mrb[0].mxu1 %vm109_vm0, %v3886_v7 }
  0x58   :  { %3112 = vmatprep.mubr.msk.f32.mxu1 %vm109_vm0, %v96_v8 }
  0x5b   :  { %3113 = vmatmul.mubr.msk.f32.gmra.mrb[2].mxu1 %vm109_vm0, %v97_v9 }
 0x12a   :  { %v3111_v11 = vpop.f32.mrb[0].mxu1 }
 0x12b   :  { %v3904_v12 = vadd.f32 %v3111_v11, %v3901_v10  ;;  %v188_v13 = vpop.f32.mrb[1].mxu1 }
 0x12c   :  { %v3907_v14 = vadd.f32 %v3901_v10, %v188_v13 }
 0x12e   :  { %410 = vrot.lane.b32.xlu1 %v3907_v14, %s3731_s18  ;;  %3119 = vmatprep.mubr.msk.f32.mxu1 %vm213_vm1, %v3907_v14  ;;  %v3915_v15 = vpack.i.bf16 %v3904_v12, %v3907_v14  ;;  %v3923_v16 = vpop.f32.mrb[2].mxu1 }
 0x12f   :  { %v3925_v17 = vpop.f32.mrb[3].mxu1 }
 0x130   :  { %3446 = vrot.lane.b32.xlu0 %v3915_v15, %s3732_s2 }
 0x132   :  { %412 = vrot.lane.b32.xlu1 %v3904_v12, %s3731_s18 }
 0x134   :  { %3451 = vrot.lane.b32.xlu0 %v3915_v15, %s3733_s23 }
 0x1a0   :  { %v411_v18 = vpop.permute.xlu1 %410 }
 0x1a1   :  { %3133 = vmatprep.mubr.msk.f32.mxu0 %vm213_vm1, %v411_v18 }
 0x1a2   :  { %v3447_v19 = vpop.permute.xlu0 %3446 }
 0x1a3   :  { %v3449_v20 = vunpack.i.h.bf16 %v3447_v19  ;;  %v3448_v21 = vunpack.i.l.bf16 %v3447_v19 }
 0x1a4   :  { %v413_v28 = vpop.permute.xlu1 %412 }
 0x1a5   :  { %v3311_v23 = vpack.c.bf16 %v3449_v20, %v3448_v21 }
 0x1a6   :  { %v3452_v24 = vpop.permute.xlu0 %3451 }
 0x1a7   :  { %v3454_v25 = vunpack.i.h.bf16 %v3452_v24  ;;  %v3453_v26 = vunpack.i.l.bf16 %v3452_v24  ;;  %3313 = vmatprep.subr.msk.bf16.mxu1 %vm3930_vm2, %v3311_v23 }
 0x1a8   :  { %3316 = vmatpush3.bf16.xpose.msk.msra.mxu1 %vm3930_vm2, %v3311_v23 }
 0x1a9   :  { %v3321_v27 = vpack.c.bf16 %v3454_v25, %v3453_v26 }
 0x1ab   :  { %3323 = vmatprep.subr.msk.bf16.mxu0 %vm3930_vm2, %v3321_v27 }
 0x1ac   :  { %3326 = vmatpush3.bf16.xpose.msk.msra.mxu0 %vm3930_vm2, %v3321_v27 }
 0x1af   :  { %3120 = vmatmul.mubr.msk.f32.vlgmr.msra.gmra.mrb[4].mxu1 %vm213_vm1, %v3904_v12 }
 0x1b3   :  { %3134 = vmatmul.mubr.msk.f32.vlgmr.msra.gmra.mrb[0].mxu0 %vm213_vm1, %v413_v28 }
 0x282   :  { %v3121_v29 = vpop.f32.mrb[4].mxu1 }
 0x283   :  { %v298_v30 = vmul.f32 0.35355338, %v3121_v29  ;;  %v288_v31 = vpop.f32.mrb[5].mxu1 }
 0x284   :  { %v297_v32 = vmul.f32 0.35355338, %v288_v31 }
 0x285   :  { %v303_v33 = vsel %vm299_vm3, %v298_v30, -inf }
 0x286   :  { %v3135_v34 = vpop.f32.mrb[0].mxu0  ;;  %304 = vmax.xlane.f32.xlu1 %v303_v33  ;;  %v300_v35 = vsel %vm299_vm3, %v297_v32, -inf }
 0x287   :  { %v492_v36 = vpop.f32.mrb[1].mxu0  ;;  %301 = vmax.xlane.f32.xlu0 %v300_v35  ;;  %v502_v38 = vmul.f32 0.35355338, %v3135_v34  ;;  %v3986_v35 = vadd.f32 %v3901_v10, %v3925_v17  ;;  %v4001_v17 = vld [vmem:[%s4255_s3] sm:$0xff] }
 0x288   :  { %v501_v37 = vmul.f32 0.35355338, %v492_v36 }
 0x289   :  { %v506_v40 = vsel %vm299_vm3, %v502_v38, -inf }
 0x28a   :  { %v503_v39 = vsel %vm299_vm3, %v501_v37, -inf }
 0x28b   :  { %504 = vmax.xlane.f32.xlu0 %v503_v39 }
 0x28f   :  { %507 = vmax.xlane.f32.xlu0 %v506_v40 }
 0x297   :  { %3456 = vrot.lane.b32.xlu1 %v3915_v15, %s3734_s24 }
 0x313   :  { %v305_v41 = vpop.xlane.xlu1 %304 }
 0x314   :  { %v307_v42 = vsub.f32 %v298_v30, %v305_v41  ;;  %v302_v43 = vpop.xlane.xlu0 %301 }
 0x315   :  { %v306_v44 = vsub.f32 %v297_v32, %v302_v43 }
 0x316   :  { %v310_v45 = vmul.f32 1.442695, %v307_v42 }
 0x317   :  { %v308_v46 = vmul.f32 1.442695, %v306_v44  ;;  %v3457_v47 = vpop.permute.xlu1 %3456 }
 0x318   :  { %3525 = vpow2.f32 %v310_v45  ;;  %v3459_v48 = vunpack.i.h.bf16 %v3457_v47  ;;  %v3458_v49 = vunpack.i.l.bf16 %v3457_v47  ;;  %v505_v50 = vpop.xlane.xlu0 %504 }
 0x319   :  { %3527 = vpow2.f32 %v308_v46  ;;  %v509_v61 = vsub.f32 %v501_v37, %v505_v50  ;;  %v3994_v37 = vld [vmem:[%s4255_s3 + $0x8] sm:$0xff]  ;;  %v4013_v50 = vadd.f32 %v3923_v16, %v3901_v10 }
 0x31a   :  { %v3317_v51 = vpack.c.bf16 %v3459_v48, %v3458_v49  ;;  %3143 = vmatprep.subr.mxu0 %v3994_v37 }
 0x31b   :  { %v511_v62 = vmul.f32 1.442695, %v509_v61  ;;  %3144 = vmatpush3.msra.mxu0 %v3994_v37 }
 0x31c   :  { %3318 = vmatprep.subr.bf16.mxu1 %v3317_v51  ;;  %v508_v52 = vpop.xlane.xlu0 %507  ;;  %3148 = vmatprep.subr.mxu0 %v4001_v17 }
 0x31d   :  { %v510_v53 = vsub.f32 %v502_v38, %v508_v52  ;;  %3320 = vmatpush3.bf16.msra.mxu1 %v3317_v51  ;;  %v4019_v51 = vpack.i.bf16 %v4013_v50, %v3986_v35 }
 0x31f   :  { %v513_v54 = vmul.f32 1.442695, %v510_v53 }
 0x321   :  { %3529 = vpow2.f32 %v513_v54 }
 0x322   :  { %v3526_v55 = vpop.eup %3525  ;;  %3531 = vpow2.f32 %v511_v62 }
 0x323   :  { %v3528_v56 = vpop.eup %3527  ;;  %v315_v57 = vsel %vm299_vm3, %v3526_v55, 0.0 }
 0x324   :  { %316 = vadd.xlane.f32.xlu0 %v315_v57  ;;  %v312_v58 = vsel %vm299_vm3, %v3528_v56, 0.0 }
 0x325   :  { %313 = vadd.xlane.f32.xlu1 %v312_v58 }
 0x32b   :  { %v3530_v59 = vpop.eup %3529 }
 0x32c   :  { %v518_v60 = vsel %vm299_vm3, %v3530_v59, 0.0  ;;  %v3532_v63 = vpop.eup %3531 }
 0x32d   :  { %519 = vadd.xlane.f32.xlu0 %v518_v60  ;;  %v515_v0 = vsel %vm299_vm3, %v3532_v63, 0.0 }
 0x336   :  { %3466 = vrot.lane.b32.xlu1 %v3915_v15, %s3735_s25 }
 0x343   :  { %3461 = vrot.lane.b32.xlu0 %v3915_v15, %s3736_s27 }
 0x347   :  { %777 = vrot.lane.b32.xlu0 %v3904_v12, %s3737_s29 }
 0x34b   :  { %1061 = vrot.lane.b32.xlu0 %v3907_v14, %s3738_s30 }
 0x35a   :  { %516 = vadd.xlane.f32.xlu1 %v515_v0 }
 0x36b   :  { %775 = vrot.lane.b32.xlu1 %v3907_v14, %s3737_s29 }
 0x36f   :  { %3471 = vrot.lane.b32.xlu1 %v3915_v15, %s3739_s14 }
 0x373   :  { %1063 = vrot.lane.b32.xlu1 %v3904_v12, %s3738_s30 }
 0x3b1   :  { %v317_v1 = vpop.xlane.xlu0 %316 }
 0x3b2   :  { %3533 = vrcp.f32 %v317_v1  ;;  %v314_v2 = vpop.xlane.xlu1 %313 }
 0x3b3   :  { %3535 = vrcp.f32 %v314_v2 }
 0x3b6   :  { %v3467_v4 = vpop.permute.xlu1 %3466 }
 0x3b7   :  { %v3469_v9 = vunpack.i.h.bf16 %v3467_v4  ;;  %v3468_v14 = vunpack.i.l.bf16 %v3467_v4 }
 0x3b9   :  { %v3331_v12 = vpack.c.bf16 %v3469_v9, %v3468_v14  ;;  %v4040_v14 = vld [vmem:[%s4255_s3 + $0x10] sm:$0xff] }
 0x3ba   :  { %v520_v3 = vpop.xlane.xlu0 %519 }
 0x3bb   :  { %3537 = vrcp.f32 %v520_v3 }
 0x3bc   :  { %v3534_v6 = vpop.eup %3533 }
 0x3bd   :  { %v3536_v8 = vpop.eup %3535  ;;  %v321_v18 = vmul.f32 %v3534_v6, %v3526_v55 }
 0x3be   :  { %v3462_v11 = vpop.permute.xlu0 %3461  ;;  %v320_v13 = vmul.f32 %v3536_v8, %v3528_v56 }
 0x3bf   :  { %v3464_v19 = vunpack.i.h.bf16 %v3462_v11  ;;  %v3463_v20 = vunpack.i.l.bf16 %v3462_v11 }
 0x3c0   :  { %3126 = vmatprep.mubr.msk.f32.mxu1 %vm299_vm3, %v320_v13 }
 0x3c1   :  { %v3327_v21 = vpack.c.bf16 %v3464_v19, %v3463_v20  ;;  %3127 = vmatmul.mubr.msk.f32.vlgmr.msra.gmra.mrb[6].mxu1 %vm299_vm3, %v321_v18 }
 0x3c2   :  { %v778_v33 = vpop.permute.xlu0 %777 }
 0x3c3   :  { %3328 = vmatprep.subr.bf16.mxu1 %v3327_v21 }
 0x3c4   :  { %3330 = vmatpush3.bf16.msra.mxu1 %v3327_v21 }
 0x3c5   :  { %3333 = vmatprep.subr.msk.bf16.mxu1 %vm3930_vm2, %v3331_v12  ;;  %v3538_v26 = vpop.eup %3537 }
 0x3c6   :  { %v524_v31 = vmul.f32 %v3538_v26, %v3530_v59  ;;  %v1062_v34 = vpop.permute.xlu0 %1061 }
 0x3e7   :  { %v517_v23 = vpop.xlane.xlu1 %516 }
 0x3e8   :  { %3539 = vrcp.f32 %v517_v23 }
 0x3eb   :  { %v776_v24 = vpop.permute.xlu1 %775 }
 0x3ef   :  { %v3472_v25 = vpop.permute.xlu1 %3471 }
 0x3f0   :  { %v3474_v28 = vunpack.i.h.bf16 %v3472_v25  ;;  %v3473_v29 = vunpack.i.l.bf16 %v3472_v25 }
 0x3f2   :  { %v3540_v27 = vpop.eup %3539  ;;  %v3341_v32 = vpack.c.bf16 %v3474_v28, %v3473_v29 }
 0x3f3   :  { %v523_v30 = vmul.f32 %v3540_v27, %v3532_v63  ;;  %v1064_v36 = vpop.permute.xlu1 %1063 }
 0x3f5   :  { %3140 = vmatprep.mubr.msk.f32.mxu1 %vm299_vm3, %v523_v30 }
 0x3f6   :  { %3141 = vmatmul.mubr.msk.f32.vlgmr.msra.gmra.mrb[8].mxu1 %vm299_vm3, %v524_v31 }
 0x3f7   :  { %3336 = vmatpush3.bf16.xpose.msk.msra.mxu1 %vm3930_vm2, %v3331_v12  ;;  %3157 = vmatprep.mubr.msk.f32.mxu1 %vm213_vm1, %v776_v24 }
 0x3f8   :  { %3343 = vmatprep.subr.msk.bf16.mxu1 %vm3930_vm2, %v3341_v32 }
 0x3fe   :  { %3158 = vmatmul.mubr.msk.f32.vlgmr.msra.gmra.mrb[10].mxu1 %vm213_vm1, %v778_v33 }
 0x3ff   :  { %3346 = vmatpush3.bf16.xpose.msk.msra.mxu1 %vm3930_vm2, %v3341_v32  ;;  %3176 = vmatprep.mubr.msk.f32.mxu1 %vm213_vm1, %v1062_v34 }
 0x406   :  { %3177 = vmatmul.mubr.msk.f32.vlgmr.msra.gmra.mrb[12].mxu1 %vm213_vm1, %v1064_v36 }
 0x407   :  { %3195 = vmatprep.mubr.msk.f32.mxu1 %vm213_vm1, %v3986_v35 }
 0x494   :  { %v3128_v38 = vpop.f32.mrb[6].mxu1 }
 0x495   :  { %v400_v39 = vpop.f32.mrb[7].mxu1 }
 0x4c9   :  { %v3142_v40 = vpop.f32.mrb[8].mxu1 }
 0x4ca   :  { %v603_v41 = vpop.f32.mrb[9].mxu1 }
 0x4cb   :  { %3145 = vmatprep.mubr.msk.f32.mxu0 %vm213_vm1, %v603_v41 }
 0x4cc   :  { %3146 = vmatmul.mubr.msk.f32.vlgmr.msra.gmra.mrb[2].mxu0 %vm213_vm1, %v3142_v40 }
 0x4cd   :  { %3150 = vmatprep.mubr.msk.f32.mxu0 %vm213_vm1, %v400_v39  ;;  %3149 = vmatpush3.msra.mxu0 %v4001_v17 }
 0x4d1   :  { %v3159_v42 = vpop.f32.mrb[10].mxu1 }
 0x4d2   :  { %v867_v43 = vmul.f32 0.35355338, %v3159_v42  ;;  %v857_v44 = vpop.f32.mrb[11].mxu1 }
 0x4d3   :  { %v866_v45 = vmul.f32 0.35355338, %v857_v44 }
 0x4d4   :  { %v871_v46 = vsel %vm299_vm3, %v867_v43, -inf  ;;  %3151 = vmatmul.mubr.msk.f32.vlgmr.msra.gmra.mrb[2].mxu0 %vm213_vm1, %v3128_v38 }
 0x4d5   :  { %872 = vmax.xlane.f32.xlu1 %v871_v46  ;;  %v868_v47 = vsel %vm299_vm3, %v866_v45, -inf }
 0x4d6   :  { %869 = vmax.xlane.f32.xlu0 %v868_v47 }
 0x4d9   :  { %v3178_v48 = vpop.f32.mrb[12].mxu1 }
 0x4da   :  { %v1143_v49 = vpop.f32.mrb[13].mxu1  ;;  %v1153_v9 = vmul.f32 0.35355338, %v3178_v48 }
 0x4db   :  { %v1152_v52 = vmul.f32 0.35355338, %v1143_v49 }
 0x4dc   :  { %v1157_v11 = vsel %vm299_vm3, %v1153_v9, -inf }
 0x4dd   :  { %v1154_v53 = vsel %vm299_vm3, %v1152_v52, -inf }
 0x4e6   :  { %3476 = vrot.lane.b32.xlu1 %v3915_v15, %s3740_s26 }
 0x4ea   :  { %3486 = vrot.lane.b32.xlu1 %v4019_v51, %s3733_s23 }
 0x4ee   :  { %1548 = vrot.lane.b32.xlu1 %v3986_v35, %s3731_s18 }
 0x512   :  { %1155 = vmax.xlane.f32.xlu1 %v1154_v53 }
 0x562   :  { %v873_v10 = vpop.xlane.xlu1 %872 }
 0x563   :  { %v875_v16 = vsub.f32 %v867_v43, %v873_v10  ;;  %v870_v54 = vpop.xlane.xlu0 %869 }
 0x564   :  { %v874_v55 = vsub.f32 %v866_v45, %v870_v54 }
 0x565   :  { %v878_v56 = vmul.f32 1.442695, %v875_v16 }
 0x566   :  { %v876_v57 = vmul.f32 1.442695, %v874_v55  ;;  %v3477_v58 = vpop.permute.xlu1 %3476 }
 0x567   :  { %v3479_v59 = vunpack.i.h.bf16 %v3477_v58  ;;  %v3478_v60 = vunpack.i.l.bf16 %v3477_v58 }
 0x568   :  { %3541 = vpow2.f32 %v876_v57 }
 0x569   :  { %v3337_v61 = vpack.c.bf16 %v3479_v59, %v3478_v60  ;;  %3543 = vpow2.f32 %v878_v56 }
 0x56a   :  { %v3487_v2 = vpop.permute.xlu1 %3486 }
 0x56b   :  { %3338 = vmatprep.subr.bf16.mxu0 %v3337_v61  ;;  %v3489_v12 = vunpack.i.h.bf16 %v3487_v2  ;;  %v3488_v23 = vunpack.i.l.bf16 %v3487_v2 }
 0x56c   :  { %3340 = vmatpush3.bf16.msra.mxu0 %v3337_v61 }
 0x56d   :  { %3167 = vmatprep.subr.mxu0 %v4040_v14  ;;  %v3361_v29 = vpack.c.bf16 %v3489_v12, %v3488_v23 }
 0x56e   :  { %v1549_v3 = vpop.permute.xlu1 %1548 }
 0x572   :  { %v3542_v62 = vpop.eup %3541 }
 0x573   :  { %v880_v63 = vsel %vm299_vm3, %v3542_v62, 0.0  ;;  %v3544_v0 = vpop.eup %3543 }
 0x574   :  { %881 = vadd.xlane.f32.xlu0 %v880_v63  ;;  %v883_v1 = vsel %vm299_vm3, %v3544_v0, 0.0 }
 0x578   :  { %884 = vadd.xlane.f32.xlu0 %v883_v1 }
 0x58e   :  { %3481 = vrot.lane.b32.xlu0 %v4019_v51, %s3732_s2 }
 0x592   :  { %1550 = vrot.lane.b32.xlu0 %v4013_v50, %s3731_s18 }
 0x59f   :  { %v1156_v4 = vpop.xlane.xlu1 %1155 }
 0x5a0   :  { %v1160_v6 = vsub.f32 %v1152_v52, %v1156_v4 }
 0x5a2   :  { %v1162_v8 = vmul.f32 1.442695, %v1160_v6  ;;  %v4085_v6 = vld [vmem:[%s4255_s3 + $0x18] sm:$0xff] }
 0x5a4   :  { %3545 = vpow2.f32 %v1162_v8 }
 0x5ae   :  { %v4033_v13 = vpop.eup %3545 }
 0x5af   :  { %v1166_v18 = vsel %vm299_vm3, %v4033_v13, 0.0 }
 0x5b1   :  { %1158 = vmax.xlane.f32.xlu0 %v1157_v11 }
 0x5b5   :  { %1167 = vadd.xlane.f32.xlu0 %v1166_v18 }
 0x5cb   :  { %3491 = vrot.lane.b32.xlu0 %v3915_v15, %s3741_s19 }
 0x5cf   :  { %1915 = vrot.lane.b32.xlu0 %v4013_v50, %s3737_s29 }
 0x601   :  { %v882_v19 = vpop.xlane.xlu0 %881 }
 0x602   :  { %3547 = vrcp.f32 %v882_v19 }
 0x605   :  { %v885_v20 = vpop.xlane.xlu0 %884 }
 0x606   :  { %3549 = vrcp.f32 %v885_v20 }
 0x609   :  { %v3482_v21 = vpop.permute.xlu0 %3481 }
 0x60a   :  { %v3484_v24 = vunpack.i.h.bf16 %v3482_v21  ;;  %v3483_v25 = vunpack.i.l.bf16 %v3482_v21 }
 0x60c   :  { %v3548_v26 = vpop.eup %3547  ;;  %v3351_v27 = vpack.c.bf16 %v3484_v24, %v3483_v25 }
 0x60d   :  { %v888_v28 = vmul.f32 %v3548_v26, %v3542_v62  ;;  %v1551_v31 = vpop.permute.xlu0 %1550 }
 0x60e   :  { %3353 = vmatprep.subr.msk.bf16.mxu1 %vm3930_vm2, %v3351_v27 }
 0x60f   :  { %3164 = vmatprep.mubr.msk.f32.mxu0 %vm299_vm3, %v888_v28  ;;  %3356 = vmatpush3.bf16.xpose.msk.msra.mxu1 %vm3930_vm2, %v3351_v27 }
 0x610   :  { %v3550_v15 = vpop.eup %3549  ;;  %3363 = vmatprep.subr.msk.bf16.mxu1 %vm3930_vm2, %v3361_v29 }
 0x611   :  { %v889_v30 = vmul.f32 %v3550_v15, %v3544_v0 }
 0x613   :  { %3165 = vmatmul.mubr.msk.f32.vlgmr.msra.gmra.mrb[4].mxu0 %vm299_vm3, %v889_v30 }
 0x614   :  { %3168 = vmatpush3.msra.mxu0 %v4040_v14 }
 0x616   :  { %3196 = vmatmul.mubr.msk.f32.vlgmr.msra.gmra.mrb[14].mxu1 %vm213_vm1, %v4013_v50 }
 0x617   :  { %3366 = vmatpush3.bf16.xpose.msk.msra.mxu1 %vm3930_vm2, %v3361_v29  ;;  %3209 = vmatprep.mubr.msk.f32.mxu1 %vm213_vm1, %v1549_v3 }
 0x61e   :  { %3210 = vmatmul.mubr.msk.f32.vlgmr.msra.gmra.mrb[16].mxu1 %vm213_vm1, %v1551_v31 }
 0x63e   :  { %v1159_v32 = vpop.xlane.xlu0 %1158 }
 0x63f   :  { %v1161_v33 = vsub.f32 %v1153_v9, %v1159_v32 }
 0x641   :  { %v1164_v34 = vmul.f32 1.442695, %v1161_v33 }
 0x642   :  { %v1168_v36 = vpop.xlane.xlu0 %1167 }
 0x643   :  { %3551 = vpow2.f32 %v1164_v34 }
 0x644   :  { %3553 = vrcp.f32 %v1168_v36 }
 0x646   :  { %v3492_v38 = vpop.permute.xlu0 %3491 }
 0x647   :  { %v3494_v39 = vunpack.i.h.bf16 %v3492_v38  ;;  %v3493_v40 = vunpack.i.l.bf16 %v3492_v38 }
 0x649   :  { %v3347_v41 = vpack.c.bf16 %v3494_v39, %v3493_v40 }
 0x64a   :  { %v1916_v59 = vpop.permute.xlu0 %1915 }
 0x64b   :  { %3348 = vmatprep.subr.bf16.mxu0 %v3347_v41 }
 0x64d   :  { %v3552_v42 = vpop.eup %3551 }
 0x64e   :  { %v1169_v43 = vsel %vm299_vm3, %v3552_v42, 0.0  ;;  %v3554_v52 = vpop.eup %3553 }
 0x64f   :  { %1170 = vadd.xlane.f32.xlu1 %v1169_v43  ;;  %v1174_v16 = vmul.f32 %v3554_v52, %v4033_v13 }
 0x660   :  { %3496 = vrot.lane.b32.xlu1 %v4019_v51, %s3735_s25 }
 0x664   :  { %1913 = vrot.lane.b32.xlu1 %v3986_v35, %s3737_s29 }
 0x6dc   :  { %v1171_v44 = vpop.xlane.xlu1 %1170 }
 0x6dd   :  { %3555 = vrcp.f32 %v1171_v44 }
 0x6e0   :  { %v3497_v45 = vpop.permute.xlu1 %3496 }
 0x6e1   :  { %v3499_v46 = vunpack.i.h.bf16 %v3497_v45  ;;  %v3498_v47 = vunpack.i.l.bf16 %v3497_v45 }
 0x6e3   :  { %v3371_v48 = vpack.c.bf16 %v3499_v46, %v3498_v47 }
 0x6e4   :  { %v1914_v49 = vpop.permute.xlu1 %1913 }
 0x6e5   :  { %3373 = vmatprep.subr.msk.bf16.mxu1 %vm3930_vm2, %v3371_v48  ;;  %3233 = vmatprep.mubr.msk.f32.mxu1 %vm213_vm1, %v1914_v49 }
 0x6e6   :  { %v3166_v53 = vpop.f32.mrb[4].mxu0  ;;  %3376 = vmatpush3.bf16.xpose.msk.msra.mxu1 %vm3930_vm2, %v3371_v48 }
 0x6e7   :  { %v968_v10 = vpop.f32.mrb[5].mxu0  ;;  %v3556_v54 = vpop.eup %3555 }
 0x6e8   :  { %3169 = vmatprep.mubr.msk.f32.mxu0 %vm213_vm1, %v968_v10  ;;  %v1175_v60 = vmul.f32 %v3556_v54, %v3552_v42 }
 0x6e9   :  { %3170 = vmatmul.mubr.msk.f32.vlgmr.msra.gmra.mrb[2].mxu0 %vm213_vm1, %v3166_v53  ;;  %v3197_v55 = vpop.f32.mrb[14].mxu1 }
 0x6ea   :  { %3350 = vmatpush3.bf16.msra.mxu0 %v3347_v41  ;;  %v1437_v56 = vmul.f32 0.35355338, %v3197_v55  ;;  %3183 = vmatprep.mubr.msk.f32.mxu0 %vm299_vm3, %v1174_v16  ;;  %v1427_v57 = vpop.f32.mrb[15].mxu1 }
 0x6eb   :  { %v1436_v58 = vmul.f32 0.35355338, %v1427_v57  ;;  %3186 = vmatprep.subr.mxu0 %v4085_v6 }
 0x6ec   :  { %v1441_v61 = vsel %vm299_vm3, %v1437_v56, -inf }
 0x6ed   :  { %3234 = vmatmul.mubr.msk.f32.vlgmr.msra.gmra.mrb[18].mxu1 %vm213_vm1, %v1916_v59  ;;  %1442 = vmax.xlane.f32.xlu0 %v1441_v61  ;;  %v1438_v62 = vsel %vm299_vm3, %v1436_v58, -inf }
 0x6ee   :  { %3184 = vmatmul.mubr.msk.f32.vlgmr.msra.gmra.mrb[6].mxu0 %vm299_vm3, %v1175_v60  ;;  %1439 = vmax.xlane.f32.xlu1 %v1438_v62 }
 0x6ef   :  { %3187 = vmatpush3.msra.mxu0 %v4085_v6 }
 0x6f1   :  { %v3211_v63 = vpop.f32.mrb[16].mxu1 }
 0x6f2   :  { %v1640_v0 = vmul.f32 0.35355338, %v3211_v63  ;;  %v1630_v1 = vpop.f32.mrb[17].mxu1 }
 0x6f3   :  { %v1639_v2 = vmul.f32 0.35355338, %v1630_v1 }
 0x6f4   :  { %v1644_v3 = vsel %vm299_vm3, %v1640_v0, -inf }
 0x6f5   :  { %1645 = vmax.xlane.f32.xlu1 %v1644_v3  ;;  %v1641_v4 = vsel %vm299_vm3, %v1639_v2, -inf }
 0x6f6   :  { %1642 = vmax.xlane.f32.xlu0 %v1641_v4 }
 0x77a   :  { %v1443_v8 = vpop.xlane.xlu0 %1442 }
 0x77b   :  { %v1445_v9 = vsub.f32 %v1437_v56, %v1443_v8  ;;  %v1440_v11 = vpop.xlane.xlu1 %1439 }
 0x77c   :  { %v1444_v13 = vsub.f32 %v1436_v58, %v1440_v11 }
 0x77d   :  { %v1448_v18 = vmul.f32 1.442695, %v1445_v9 }
 0x77e   :  { %v1446_v19 = vmul.f32 1.442695, %v1444_v13 }
 0x77f   :  { %3557 = vpow2.f32 %v1448_v18 }
 0x780   :  { %3559 = vpow2.f32 %v1446_v19  ;;  %v4133_v19 = vld [vmem:[%s4256_s4] ss:$0 sm:$0xff] }
 0x782   :  { %v1646_v20 = vpop.xlane.xlu1 %1645 }
 0x783   :  { %v1648_v21 = vsub.f32 %v1640_v0, %v1646_v20  ;;  %v1643_v12 = vpop.xlane.xlu0 %1642 }
 0x784   :  { %v1647_v23 = vsub.f32 %v1639_v2, %v1643_v12 }
 0x785   :  { %v1651_v24 = vmul.f32 1.442695, %v1648_v21 }
 0x786   :  { %v1649_v25 = vmul.f32 1.442695, %v1647_v23 }
 0x787   :  { %3561 = vpow2.f32 %v1651_v24 }
 0x788   :  { %3563 = vpow2.f32 %v1649_v25 }
 0x789   :  { %v3558_v26 = vpop.eup %3557 }
 0x78a   :  { %v3560_v27 = vpop.eup %3559  ;;  %v1453_v28 = vsel %vm299_vm3, %v3558_v26, 0.0 }
 0x78b   :  { %1454 = vadd.xlane.f32.xlu1 %v1453_v28  ;;  %v1450_v29 = vsel %vm299_vm3, %v3560_v27, 0.0 }
 0x78c   :  { %1451 = vadd.xlane.f32.xlu0 %v1450_v29 }
 0x791   :  { %v4091_v15 = vpop.eup %3561 }
 0x792   :  { %v3564_v30 = vpop.eup %3563  ;;  %v1656_v31 = vsel %vm299_vm3, %v4091_v15, 0.0 }
 0x793   :  { %1657 = vadd.xlane.f32.xlu1 %v1656_v31  ;;  %v1653_v32 = vsel %vm299_vm3, %v3564_v30, 0.0 }
 0x794   :  { %1654 = vadd.xlane.f32.xlu0 %v1653_v32 }
 0x7a4   :  { %3506 = vrot.lane.b32.xlu1 %v4019_v51, %s3736_s27 }
 0x7a8   :  { %3511 = vrot.lane.b32.xlu1 %v4019_v51, %s3739_s14 }
 0x7aa   :  { %3501 = vrot.lane.b32.xlu0 %v4019_v51, %s3734_s24 }
 0x7ac   :  { %2201 = vrot.lane.b32.xlu1 %v4013_v50, %s3738_s30 }
 0x7ae   :  { %2199 = vrot.lane.b32.xlu0 %v3986_v35, %s3738_s30 }
 0x7c0   :  { %v3235_v33 = vpop.f32.mrb[18].mxu1 }
 0x7c1   :  { %v3185_v34 = vpop.f32.mrb[6].mxu0  ;;  %v1995_v36 = vpop.f32.mrb[19].mxu1  ;;  %v2005_v40 = vmul.f32 0.35355338, %v3235_v33 }
 0x7c2   :  { %v1254_v38 = vpop.f32.mrb[7].mxu0  ;;  %v2004_v39 = vmul.f32 0.35355338, %v1995_v36 }
 0x7c3   :  { %3188 = vmatprep.mubr.msk.f32.mxu0 %vm213_vm1, %v1254_v38  ;;  %v2009_v42 = vsel %vm299_vm3, %v2005_v40, -inf }
 0x7c4   :  { %3189 = vmatmul.mubr.msk.f32.vlgmr.msra.gmra.mrb[2].mxu0 %vm213_vm1, %v3185_v34  ;;  %v2006_v41 = vsel %vm299_vm3, %v2004_v39, -inf }
 0x7cd   :  { %2007 = vmax.xlane.f32.xlu0 %v2006_v41 }
 0x7d0   :  { %2010 = vmax.xlane.f32.xlu1 %v2009_v42 }
 0x7e1   :  { %3516 = vrot.lane.b32.xlu1 %v4019_v51, %s3740_s26 }
 0x7e5   :  { %3521 = vrot.lane.b32.xlu1 %v4019_v51, %s3741_s19 }
 0x818   :  { %v1455_v50 = vpop.xlane.xlu1 %1454 }
 0x819   :  { %v1452_v35 = vpop.xlane.xlu0 %1451 }
 0x81a   :  { %3565 = vrcp.f32 %v1452_v35 }
 0x81b   :  { %3567 = vrcp.f32 %v1455_v50 }
 0x820   :  { %v1658_v43 = vpop.xlane.xlu1 %1657 }
 0x821   :  { %v1655_v44 = vpop.xlane.xlu0 %1654 }
 0x822   :  { %3569 = vrcp.f32 %v1655_v44 }
 0x823   :  { %3571 = vrcp.f32 %v1658_v43 }
 0x824   :  { %v3566_v45 = vpop.eup %3565  ;;  %v3507_v46 = vpop.permute.xlu1 %3506 }
 0x825   :  { %v3502_v47 = vpop.permute.xlu0 %3501  ;;  %v1458_v48 = vmul.f32 %v3566_v45, %v3560_v27  ;;  %v3509_v49 = vunpack.i.h.bf16 %v3507_v46  ;;  %v3508_v52 = vunpack.i.l.bf16 %v3507_v46  ;;  %v3568_v54 = vpop.eup %3567 }
 0x826   :  { %v3504_v53 = vunpack.i.h.bf16 %v3502_v47  ;;  %v3503_v10 = vunpack.i.l.bf16 %v3502_v47  ;;  %v1459_v61 = vmul.f32 %v3568_v54, %v3558_v26 }
 0x827   :  { %3202 = vmatprep.mubr.msk.f32.mxu0 %vm299_vm3, %v1458_v48  ;;  %v3367_v58 = vpack.c.bf16 %v3509_v49, %v3508_v52 }
 0x828   :  { %v3357_v16 = vpack.c.bf16 %v3504_v53, %v3503_v10  ;;  %v3512_v51 = vpop.permute.xlu1 %3511 }
 0x829   :  { %v3514_v55 = vunpack.i.h.bf16 %v3512_v51  ;;  %v3513_v56 = vunpack.i.l.bf16 %v3512_v51  ;;  %v2200_v57 = vpop.permute.xlu0 %2199 }
 0x82a   :  { %3358 = vmatprep.subr.bf16.mxu0 %v3357_v16  ;;  %3252 = vmatprep.mubr.msk.f32.mxu1 %vm213_vm1, %v2200_v57 }
 0x82b   :  { %v3381_v59 = vpack.c.bf16 %v3514_v55, %v3513_v56  ;;  %3360 = vmatpush3.bf16.msra.mxu0 %v3357_v16 }
 0x82c   :  { %v3570_v60 = vpop.eup %3569  ;;  %3368 = vmatprep.subr.bf16.mxu0 %v3367_v58  ;;  %v2202_v1 = vpop.permute.xlu1 %2201 }
 0x82d   :  { %v3572_v62 = vpop.eup %3571  ;;  %3383 = vmatprep.subr.msk.bf16.mxu1 %vm3930_vm2, %v3381_v59  ;;  %v1661_v63 = vmul.f32 %v3570_v60, %v3564_v30 }
 0x82e   :  { %3203 = vmatmul.mubr.msk.f32.vlgmr.msra.gmra.mrb[8].mxu0 %vm299_vm3, %v1459_v61  ;;  %3386 = vmatpush3.bf16.xpose.msk.msra.mxu1 %vm3930_vm2, %v3381_v59  ;;  %v1662_v0 = vmul.f32 %v3572_v62, %v4091_v15 }
 0x82f   :  { %3370 = vmatpush3.bf16.msra.mxu0 %v3367_v58  ;;  %3216 = vmatprep.mubr.msk.f32.mxu0 %vm299_vm3, %v1661_v63 }
 0x830   :  { %3219 = vmatprep.subr.mxu0 %v3994_v37 }
 0x832   :  { %3217 = vmatmul.mubr.msk.f32.vlgmr.msra.gmra.mrb[10].mxu0 %vm299_vm3, %v1662_v0 }
 0x833   :  { %3220 = vmatpush3.msra.mxu0 %v3994_v37 }
 0x834   :  { %3224 = vmatprep.subr.mxu0 %v4001_v17 }
 0x835   :  { %3253 = vmatmul.mubr.msk.f32.vlgmr.msra.gmra.mrb[20].mxu1 %vm213_vm1, %v2202_v1 }
 0x85a   :  { %v2008_v2 = vpop.xlane.xlu0 %2007 }
 0x85b   :  { %v2012_v3 = vsub.f32 %v2004_v39, %v2008_v2 }
 0x85d   :  { %v2014_v22 = vmul.f32 1.442695, %v2012_v3  ;;  %v2011_v4 = vpop.xlane.xlu1 %2010 }
 0x85e   :  { %v2013_v8 = vsub.f32 %v2005_v40, %v2011_v4 }
 0x85f   :  { %3573 = vpow2.f32 %v2014_v22 }
 0x860   :  { %v2016_v9 = vmul.f32 1.442695, %v2013_v8 }
 0x861   :  { %v3517_v26 = vpop.permute.xlu1 %3516 }
 0x862   :  { %3575 = vpow2.f32 %v2016_v9  ;;  %v3519_v15 = vunpack.i.h.bf16 %v3517_v26  ;;  %v3518_v30 = vunpack.i.l.bf16 %v3517_v26 }
 0x864   :  { %v3377_v33 = vpack.c.bf16 %v3519_v15, %v3518_v30  ;;  %v2576_v15 = vld [vmem:[#allocation7 + $0x8] sm:$0xff] }
 0x865   :  { %v3522_v41 = vpop.permute.xlu1 %3521 }
 0x866   :  { %v3524_v35 = vunpack.i.h.bf16 %v3522_v41  ;;  %v3523_v50 = vunpack.i.l.bf16 %v3522_v41 }
 0x868   :  { %v3387_v45 = vpack.c.bf16 %v3524_v35, %v3523_v50 }
 0x869   :  { %v3574_v11 = vpop.eup %3573 }
 0x86a   :  { %v2018_v13 = vsel %vm299_vm3, %v3574_v11, 0.0 }
 0x86b   :  { %2019 = vadd.xlane.f32.xlu0 %v2018_v13  ;;  %v3605_v13 = vld [vmem:[%s4252_s0 + $0x10] sm:$0xff] }
 0x86c   :  { %v3576_v18 = vpop.eup %3575 }
 0x86d   :  { %v2021_v37 = vsel %vm299_vm3, %v3576_v18, 0.0 }
 0x86f   :  { %2022 = vadd.xlane.f32.xlu0 %v2021_v37 }
 0x897   :  { %v3190_v20 = vpop.f32.mrb[2].mxu0 }
 0x898   :  { %v2493_v21 = vadd.f32 %v3190_v20, %v4133_v19  ;;  %v1336_v12 = vpop.f32.mrb[3].mxu0 }
 0x899   :  { %v2492_v16 = vadd.f32 %v4133_v19, %v1336_v12 }
 0x89a   :  { %v4137_v23 = vadd.f32 %v2493_v21, %v3886_v7  ;;  %v3606_v21 = vld [vmem:[%s4252_s0 + $0x18] sm:$0xff] }
 0x89c   :  { %v2503_v24 = vsel %vm109_vm0, %v4137_v23, 0.0 }
 0x89d   :  { %2504 = vadd.xlane.f32.xlu1 %v2503_v24 }
 0x8f8   :  { %v2020_v25 = vpop.xlane.xlu0 %2019 }
 0x8f9   :  { %3577 = vrcp.f32 %v2020_v25 }
 0x8fc   :  { %v2023_v28 = vpop.xlane.xlu0 %2022 }
 0x8fd   :  { %3579 = vrcp.f32 %v2023_v28 }
 0x901   :  { %v3204_v27 = vpop.f32.mrb[8].mxu0 }
 0x902   :  { %v1538_v29 = vpop.f32.mrb[9].mxu0 }
 0x903   :  { %v3578_v40 = vpop.eup %3577 }
 0x904   :  { %v2026_v44 = vmul.f32 %v3578_v40, %v3574_v11 }
 0x905   :  { %v3218_v31 = vpop.f32.mrb[10].mxu0 }
 0x906   :  { %v1741_v32 = vpop.f32.mrb[11].mxu0 }
 0x907   :  { %3221 = vmatprep.mubr.msk.f32.mxu0 %vm213_vm1, %v1741_v32  ;;  %v3580_v42 = vpop.eup %3579  ;;  %v2578_v32 = vld [vmem:[#allocation7 + $0x18] sm:$0xff] }
 0x908   :  { %3222 = vmatmul.mubr.msk.f32.vlgmr.msra.gmra.mrb[12].mxu0 %vm213_vm1, %v3218_v31  ;;  %v3254_v7 = vpop.f32.mrb[20].mxu1  ;;  %v2577_v31 = vld [vmem:[#allocation7 + $0x10] sm:$0xff] }
 0x909   :  { %3225 = vmatpush3.msra.mxu0 %v4001_v17  ;;  %3226 = vmatprep.mubr.msk.f32.mxu0 %vm213_vm1, %v1538_v29  ;;  %v2281_v34 = vpop.f32.mrb[21].mxu1  ;;  %v2291_v38 = vmul.f32 0.35355338, %v3254_v7  ;;  %v2027_v17 = vmul.f32 %v3580_v42, %v3576_v18  ;;  %v2575_v29 = vld [vmem:[#allocation7] sm:$0xff] }
 0x90a   :  { %3378 = vmatprep.subr.bf16.mxu0 %v3377_v33  ;;  %v2290_v36 = vmul.f32 0.35355338, %v2281_v34  ;;  %v3391_v30 = vpack.c.bf16 %v2576_v15, %v2575_v29 }
 0x90b   :  { %v2295_v43 = vsel %vm299_vm3, %v2291_v38, -inf }
 0x90c   :  { %v2292_v39 = vsel %vm299_vm3, %v2290_v36, -inf  ;;  %3392 = vmatprep.subr.bf16.mxu1 %v3391_v30 }
 0x90d   :  { %2293 = vmax.xlane.f32.xlu0 %v2292_v39  ;;  %3394 = vmatpush3.bf16.msra.mxu1 %v3391_v30 }
 0x910   :  { %3227 = vmatmul.mubr.msk.f32.vlgmr.msra.gmra.mrb[12].mxu0 %vm213_vm1, %v3204_v27 }
 0x911   :  { %3380 = vmatpush3.bf16.msra.mxu0 %v3377_v33  ;;  %2296 = vmax.xlane.f32.xlu0 %v2295_v43  ;;  %v3395_v33 = vpack.c.bf16 %v2578_v32, %v2577_v31 }
 0x912   :  { %3240 = vmatprep.mubr.msk.f32.mxu0 %vm299_vm3, %v2026_v44  ;;  %3243 = vmatprep.subr.mxu0 %v4040_v14 }
 0x913   :  { %3396 = vmatprep.subr.bf16.mxu1 %v3395_v33 }
 0x914   :  { %3241 = vmatmul.mubr.msk.f32.vlgmr.msra.gmra.mrb[14].mxu0 %vm299_vm3, %v2027_v17  ;;  %3398 = vmatpush3.bf16.msra.mxu1 %v3395_v33 }
 0x915   :  { %3244 = vmatpush3.msra.mxu0 %v4040_v14  ;;  %v2496_v14 = vadd.f32 %v2492_v16, %v3879_v5 }
 0x916   :  { %3388 = vmatprep.subr.bf16.mxu0 %v3387_v45 }
 0x917   :  { %v2500_v56 = vsel %vm109_vm0, %v2496_v14, 0.0 }
 0x92a   :  { %v2505_v11 = vpop.xlane.xlu1 %2504 }
 0x92b   :  { %v2514_v18 = vmul.f32 0.03125, %v2505_v11 }
 0x92d   :  { %v2518_v24 = vsub.f32 %v4137_v23, %v2514_v18 }
 0x92f   :  { %v2522_v27 = vmul.f32 %v2518_v24, %v2518_v24 }
 0x931   :  { %v2528_v28 = vsel %vm109_vm0, %v2522_v27, 0.0 }
 0x99a   :  { %v2294_v46 = vpop.xlane.xlu0 %2293 }
 0x99b   :  { %v2298_v47 = vsub.f32 %v2290_v36, %v2294_v46 }
 0x99d   :  { %v2300_v48 = vmul.f32 1.442695, %v2298_v47 }
 0x99e   :  { %v2297_v49 = vpop.xlane.xlu0 %2296 }
 0x99f   :  { %3581 = vpow2.f32 %v2300_v48  ;;  %v2299_v52 = vsub.f32 %v2291_v38, %v2297_v49  ;;  %v2971_v48 = vld [vmem:[#allocation2] ss:$0 sm:$0xff] }
 0x9a1   :  { %v2302_v53 = vmul.f32 1.442695, %v2299_v52  ;;  %v2972_v52 = vld [vmem:[#allocation5] ss:$0 sm:$0xff] }
 0x9a3   :  { %3583 = vpow2.f32 %v2302_v53 }
 0x9a9   :  { %v3582_v10 = vpop.eup %3581 }
 0x9aa   :  { %v2304_v51 = vsel %vm299_vm3, %v3582_v10, 0.0 }
 0x9ab   :  { %2305 = vadd.xlane.f32.xlu0 %v2304_v51 }
 0x9ad   :  { %v3584_v54 = vpop.eup %3583 }
 0x9ae   :  { %v2307_v55 = vsel %vm299_vm3, %v3584_v54, 0.0 }
 0x9af   :  { %2308 = vadd.xlane.f32.xlu0 %v2307_v55 }
 0x9b3   :  { %2501 = vadd.xlane.f32.xlu0 %v2500_v56  ;;  %v2688_v56 = vld [vmem:[%s4261_s9 + $0x8] sm:$0xff] }
 0x9e7   :  { %v3242_v57 = vpop.f32.mrb[14].mxu0 }
 0x9e8   :  { %v2106_v58 = vpop.f32.mrb[15].mxu0 }
 0x9e9   :  { %3245 = vmatprep.mubr.msk.f32.mxu0 %vm213_vm1, %v2106_v58 }
 0x9ea   :  { %3246 = vmatmul.mubr.msk.f32.vlgmr.msra.gmra.mrb[12].mxu0 %vm213_vm1, %v3242_v57  ;;  %v2689_v57 = vld [vmem:[%s4261_s9 + $0x10] sm:$0xff] }
 0x9eb   :  { %3390 = vmatpush3.bf16.msra.mxu0 %v3387_v45 }
 0x9ec   :  { %3262 = vmatprep.subr.mxu0 %v4085_v6 }
 0xa38   :  { %v2306_v59 = vpop.xlane.xlu0 %2305 }
 0xa39   :  { %3585 = vrcp.f32 %v2306_v59  ;;  %v2690_v59 = vld [vmem:[%s4261_s9 + $0x18] sm:$0xff] }
 0xa3c   :  { %v2309_v60 = vpop.xlane.xlu0 %2308 }
 0xa3d   :  { %3587 = vrcp.f32 %v2309_v60  ;;  %v3403_v60 = vpack.c.bf16 %v2690_v59, %v2689_v57 }
 0xa40   :  { %v2502_v2 = vpop.xlane.xlu0 %2501 }
 0xa41   :  { %v2513_v4 = vmul.f32 0.03125, %v2502_v2 }
 0xa43   :  { %v3586_v61 = vpop.eup %3585  ;;  %v2517_v37 = vsub.f32 %v2496_v14, %v2513_v4  ;;  %v2687_v14 = vld [vmem:[%s4261_s9] sm:$0xff] }
 0xa44   :  { %v2312_v62 = vmul.f32 %v3586_v61, %v3582_v10  ;;  %v3399_v58 = vpack.c.bf16 %v2688_v56, %v2687_v14  ;;  %v2691_v61 = vld [vmem:[%s4261_s9 + $0x20] sm:$0xff] }
 0xa45   :  { %v2521_v25 = vmul.f32 %v2517_v37, %v2517_v37 }
 0xa46   :  { %3259 = vmatprep.mubr.msk.f32.mxu0 %vm299_vm3, %v2312_v62  ;;  %v2692_v62 = vld [vmem:[%s4261_s9 + $0x28] sm:$0xff] }
 0xa47   :  { %v3588_v5 = vpop.eup %3587  ;;  %v2525_v26 = vsel %vm109_vm0, %v2521_v25, 0.0 }
 0xa48   :  { %v2313_v63 = vmul.f32 %v3588_v5, %v3584_v54  ;;  %v3407_v5 = vpack.c.bf16 %v2692_v62, %v2691_v61 }
 0xa4a   :  { %3260 = vmatmul.mubr.msk.f32.vlgmr.msra.gmra.mrb[16].mxu0 %vm299_vm3, %v2313_v63  ;;  %v2693_v63 = vld [vmem:[%s4261_s9 + $0x30] sm:$0xff] }
 0xa4b   :  { %3263 = vmatpush3.msra.mxu0 %v4085_v6 }
 0xa4c   :  { %3400 = vmatprep.subr.bf16.mxu0 %v3399_v58 }
 0xb1d   :  { %v3261_v0 = vpop.f32.mrb[16].mxu0 }
 0xb1e   :  { %v2392_v1 = vpop.f32.mrb[17].mxu0 }
 0xb1f   :  { %3264 = vmatprep.mubr.msk.f32.mxu0 %vm213_vm1, %v2392_v1 }
 0xb20   :  { %3265 = vmatmul.mubr.msk.f32.vlgmr.msra.gmra.mrb[12].mxu0 %vm213_vm1, %v3261_v0  ;;  %v2694_v0 = vld [vmem:[%s4261_s9 + $0x38] sm:$0xff] }
 0xb21   :  { %3402 = vmatpush3.bf16.msra.mxu0 %v3399_v58  ;;  %v3411_v1 = vpack.c.bf16 %v2694_v0, %v2693_v63 }
 0xb22   :  { %3404 = vmatprep.subr.bf16.mxu0 %v3403_v60 }
 0xb25   :  { %3406 = vmatpush3.bf16.msra.mxu0 %v3403_v60 }
 0xb26   :  { %3408 = vmatprep.subr.bf16.mxu0 %v3407_v5 }
 0xb29   :  { %3410 = vmatpush3.bf16.msra.mxu0 %v3407_v5 }
 0xb2a   :  { %3412 = vmatprep.subr.bf16.mxu0 %v3411_v1 }
 0xb2d   :  { %3414 = vmatpush3.bf16.msra.mxu0 %v3411_v1 }
 0xbf3   :  { %v3266_v3 = vpop.f32.mrb[12].mxu0 }
 0xbf4   :  { %v2474_v22 = vpop.f32.mrb[13].mxu0  ;;  %v2495_v8 = vadd.f32 %v3266_v3, %v4133_v19 }
 0xbf5   :  { %v2494_v9 = vadd.f32 %v4133_v19, %v2474_v22 }
 0xbf6   :  { %v2499_v12 = vadd.f32 %v3606_v21, %v2495_v8 }
 0xbf7   :  { %v2498_v6 = vadd.f32 %v3605_v13, %v2494_v9 }
 0xbf8   :  { %v2509_v19 = vsel %vm109_vm0, %v2499_v12, 0.0 }
 0xbf9   :  { %v2506_v20 = vsel %vm109_vm0, %v2498_v6, 0.0 }
 0xbfa   :  { %2507 = vadd.xlane.f32.xlu0 %v2506_v20 }
 0xbfe   :  { %2510 = vadd.xlane.f32.xlu0 %v2509_v19 }
 0xc02   :  { %2526 = vadd.xlane.f32.xlu0 %v2525_v26 }
 0xc06   :  { %2529 = vadd.xlane.f32.xlu0 %v2528_v28 }
 0xc87   :  { %v2508_v23 = vpop.xlane.xlu0 %2507 }
 0xc88   :  { %v2515_v7 = vmul.f32 0.03125, %v2508_v23 }
 0xc8a   :  { %v2519_v34 = vsub.f32 %v2498_v6, %v2515_v7  ;;  %v2978_v7 = vld [vmem:[%s4262_s10] ss:$0 sm:$0xff] }
 0xc8b   :  { %v2511_v36 = vpop.xlane.xlu0 %2510 }
 0xc8c   :  { %v2516_v38 = vmul.f32 0.03125, %v2511_v36  ;;  %v2523_v39 = vmul.f32 %v2519_v34, %v2519_v34 }
 0xc8e   :  { %v2520_v40 = vsub.f32 %v2499_v12, %v2516_v38  ;;  %v2531_v41 = vsel %vm109_vm0, %v2523_v39, 0.0 }
 0xc8f   :  { %2532 = vadd.xlane.f32.xlu0 %v2531_v41  ;;  %v2527_v42 = vpop.xlane.xlu0 %2526 }
 0xc90   :  { %v2537_v35 = vmul.f32 0.03125, %v2527_v42  ;;  %v2524_v50 = vmul.f32 %v2520_v40, %v2520_v40 }
 0xc92   :  { %v2541_v43 = vadd.f32 1e-05, %v2537_v35  ;;  %v2534_v44 = vsel %vm109_vm0, %v2524_v50, 0.0 }
 0xc93   :  { %2535 = vadd.xlane.f32.xlu0 %v2534_v44  ;;  %v2530_v17 = vpop.xlane.xlu0 %2529 }
 0xc94   :  { %3589 = vrsqrt.f32 %v2541_v43  ;;  %v2538_v45 = vmul.f32 0.03125, %v2530_v17 }
 0xc96   :  { %v2542_v46 = vadd.f32 1e-05, %v2538_v45 }
 0xc98   :  { %3591 = vrsqrt.f32 %v2542_v46 }
 0xc9e   :  { %v3590_v47 = vpop.eup %3589 }
 0xc9f   :  { %v2549_v49 = vmul.f32 %v3590_v47, %v2517_v37 }
 0xca1   :  { %v2560_v53 = vmul.f32 %v2971_v48, %v2549_v49 }
 0xca2   :  { %v3592_v10 = vpop.eup %3591 }
 0xca3   :  { %v2550_v16 = vmul.f32 %v3592_v10, %v2518_v24  ;;  %v4180_v51 = vadd.f32 %v2972_v52, %v2560_v53  ;;  %v2973_v24 = vld [vmem:[#allocation8] ss:$0 sm:$0xff] }
 0xca5   :  { %3275 = vmatprep.mubr.msk.f32.mxu1 %vm109_vm0, %v4180_v51  ;;  %v2561_v54 = vmul.f32 %v2971_v48, %v2550_v16 }
 0xca7   :  { %v4184_v55 = vadd.f32 %v2972_v52, %v2561_v54 }
 0xca9   :  { %3276 = vmatmul.mubr.msk.f32.vlgmr.msra.gmra.mrb[22].mxu1 %vm109_vm0, %v4184_v55 }
 0xd1c   :  { %v2533_v2 = vpop.xlane.xlu0 %2532 }
 0xd1d   :  { %v2539_v3 = vmul.f32 0.03125, %v2533_v2 }
 0xd1f   :  { %v2543_v22 = vadd.f32 1e-05, %v2539_v3 }
 0xd20   :  { %v2536_v4 = vpop.xlane.xlu0 %2535 }
 0xd21   :  { %3593 = vrsqrt.f32 %v2543_v22  ;;  %v2540_v8 = vmul.f32 0.03125, %v2536_v4 }
 0xd23   :  { %v2544_v9 = vadd.f32 1e-05, %v2540_v8 }
 0xd25   :  { %3595 = vrsqrt.f32 %v2544_v9 }
 0xd2b   :  { %v3594_v11 = vpop.eup %3593 }
 0xd2c   :  { %v2551_v13 = vmul.f32 %v3594_v11, %v2519_v34 }
 0xd2e   :  { %v2562_v6 = vmul.f32 %v2971_v48, %v2551_v13  ;;  %v2983_v13 = vld [vmem:[%s4263_s11] ss:$0 sm:$0xff]  ;;  %s3742_s11 = smov [#allocation10]  }
 0xd2f   :  { %v3596_v18 = vpop.eup %3595 }
 0xd30   :  { %v2573_v37 = vadd.f32 %v2972_v52, %v2562_v6  ;;  %v2552_v20 = vmul.f32 %v3596_v18, %v2520_v40  ;;  %v2984_v18 = vld [vmem:[%s4264_s12] ss:$0 sm:$0xff]  ;;  %s2887_s12 = sshll.u32 %s3742_s11, 4  ;;  %s2888_s12 = int_to_ptr.vmem [resolvable:$true] %s2887_s12 }
 0xd31   :  { %s3695_s4 = scalar_lea.vmem %s2888_s12, 512  ;;  %p3700_p5 = scmp.lt.s32.totalorder %s2888_s12, %s2888_s12 }
 0xd32   :  { %3278 = vmatprep.mubr.msk.f32.mxu1 %vm109_vm0, %v2573_v37  ;;  %v2563_v21 = vmul.f32 %v2971_v48, %v2552_v20  ;;  %p3696_p4 = scmp.ne.s32.totalorder %s2888_s12, %s3695_s4  ;;  %p3701_p6 = scmp.lt.s32.totalorder %s3695_s4, %s3695_s4 }
 0xd34   :  { %v2574_v12 = vadd.f32 %v2972_v52, %v2563_v21  ;;  %p3702_p7 = por %p3701_p6, %p3700_p5 }
 0xd36   :  { %3279 = vmatmul.mubr.msk.f32.gmra.mrb[24].mxu1 %vm109_vm0, %v2574_v12  ;;  %p3703_p8 = pnand %p3702_p7, %p3696_p4 }
 0xd7c   :  { %v3277_v19 = vpop.f32.mrb[22].mxu1 }
 0xd7d   :  { %v2670_v25 = vadd.f32 %v3277_v19, %v2973_v24  ;;  %v2664_v26 = vpop.f32.mrb[23].mxu1 }
 0xd7e   :  { %v2665_v27 = vadd.f32 %v2973_v24, %v2664_v26 }
 0xd7f   :  { %v2684_v29 = vmax.f32 %v2670_v25, 0.0 }
 0xd80   :  { %v2683_v28 = vmax.f32 %v2665_v27, 0.0 }
 0xd82   :  { %3297 = vmatprep.mubr.msk.f32.mxu0 %vm2702_vm4, %v2683_v28 }
 0xd83   :  { %3298 = vmatmul.mubr.msk.f32.vlgmr.msra.gmra.mrb[18].mxu0 %vm2702_vm4, %v2684_v29 }
 0xe09   :  { %v3280_v15 = vpop.f32.mrb[24].mxu1 }
 0xe0a   :  { %v2680_v30 = vadd.f32 %v3280_v15, %v2973_v24  ;;  %v2674_v31 = vpop.f32.mrb[25].mxu1 }
 0xe0b   :  { %v2675_v32 = vadd.f32 %v2973_v24, %v2674_v31 }
 0xe0c   :  { %v2686_v23 = vmax.f32 %v2680_v30, 0.0 }
 0xe0d   :  { %v2685_v33 = vmax.f32 %v2675_v32, 0.0 }
 0xe0f   :  { %3300 = vmatprep.mubr.msk.f32.mxu0 %vm2702_vm4, %v2685_v33 }
 0xe10   :  { %3301 = vmatmul.mubr.msk.f32.gmra.mrb[20].mxu0 %vm2702_vm4, %v2686_v23 }
 0xe56   :  { %v3299_v34 = vpop.f32.mrb[18].mxu0 }
 0xe57   :  { %v2781_v36 = vpop.f32.mrb[19].mxu0  ;;  %v2787_v38 = vadd.f32 %v3299_v34, %v2978_v7 }
 0xe58   :  { %v2782_v39 = vadd.f32 %v2978_v7, %v2781_v36 }
 0xe59   :  { %v2801_v42 = vadd.f32 %v2787_v38, %v4184_v55 }
 0xe5a   :  { %v2800_v40 = vadd.f32 %v2782_v39, %v4180_v51 }
 0xe5b   :  { %v2807_v35 = vsel %vm109_vm0, %v2801_v42, 0.0 }
 0xe5c   :  { %v2804_v41 = vsel %vm109_vm0, %v2800_v40, 0.0 }
 0xe5d   :  { %2805 = vadd.xlane.f32.xlu0 %v2804_v41 }
 0xe61   :  { %2808 = vadd.xlane.f32.xlu0 %v2807_v35 }
 0xee3   :  { %v3302_v50 = vpop.f32.mrb[20].mxu0 }
 0xee4   :  { %v2797_v43 = vadd.f32 %v3302_v50, %v2978_v7  ;;  %v2791_v44 = vpop.f32.mrb[21].mxu0 }
 0xee5   :  { %v2792_v17 = vadd.f32 %v2978_v7, %v2791_v44 }
 0xee6   :  { %v2803_v45 = vadd.f32 %v2797_v43, %v2574_v12 }
 0xee7   :  { %v2802_v46 = vadd.f32 %v2792_v17, %v2573_v37 }
 0xee8   :  { %v2813_v47 = vsel %vm109_vm0, %v2803_v45, 0.0 }
 0xee9   :  { %2814 = vadd.xlane.f32.xlu1 %v2813_v47  ;;  %v2810_v48 = vsel %vm109_vm0, %v2802_v46, 0.0 }
 0xeea   :  { %2811 = vadd.xlane.f32.xlu0 %v2810_v48  ;;  %v2806_v49 = vpop.xlane.xlu0 %2805 }
 0xeeb   :  { %v2816_v52 = vmul.f32 0.03125, %v2806_v49 }
 0xeed   :  { %v2820_v53 = vsub.f32 %v2800_v40, %v2816_v52 }
 0xeee   :  { %v2809_v10 = vpop.xlane.xlu0 %2808 }
 0xeef   :  { %v2817_v16 = vmul.f32 0.03125, %v2809_v10  ;;  %v2824_v51 = vmul.f32 %v2820_v53, %v2820_v53 }
 0xef1   :  { %v2821_v54 = vsub.f32 %v2801_v42, %v2817_v16  ;;  %v2828_v55 = vsel %vm109_vm0, %v2824_v51, 0.0 }
 0xef2   :  { %2829 = vadd.xlane.f32.xlu0 %v2828_v55 }
 0xef3   :  { %v2825_v14 = vmul.f32 %v2821_v54, %v2821_v54 }
 0xef5   :  { %v2831_v56 = vsel %vm109_vm0, %v2825_v14, 0.0 }
 0xef6   :  { %2832 = vadd.xlane.f32.xlu1 %v2831_v56 }
 0xf76   :  { %v2815_v57 = vpop.xlane.xlu1 %2814 }
 0xf77   :  { %v2819_v58 = vmul.f32 0.03125, %v2815_v57  ;;  %v2812_v59 = vpop.xlane.xlu0 %2811 }
 0xf78   :  { %v2818_v60 = vmul.f32 0.03125, %v2812_v59 }
 0xf79   :  { %v2823_v61 = vsub.f32 %v2803_v45, %v2819_v58 }
 0xf7a   :  { %v2822_v62 = vsub.f32 %v2802_v46, %v2818_v60 }
 0xf7b   :  { %v2827_v5 = vmul.f32 %v2823_v61, %v2823_v61 }
 0xf7c   :  { %v2826_v63 = vmul.f32 %v2822_v62, %v2822_v62 }
 0xf7d   :  { %v2837_v0 = vsel %vm109_vm0, %v2827_v5, 0.0 }
 0xf7e   :  { %2838 = vadd.xlane.f32.xlu1 %v2837_v0  ;;  %v2834_v1 = vsel %vm109_vm0, %v2826_v63, 0.0 }
 0xf7f   :  { %2835 = vadd.xlane.f32.xlu0 %v2834_v1  ;;  %v2830_v2 = vpop.xlane.xlu0 %2829 }
 0xf80   :  { %v2840_v3 = vmul.f32 0.03125, %v2830_v2 }
 0xf82   :  { %v2844_v22 = vadd.f32 1e-05, %v2840_v3 }
 0xf83   :  { %v2833_v4 = vpop.xlane.xlu1 %2832 }
 0xf84   :  { %3597 = vrsqrt.f32 %v2844_v22  ;;  %v2841_v8 = vmul.f32 0.03125, %v2833_v4 }
 0xf86   :  { %v2845_v9 = vadd.f32 1e-05, %v2841_v8 }
 0xf88   :  { %3599 = vrsqrt.f32 %v2845_v9 }
 0xf8e   :  { %v3598_v11 = vpop.eup %3597 }
 0xf8f   :  { %v2852_v6 = vmul.f32 %v3598_v11, %v2820_v53 }
 0xf91   :  { %v2863_v37 = vmul.f32 %v2983_v13, %v2852_v6 }
 0xf92   :  { %v3600_v20 = vpop.eup %3599 }
 0xf93   :  { %v2853_v21 = vmul.f32 %v3600_v20, %v2821_v54  ;;  %v2874_v12 = vadd.f32 %v2984_v18, %v2863_v37 }
 0xf95   :  { %v2864_v24 = vmul.f32 %v2983_v13, %v2853_v21  ;;  %2878 = vst.msk [vmem:[#allocation10] sm:$0xff] %vm109_vm0, %v2874_v12 }
 0xf97   :  { %v2875_v19 = vadd.f32 %v2984_v18, %v2864_v24 }
 0xf99   :  { %2879 = vst.msk [vmem:[#allocation10 + $0x8] sm:$0xff] %vm109_vm0, %v2875_v19 }
0x100b   :  { %v2839_v25 = vpop.xlane.xlu1 %2838 }
0x100c   :  { %v2843_v26 = vmul.f32 0.03125, %v2839_v25  ;;  %v2836_v27 = vpop.xlane.xlu0 %2835 }
0x100d   :  { %v2842_v28 = vmul.f32 0.03125, %v2836_v27 }
0x100e   :  { %v2847_v29 = vadd.f32 1e-05, %v2843_v26 }
0x100f   :  { %v2846_v15 = vadd.f32 1e-05, %v2842_v28 }
0x1010   :  { %3601 = vrsqrt.f32 %v2847_v29 }
0x1011   :  { %3603 = vrsqrt.f32 %v2846_v15 }
0x101a   :  { %v3602_v30 = vpop.eup %3601 }
0x101b   :  { %v3604_v31 = vpop.eup %3603  ;;  %v2855_v32 = vmul.f32 %v3602_v30, %v2823_v61 }
0x101c   :  { %v2854_v33 = vmul.f32 %v3604_v31, %v2822_v62 }
0x101d   :  { %v2866_v23 = vmul.f32 %v2983_v13, %v2855_v32 }
0x101e   :  { %v2865_v7 = vmul.f32 %v2983_v13, %v2854_v33 }
0x101f   :  { %v2877_v34 = vadd.f32 %v2984_v18, %v2866_v23 }
0x1020   :  { %v2876_v36 = vadd.f32 %v2984_v18, %v2865_v7 }
0x1021   :  { %2881 = vst.msk [vmem:[#allocation10 + $0x18] sm:$0xff] %vm109_vm0, %v2877_v34 }
0x1022   :  { %2880 = vst.msk [vmem:[#allocation10 + $0x10] sm:$0xff] %vm109_vm0, %v2876_v36 }
0x1023   :  { %3706 = shalt.err (!%p3703_p8)
}
0x1024   :  { %s3707_s2 = scalar_lea.hbm %s4265_s13, 512 }
0x1025   :  { %p3708_p9 = scmp.ne.s32.totalorder %s4265_s13, %s3707_s2  ;;  %p3711_p10 = scmp.lt.u32.totalorder %s3707_s2, %s4265_s13 }
0x1027   :  { %p3713_p11 = pnand %p3711_p10, %p3708_p9 }
0x1029   :  { %3716 = shalt.err (!%p3713_p11)
}
0x102a   :  { %2893 = dma.vmem_to_hbm [thread:$0]  %s2888_s12, 512, %s4265_s13, [#allocation4], %s3728_s5, %s3728_s5, %s3729_s28  }
0x102b   :  { %3723 = dma.done.wait [#allocation4], 512  }
0x102c   :  { %3724 = vsyncadd [#allocation4], 4294966784 }
0x102d   :  { %2897 = vsyncpa [#allocation3], 1 }
0x102e   :  { %2898 = vsyncpa [#allocation6], 1 }
0x102f   :  { %2899 = vsyncpa [#allocation9], 1 }
0x1030   :  { %2900 = vsyncpa [#allocation4], 1 }

// kernel: tpu_custom_call.1
= control target key start
LH: loop header
LB: loop body
LE: loop exit
PB: predicated region body
PF: predicated region fallthrough
CT: control target
= control target key end

     0   :  { %18 = vsyncpa [#allocation3], 0  ;;  %s4252_s0 = inlined_call_operand.vmem [shape: f32[2,16,32], index: 0, kind: input, shape index: {}]   ;;  %s4253_s1 = inlined_call_operand.vmem [shape: f32[32,96], index: 1, kind: input, shape index: {}]   ;;  %s4254_s2 = inlined_call_operand.vmem [shape: f32[1,96], index: 2, kind: input, shape index: {}]   ;;  %s4255_s3 = inlined_call_operand.vmem [shape: f32[32,32], index: 3, kind: input, shape index: {}]   ;;  %s4256_s4 = inlined_call_operand.vmem [shape: f32[1,32], index: 4, kind: input, shape index: {}]   ;;  %s4257_s5 = inlined_call_operand.hbm [shape: f32[1,32], index: 5, kind: input, shape index: {}]   ;;  %s4258_s6 = inlined_call_operand.hbm [shape: f32[1,32], index: 6, kind: input, shape index: {}]   ;;  %s4259_s7 = inlined_call_operand.hbm [shape: f32[32,64], index: 7, kind: input, shape index: {}]   ;;  %s4260_s8 = inlined_call_operand.hbm [shape: f32[1,64], index: 8, kind: input, shape index: {}]   ;;  %s4261_s9 = inlined_call_operand.vmem [shape: f32[64,32], index: 9, kind: input, shape index: {}]   ;;  %s4262_s10 = inlined_call_operand.vmem [shape: f32[1,32], index: 10, kind: input, shape index: {}]   ;;  %s4263_s11 = inlined_call_operand.vmem [shape: f32[1,32], index: 11, kind: input, shape index: {}]   ;;  %s4264_s12 = inlined_call_operand.vmem [shape: f32[1,32], index: 12, kind: input, shape index: {}]   ;;  %s4265_s13 = inlined_call_operand.hbm [shape: f32[2,16,32], index: 13, kind: output, shape index: {}]  }
   0x1   :  { %19 = vsyncpa [#allocation6], 0 }
   0x2   :  { %20 = vsyncpa [#allocation9], 0 }
   0x3   :  { %21 = vsyncpa [#allocation4], 0  ;;  %s3725_s25 = smov [#allocation5]   ;;  %s3726_s27 = smov [#allocation2]  }
   0x4   :  { %s48_s26 = sshll.u32 %s3725_s25, 4  ;;  %s38_s28 = sshll.u32 %s3726_s27, 4  ;;  %s49_s26 = int_to_ptr.vmem [resolvable:$true] %s48_s26  ;;  %s39_s28 = int_to_ptr.vmem [resolvable:$true] %s38_s28 }
   0x5   :  { %s3607_s14 = scalar_lea.hbm %s4258_s6, 16 }
   0x6   :  { %p3608_p0 = scmp.ne.s32.totalorder %s4258_s6, %s3607_s14  ;;  %p3611_p1 = scmp.lt.u32.totalorder %s3607_s14, %s4258_s6 }
   0x8   :  { %p3613_p2 = pnand %p3611_p1, %p3608_p0 }
   0xa   :  { %3616 = shalt.err (!%p3613_p2)
}
   0xb   :  { %s3617_s19 = scalar_lea.vmem %s49_s26, 16  ;;  %s3621_s20 = scalar_lea.vmem %s49_s26, 32 }
   0xc   :  { %p3618_p3 = scmp.ne.s32.totalorder %s49_s26, %s3617_s19  ;;  %p3622_p4 = scmp.lt.s32.totalorder %s49_s26, %s49_s26 }
   0xd   :  { %p3623_p5 = scmp.lt.s32.totalorder %s3621_s20, %s3617_s19 }
   0xf   :  { %p3624_p6 = por %p3623_p5, %p3622_p4 }
  0x11   :  { %p3625_p7 = pnand %p3624_p6, %p3618_p3 }
  0x13   :  { %3628 = shalt.err (!%p3625_p7)
}
  0x14   :  { %51 = dma.hbm_to_vmem [thread:$0]  %s4258_s6, 16, %s49_s26, [#allocation6]  }
  0x15   :  { %s3629_s25 = scalar_lea.hbm %s4257_s5, 16 }
  0x16   :  { %p3630_p8 = scmp.ne.s32.totalorder %s4257_s5, %s3629_s25  ;;  %p3633_p9 = scmp.lt.u32.totalorder %s3629_s25, %s4257_s5 }
  0x18   :  { %p3635_p10 = pnand %p3633_p9, %p3630_p8 }
  0x1a   :  { %3638 = shalt.err (!%p3635_p10)
}
  0x1b   :  { %s3639_s15 = scalar_lea.vmem %s39_s28, 16  ;;  %s3643_s16 = scalar_lea.vmem %s39_s28, 32 }
  0x1c   :  { %p3640_p11 = scmp.ne.s32.totalorder %s39_s28, %s3639_s15  ;;  %p3644_p12 = scmp.lt.s32.totalorder %s39_s28, %s39_s28 }
  0x1d   :  { %p3645_p13 = scmp.lt.s32.totalorder %s3643_s16, %s3639_s15 }
  0x1f   :  { %p3646_p0 = por %p3645_p13, %p3644_p12 }
  0x21   :  { %p3647_p1 = pnand %p3646_p0, %p3640_p11 }
  0x23   :  { %3650 = shalt.err (!%p3647_p1)
}
  0x24   :  { %41 = dma.hbm_to_vmem [thread:$0]  %s4257_s5, 16, %s39_s28, [#allocation3]  }
  0x25   :  { %s3727_s17 = smov [#allocation7]   ;;  %s3651_s21 = scalar_lea.hbm %s4259_s7, 512 }
  0x26   :  { %s57_s18 = sshll.u32 %s3727_s17, 4  ;;  %p3652_p2 = scmp.ne.s32.totalorder %s4259_s7, %s3651_s21  ;;  %s58_s18 = int_to_ptr.vmem [resolvable:$true] %s57_s18 }
  0x27   :  { %p3655_p3 = scmp.lt.u32.totalorder %s3651_s21, %s4259_s7 }
  0x29   :  { %p3657_p4 = pnand %p3655_p3, %p3652_p2 }
  0x2b   :  { %3660 = shalt.err (!%p3657_p4)
}
  0x2c   :  { %s3661_s27 = scalar_lea.vmem %s58_s18, 512  ;;  %p3666_p6 = scmp.lt.s32.totalorder %s58_s18, %s58_s18 }
  0x2d   :  { %p3662_p5 = scmp.ne.s32.totalorder %s58_s18, %s3661_s27  ;;  %p3667_p7 = scmp.lt.s32.totalorder %s3661_s27, %s3661_s27 }
  0x2f   :  { %p3668_p8 = por %p3667_p7, %p3666_p6 }
  0x31   :  { %p3669_p9 = pnand %p3668_p8, %p3662_p5 }
  0x33   :  { %3672 = shalt.err (!%p3669_p9)
}
  0x34   :  { %s3728_s5 = smov 128   ;;  %s3729_s28 = smov 8  }
  0x35   :  { %63 = dma.hbm_to_vmem [thread:$0]  %s4259_s7, 512, %s58_s18, [#allocation6], %s3728_s5, %s3728_s5, %s3729_s28  }
  0x36   :  { %s3730_s14 = smov [#allocation8]   ;;  %s3673_s26 = scalar_lea.hbm %s4260_s8, 16 }
  0x37   :  { %s70_s15 = sshll.u32 %s3730_s14, 4  ;;  %p3674_p10 = scmp.ne.s32.totalorder %s4260_s8, %s3673_s26  ;;  %s71_s15 = int_to_ptr.vmem [resolvable:$true] %s70_s15 }
  0x38   :  { %p3677_p11 = scmp.lt.u32.totalorder %s3673_s26, %s4260_s8 }
  0x3a   :  { %p3679_p12 = pnand %p3677_p11, %p3674_p10 }
  0x3c   :  { %3682 = shalt.err (!%p3679_p12)
}
  0x3d   :  { %s3683_s22 = scalar_lea.vmem %s71_s15, 16  ;;  %s3687_s7 = scalar_lea.vmem %s71_s15, 32 }
  0x3e   :  { %p3684_p13 = scmp.ne.s32.totalorder %s71_s15, %s3683_s22  ;;  %p3688_p0 = scmp.lt.s32.totalorder %s71_s15, %s71_s15 }
  0x3f   :  { %p3689_p1 = scmp.lt.s32.totalorder %s3687_s7, %s3683_s22 }
  0x41   :  { %p3690_p2 = por %p3689_p1, %p3688_p0 }
  0x43   :  { %p3691_p3 = pnand %p3690_p2, %p3684_p13 }
  0x45   :  { %3694 = shalt.err (!%p3691_p3)
}
  0x46   :  { %73 = dma.hbm_to_vmem [thread:$0]  %s4260_s8, 16, %s71_s15, [#allocation9]  }
  0x47   :  { %3717 = dma.done.wait [#allocation3], 16  }
  0x48   :  { %3718 = vsyncadd [#allocation3], 4294967280 }
  0x49   :  { %3719 = dma.done.wait [#allocation6], 528  }
  0x4a   :  { %3720 = vsyncadd [#allocation6], 4294966768 }
  0x4b   :  { %3721 = dma.done.wait [#allocation9], 16  }
  0x4c   :  { %3722 = vsyncadd [#allocation9], 4294967280  ;;  %vm109_vm0 = vcmask 261120   ;;  %v98_v0 = vld [vmem:[%s4253_s1] sm:$0xff]  ;;  %v99_v1 = vld [vmem:[%s4253_s1 + $0x8] sm:$0xff]  ;;  %vm213_vm1 = vcmask 64512  }
  0x4d   :  { %v100_v2 = vld [vmem:[%s4253_s1 + $0x10] sm:$0xff]  ;;  %v3303_v3 = vpack.c.bf16 %v99_v1, %v98_v0  ;;  %v101_v4 = vld [vmem:[%s4253_s1 + $0x18] sm:$0xff]  ;;  %v3879_v5 = vld [vmem:[%s4252_s0] sm:$0xff]  ;;  %s3731_s18 = smov 120   ;;  %s3733_s23 = smov 88   ;;  %vm299_vm3 = vcmask 130048  }
  0x4e   :  { %v3307_v6 = vpack.c.bf16 %v101_v4, %v100_v2  ;;  %3109 = vmatprep.mubr.msk.f32.mxu1 %vm109_vm0, %v3879_v5  ;;  %v3886_v7 = vld [vmem:[%s4252_s0 + $0x8] sm:$0xff]  ;;  %v96_v8 = vld [vmem:[%s4252_s0 + $0x10] sm:$0xff]  ;;  %v97_v9 = vld [vmem:[%s4252_s0 + $0x18] sm:$0xff]  ;;  %s3734_s24 = smov 64   ;;  %s3735_s25 = smov 80   ;;  %vm2702_vm4 = vcmask 523264  }
  0x4f   :  { %3304 = vmatprep.subr.bf16.mxu1 %v3303_v3  ;;  %v3901_v10 = vld [vmem:[%s4254_s2] ss:$0 sm:$0xff]  ;;  %s3732_s2 = smov 96   ;;  %vm3930_vm2 = vmpackc.low %vm213_vm1, %vm213_vm1  ;;  %s3736_s27 = smov 56  }
  0x50   :  { %3306 = vmatpush3.bf16.msra.mxu1 %v3303_v3  ;;  %s3737_s29 = smov 112   ;;  %s3738_s30 = smov 104  }
  0x51   :  { %3308 = vmatprep.subr.bf16.mxu1 %v3307_v6  ;;  %s3739_s14 = smov 72   ;;  %s3740_s26 = smov 48  }
  0x52   :  { %s3741_s19 = smov 40  }
  0x54   :  { %3310 = vmatpush3.bf16.msra.mxu1 %v3307_v6 }
  0x57   :  { %3110 = vmatmul.mubr.msk.f32.vlgmr.msra.gmra.mrb[0].mxu1 %vm109_vm0, %v3886_v7 }
  0x58   :  { %3112 = vmatprep.mubr.msk.f32.mxu1 %vm109_vm0, %v96_v8 }
  0x5b   :  { %3113 = vmatmul.mubr.msk.f32.gmra.mrb[2].mxu1 %vm109_vm0, %v97_v9 }
 0x12a   :  { %v3111_v11 = vpop.f32.mrb[0].mxu1 }
 0x12b   :  { %v3904_v12 = vadd.f32 %v3111_v11, %v3901_v10  ;;  %v188_v13 = vpop.f32.mrb[1].mxu1 }
 0x12c   :  { %v3907_v14 = vadd.f32 %v3901_v10, %v188_v13 }
 0x12e   :  { %410 = vrot.lane.b32.xlu1 %v3907_v14, %s3731_s18  ;;  %3119 = vmatprep.mubr.msk.f32.mxu1 %vm213_vm1, %v3907_v14  ;;  %v3915_v15 = vpack.i.bf16 %v3904_v12, %v3907_v14  ;;  %v3923_v16 = vpop.f32.mrb[2].mxu1 }
 0x12f   :  { %v3925_v17 = vpop.f32.mrb[3].mxu1 }
 0x130   :  { %3446 = vrot.lane.b32.xlu0 %v3915_v15, %s3732_s2 }
 0x132   :  { %412 = vrot.lane.b32.xlu1 %v3904_v12, %s3731_s18 }
 0x134   :  { %3451 = vrot.lane.b32.xlu0 %v3915_v15, %s3733_s23 }
 0x1a0   :  { %v411_v18 = vpop.permute.xlu1 %410 }
 0x1a1   :  { %3133 = vmatprep.mubr.msk.f32.mxu0 %vm213_vm1, %v411_v18 }
 0x1a2   :  { %v3447_v19 = vpop.permute.xlu0 %3446 }
 0x1a3   :  { %v3449_v20 = vunpack.i.h.bf16 %v3447_v19  ;;  %v3448_v21 = vunpack.i.l.bf16 %v3447_v19 }
 0x1a4   :  { %v413_v28 = vpop.permute.xlu1 %412 }
 0x1a5   :  { %v3311_v23 = vpack.c.bf16 %v3449_v20, %v3448_v21 }
 0x1a6   :  { %v3452_v24 = vpop.permute.xlu0 %3451 }
 0x1a7   :  { %v3454_v25 = vunpack.i.h.bf16 %v3452_v24  ;;  %v3453_v26 = vunpack.i.l.bf16 %v3452_v24  ;;  %3313 = vmatprep.subr.msk.bf16.mxu1 %vm3930_vm2, %v3311_v23 }
 0x1a8   :  { %3316 = vmatpush3.bf16.xpose.msk.msra.mxu1 %vm3930_vm2, %v3311_v23 }
 0x1a9   :  { %v3321_v27 = vpack.c.bf16 %v3454_v25, %v3453_v26 }
 0x1ab   :  { %3323 = vmatprep.subr.msk.bf16.mxu0 %vm3930_vm2, %v3321_v27 }
 0x1ac   :  { %3326 = vmatpush3.bf16.xpose.msk.msra.mxu0 %vm3930_vm2, %v3321_v27 }
 0x1af   :  { %3120 = vmatmul.mubr.msk.f32.vlgmr.msra.gmra.mrb[4].mxu1 %vm213_vm1, %v3904_v12 }
 0x1b3   :  { %3134 = vmatmul.mubr.msk.f32.vlgmr.msra.gmra.mrb[0].mxu0 %vm213_vm1, %v413_v28 }
 0x282   :  { %v3121_v29 = vpop.f32.mrb[4].mxu1 }
 0x283   :  { %v298_v30 = vmul.f32 0.35355338, %v3121_v29  ;;  %v288_v31 = vpop.f32.mrb[5].mxu1 }
 0x284   :  { %v297_v32 = vmul.f32 0.35355338, %v288_v31 }
 0x285   :  { %v303_v33 = vsel %vm299_vm3, %v298_v30, -inf }
 0x286   :  { %v3135_v34 = vpop.f32.mrb[0].mxu0  ;;  %304 = vmax.xlane.f32.xlu1 %v303_v33  ;;  %v300_v35 = vsel %vm299_vm3, %v297_v32, -inf }
 0x287   :  { %v492_v36 = vpop.f32.mrb[1].mxu0  ;;  %301 = vmax.xlane.f32.xlu0 %v300_v35  ;;  %v502_v38 = vmul.f32 0.35355338, %v3135_v34  ;;  %v3986_v35 = vadd.f32 %v3901_v10, %v3925_v17  ;;  %v4001_v17 = vld [vmem:[%s4255_s3] sm:$0xff] }
 0x288   :  { %v501_v37 = vmul.f32 0.35355338, %v492_v36 }
 0x289   :  { %v506_v40 = vsel %vm299_vm3, %v502_v38, -inf }
 0x28a   :  { %v503_v39 = vsel %vm299_vm3, %v501_v37, -inf }
 0x28b   :  { %504 = vmax.xlane.f32.xlu0 %v503_v39 }
 0x28f   :  { %507 = vmax.xlane.f32.xlu0 %v506_v40 }
 0x297   :  { %3456 = vrot.lane.b32.xlu1 %v3915_v15, %s3734_s24 }
 0x313   :  { %v305_v41 = vpop.xlane.xlu1 %304 }
 0x314   :  { %v307_v42 = vsub.f32 %v298_v30, %v305_v41  ;;  %v302_v43 = vpop.xlane.xlu0 %301 }
 0x315   :  { %v306_v44 = vsub.f32 %v297_v32, %v302_v43 }
 0x316   :  { %v310_v45 = vmul.f32 1.442695, %v307_v42 }
 0x317   :  { %v308_v46 = vmul.f32 1.442695, %v306_v44  ;;  %v3457_v47 = vpop.permute.xlu1 %3456 }
 0x318   :  { %3525 = vpow2.f32 %v310_v45  ;;  %v3459_v48 = vunpack.i.h.bf16 %v3457_v47  ;;  %v3458_v49 = vunpack.i.l.bf16 %v3457_v47  ;;  %v505_v50 = vpop.xlane.xlu0 %504 }
 0x319   :  { %3527 = vpow2.f32 %v308_v46  ;;  %v509_v61 = vsub.f32 %v501_v37, %v505_v50  ;;  %v3994_v37 = vld [vmem:[%s4255_s3 + $0x8] sm:$0xff]  ;;  %v4013_v50 = vadd.f32 %v3923_v16, %v3901_v10 }
 0x31a   :  { %v3317_v51 = vpack.c.bf16 %v3459_v48, %v3458_v49  ;;  %3143 = vmatprep.subr.mxu0 %v3994_v37 }
 0x31b   :  { %v511_v62 = vmul.f32 1.442695, %v509_v61  ;;  %3144 = vmatpush3.msra.mxu0 %v3994_v37 }
 0x31c   :  { %3318 = vmatprep.subr.bf16.mxu1 %v3317_v51  ;;  %v508_v52 = vpop.xlane.xlu0 %507  ;;  %3148 = vmatprep.subr.mxu0 %v4001_v17 }
 0x31d   :  { %v510_v53 = vsub.f32 %v502_v38, %v508_v52  ;;  %3320 = vmatpush3.bf16.msra.mxu1 %v3317_v51  ;;  %v4019_v51 = vpack.i.bf16 %v4013_v50, %v3986_v35 }
 0x31f   :  { %v513_v54 = vmul.f32 1.442695, %v510_v53 }
 0x321   :  { %3529 = vpow2.f32 %v513_v54 }
 0x322   :  { %v3526_v55 = vpop.eup %3525  ;;  %3531 = vpow2.f32 %v511_v62 }
 0x323   :  { %v3528_v56 = vpop.eup %3527  ;;  %v315_v57 = vsel %vm299_vm3, %v3526_v55, 0.0 }
 0x324   :  { %316 = vadd.xlane.f32.xlu0 %v315_v57  ;;  %v312_v58 = vsel %vm299_vm3, %v3528_v56, 0.0 }
 0x325   :  { %313 = vadd.xlane.f32.xlu1 %v312_v58 }
 0x32b   :  { %v3530_v59 = vpop.eup %3529 }
 0x32c   :  { %v518_v60 = vsel %vm299_vm3, %v3530_v59, 0.0  ;;  %v3532_v63 = vpop.eup %3531 }
 0x32d   :  { %519 = vadd.xlane.f32.xlu0 %v518_v60  ;;  %v515_v0 = vsel %vm299_vm3, %v3532_v63, 0.0 }
 0x336   :  { %3466 = vrot.lane.b32.xlu1 %v3915_v15, %s3735_s25 }
 0x343   :  { %3461 = vrot.lane.b32.xlu0 %v3915_v15, %s3736_s27 }
 0x347   :  { %777 = vrot.lane.b32.xlu0 %v3904_v12, %s3737_s29 }
 0x34b   :  { %1061 = vrot.lane.b32.xlu0 %v3907_v14, %s3738_s30 }
 0x35a   :  { %516 = vadd.xlane.f32.xlu1 %v515_v0 }
 0x36b   :  { %775 = vrot.lane.b32.xlu1 %v3907_v14, %s3737_s29 }
 0x36f   :  { %3471 = vrot.lane.b32.xlu1 %v3915_v15, %s3739_s14 }
 0x373   :  { %1063 = vrot.lane.b32.xlu1 %v3904_v12, %s3738_s30 }
 0x3b1   :  { %v317_v1 = vpop.xlane.xlu0 %316 }
 0x3b2   :  { %3533 = vrcp.f32 %v317_v1  ;;  %v314_v2 = vpop.xlane.xlu1 %313 }
 0x3b3   :  { %3535 = vrcp.f32 %v314_v2 }
 0x3b6   :  { %v3467_v4 = vpop.permute.xlu1 %3466 }
 0x3b7   :  { %v3469_v9 = vunpack.i.h.bf16 %v3467_v4  ;;  %v3468_v14 = vunpack.i.l.bf16 %v3467_v4 }
 0x3b9   :  { %v3331_v12 = vpack.c.bf16 %v3469_v9, %v3468_v14  ;;  %v4040_v14 = vld [vmem:[%s4255_s3 + $0x10] sm:$0xff] }
 0x3ba   :  { %v520_v3 = vpop.xlane.xlu0 %519 }
 0x3bb   :  { %3537 = vrcp.f32 %v520_v3 }
 0x3bc   :  { %v3534_v6 = vpop.eup %3533 }
 0x3bd   :  { %v3536_v8 = vpop.eup %3535  ;;  %v321_v18 = vmul.f32 %v3534_v6, %v3526_v55 }
 0x3be   :  { %v3462_v11 = vpop.permute.xlu0 %3461  ;;  %v320_v13 = vmul.f32 %v3536_v8, %v3528_v56 }
 0x3bf   :  { %v3464_v19 = vunpack.i.h.bf16 %v3462_v11  ;;  %v3463_v20 = vunpack.i.l.bf16 %v3462_v11 }
 0x3c0   :  { %3126 = vmatprep.mubr.msk.f32.mxu1 %vm299_vm3, %v320_v13 }
 0x3c1   :  { %v3327_v21 = vpack.c.bf16 %v3464_v19, %v3463_v20  ;;  %3127 = vmatmul.mubr.msk.f32.vlgmr.msra.gmra.mrb[6].mxu1 %vm299_vm3, %v321_v18 }
 0x3c2   :  { %v778_v33 = vpop.permute.xlu0 %777 }
 0x3c3   :  { %3328 = vmatprep.subr.bf16.mxu1 %v3327_v21 }
 0x3c4   :  { %3330 = vmatpush3.bf16.msra.mxu1 %v3327_v21 }
 0x3c5   :  { %3333 = vmatprep.subr.msk.bf16.mxu1 %vm3930_vm2, %v3331_v12  ;;  %v3538_v26 = vpop.eup %3537 }
 0x3c6   :  { %v524_v31 = vmul.f32 %v3538_v26, %v3530_v59  ;;  %v1062_v34 = vpop.permute.xlu0 %1061 }
 0x3e7   :  { %v517_v23 = vpop.xlane.xlu1 %516 }
 0x3e8   :  { %3539 = vrcp.f32 %v517_v23 }
 0x3eb   :  { %v776_v24 = vpop.permute.xlu1 %775 }
 0x3ef   :  { %v3472_v25 = vpop.permute.xlu1 %3471 }
 0x3f0   :  { %v3474_v28 = vunpack.i.h.bf16 %v3472_v25  ;;  %v3473_v29 = vunpack.i.l.bf16 %v3472_v25 }
 0x3f2   :  { %v3540_v27 = vpop.eup %3539  ;;  %v3341_v32 = vpack.c.bf16 %v3474_v28, %v3473_v29 }
 0x3f3   :  { %v523_v30 = vmul.f32 %v3540_v27, %v3532_v63  ;;  %v1064_v36 = vpop.permute.xlu1 %1063 }
 0x3f5   :  { %3140 = vmatprep.mubr.msk.f32.mxu1 %vm299_vm3, %v523_v30 }
 0x3f6   :  { %3141 = vmatmul.mubr.msk.f32.vlgmr.msra.gmra.mrb[8].mxu1 %vm299_vm3, %v524_v31 }
 0x3f7   :  { %3336 = vmatpush3.bf16.xpose.msk.msra.mxu1 %vm3930_vm2, %v3331_v12  ;;  %3157 = vmatprep.mubr.msk.f32.mxu1 %vm213_vm1, %v776_v24 }
 0x3f8   :  { %3343 = vmatprep.subr.msk.bf16.mxu1 %vm3930_vm2, %v3341_v32 }
 0x3fe   :  { %3158 = vmatmul.mubr.msk.f32.vlgmr.msra.gmra.mrb[10].mxu1 %vm213_vm1, %v778_v33 }
 0x3ff   :  { %3346 = vmatpush3.bf16.xpose.msk.msra.mxu1 %vm3930_vm2, %v3341_v32  ;;  %3176 = vmatprep.mubr.msk.f32.mxu1 %vm213_vm1, %v1062_v34 }
 0x406   :  { %3177 = vmatmul.mubr.msk.f32.vlgmr.msra.gmra.mrb[12].mxu1 %vm213_vm1, %v1064_v36 }
 0x407   :  { %3195 = vmatprep.mubr.msk.f32.mxu1 %vm213_vm1, %v3986_v35 }
 0x494   :  { %v3128_v38 = vpop.f32.mrb[6].mxu1 }
 0x495   :  { %v400_v39 = vpop.f32.mrb[7].mxu1 }
 0x4c9   :  { %v3142_v40 = vpop.f32.mrb[8].mxu1 }
 0x4ca   :  { %v603_v41 = vpop.f32.mrb[9].mxu1 }
 0x4cb   :  { %3145 = vmatprep.mubr.msk.f32.mxu0 %vm213_vm1, %v603_v41 }
 0x4cc   :  { %3146 = vmatmul.mubr.msk.f32.vlgmr.msra.gmra.mrb[2].mxu0 %vm213_vm1, %v3142_v40 }
 0x4cd   :  { %3150 = vmatprep.mubr.msk.f32.mxu0 %vm213_vm1, %v400_v39  ;;  %3149 = vmatpush3.msra.mxu0 %v4001_v17 }
 0x4d1   :  { %v3159_v42 = vpop.f32.mrb[10].mxu1 }
 0x4d2   :  { %v867_v43 = vmul.f32 0.35355338, %v3159_v42  ;;  %v857_v44 = vpop.f32.mrb[11].mxu1 }
 0x4d3   :  { %v866_v45 = vmul.f32 0.35355338, %v857_v44 }
 0x4d4   :  { %v871_v46 = vsel %vm299_vm3, %v867_v43, -inf  ;;  %3151 = vmatmul.mubr.msk.f32.vlgmr.msra.gmra.mrb[2].mxu0 %vm213_vm1, %v3128_v38 }
 0x4d5   :  { %872 = vmax.xlane.f32.xlu1 %v871_v46  ;;  %v868_v47 = vsel %vm299_vm3, %v866_v45, -inf }
 0x4d6   :  { %869 = vmax.xlane.f32.xlu0 %v868_v47 }
 0x4d9   :  { %v3178_v48 = vpop.f32.mrb[12].mxu1 }
 0x4da   :  { %v1143_v49 = vpop.f32.mrb[13].mxu1  ;;  %v1153_v9 = vmul.f32 0.35355338, %v3178_v48 }
 0x4db   :  { %v1152_v52 = vmul.f32 0.35355338, %v1143_v49 }
 0x4dc   :  { %v1157_v11 = vsel %vm299_vm3, %v1153_v9, -inf }
 0x4dd   :  { %v1154_v53 = vsel %vm299_vm3, %v1152_v52, -inf }
 0x4e6   :  { %3476 = vrot.lane.b32.xlu1 %v3915_v15, %s3740_s26 }
 0x4ea   :  { %3486 = vrot.lane.b32.xlu1 %v4019_v51, %s3733_s23 }
 0x4ee   :  { %1548 = vrot.lane.b32.xlu1 %v3986_v35, %s3731_s18 }
 0x512   :  { %1155 = vmax.xlane.f32.xlu1 %v1154_v53 }
 0x562   :  { %v873_v10 = vpop.xlane.xlu1 %872 }
 0x563   :  { %v875_v16 = vsub.f32 %v867_v43, %v873_v10  ;;  %v870_v54 = vpop.xlane.xlu0 %869 }
 0x564   :  { %v874_v55 = vsub.f32 %v866_v45, %v870_v54 }
 0x565   :  { %v878_v56 = vmul.f32 1.442695, %v875_v16 }
 0x566   :  { %v876_v57 = vmul.f32 1.442695, %v874_v55  ;;  %v3477_v58 = vpop.permute.xlu1 %3476 }
 0x567   :  { %v3479_v59 = vunpack.i.h.bf16 %v3477_v58  ;;  %v3478_v60 = vunpack.i.l.bf16 %v3477_v58 }
 0x568   :  { %3541 = vpow2.f32 %v876_v57 }
 0x569   :  { %v3337_v61 = vpack.c.bf16 %v3479_v59, %v3478_v60  ;;  %3543 = vpow2.f32 %v878_v56 }
 0x56a   :  { %v3487_v2 = vpop.permute.xlu1 %3486 }
 0x56b   :  { %3338 = vmatprep.subr.bf16.mxu0 %v3337_v61  ;;  %v3489_v12 = vunpack.i.h.bf16 %v3487_v2  ;;  %v3488_v23 = vunpack.i.l.bf16 %v3487_v2 }
 0x56c   :  { %3340 = vmatpush3.bf16.msra.mxu0 %v3337_v61 }
 0x56d   :  { %3167 = vmatprep.subr.mxu0 %v4040_v14  ;;  %v3361_v29 = vpack.c.bf16 %v3489_v12, %v3488_v23 }
 0x56e   :  { %v1549_v3 = vpop.permute.xlu1 %1548 }
 0x572   :  { %v3542_v62 = vpop.eup %3541 }
 0x573   :  { %v880_v63 = vsel %vm299_vm3, %v3542_v62, 0.0  ;;  %v3544_v0 = vpop.eup %3543 }
 0x574   :  { %881 = vadd.xlane.f32.xlu0 %v880_v63  ;;  %v883_v1 = vsel %vm299_vm3, %v3544_v0, 0.0 }
 0x578   :  { %884 = vadd.xlane.f32.xlu0 %v883_v1 }
 0x58e   :  { %3481 = vrot.lane.b32.xlu0 %v4019_v51, %s3732_s2 }
 0x592   :  { %1550 = vrot.lane.b32.xlu0 %v4013_v50, %s3731_s18 }
 0x59f   :  { %v1156_v4 = vpop.xlane.xlu1 %1155 }
 0x5a0   :  { %v1160_v6 = vsub.f32 %v1152_v52, %v1156_v4 }
 0x5a2   :  { %v1162_v8 = vmul.f32 1.442695, %v1160_v6  ;;  %v4085_v6 = vld [vmem:[%s4255_s3 + $0x18] sm:$0xff] }
 0x5a4   :  { %3545 = vpow2.f32 %v1162_v8 }
 0x5ae   :  { %v4033_v13 = vpop.eup %3545 }
 0x5af   :  { %v1166_v18 = vsel %vm299_vm3, %v4033_v13, 0.0 }
 0x5b1   :  { %1158 = vmax.xlane.f32.xlu0 %v1157_v11 }
 0x5b5   :  { %1167 = vadd.xlane.f32.xlu0 %v1166_v18 }
 0x5cb   :  { %3491 = vrot.lane.b32.xlu0 %v3915_v15, %s3741_s19 }
 0x5cf   :  { %1915 = vrot.lane.b32.xlu0 %v4013_v50, %s3737_s29 }
 0x601   :  { %v882_v19 = vpop.xlane.xlu0 %881 }
 0x602   :  { %3547 = vrcp.f32 %v882_v19 }
 0x605   :  { %v885_v20 = vpop.xlane.xlu0 %884 }
 0x606   :  { %3549 = vrcp.f32 %v885_v20 }
 0x609   :  { %v3482_v21 = vpop.permute.xlu0 %3481 }
 0x60a   :  { %v3484_v24 = vunpack.i.h.bf16 %v3482_v21  ;;  %v3483_v25 = vunpack.i.l.bf16 %v3482_v21 }
 0x60c   :  { %v3548_v26 = vpop.eup %3547  ;;  %v3351_v27 = vpack.c.bf16 %v3484_v24, %v3483_v25 }
 0x60d   :  { %v888_v28 = vmul.f32 %v3548_v26, %v3542_v62  ;;  %v1551_v31 = vpop.permute.xlu0 %1550 }
 0x60e   :  { %3353 = vmatprep.subr.msk.bf16.mxu1 %vm3930_vm2, %v3351_v27 }
 0x60f   :  { %3164 = vmatprep.mubr.msk.f32.mxu0 %vm299_vm3, %v888_v28  ;;  %3356 = vmatpush3.bf16.xpose.msk.msra.mxu1 %vm3930_vm2, %v3351_v27 }
 0x610   :  { %v3550_v15 = vpop.eup %3549  ;;  %3363 = vmatprep.subr.msk.bf16.mxu1 %vm3930_vm2, %v3361_v29 }
 0x611   :  { %v889_v30 = vmul.f32 %v3550_v15, %v3544_v0 }
 0x613   :  { %3165 = vmatmul.mubr.msk.f32.vlgmr.msra.gmra.mrb[4].mxu0 %vm299_vm3, %v889_v30 }
 0x614   :  { %3168 = vmatpush3.msra.mxu0 %v4040_v14 }
 0x616   :  { %3196 = vmatmul.mubr.msk.f32.vlgmr.msra.gmra.mrb[14].mxu1 %vm213_vm1, %v4013_v50 }
 0x617   :  { %3366 = vmatpush3.bf16.xpose.msk.msra.mxu1 %vm3930_vm2, %v3361_v29  ;;  %3209 = vmatprep.mubr.msk.f32.mxu1 %vm213_vm1, %v1549_v3 }
 0x61e   :  { %3210 = vmatmul.mubr.msk.f32.vlgmr.msra.gmra.mrb[16].mxu1 %vm213_vm1, %v1551_v31 }
 0x63e   :  { %v1159_v32 = vpop.xlane.xlu0 %1158 }
 0x63f   :  { %v1161_v33 = vsub.f32 %v1153_v9, %v1159_v32 }
 0x641   :  { %v1164_v34 = vmul.f32 1.442695, %v1161_v33 }
 0x642   :  { %v1168_v36 = vpop.xlane.xlu0 %1167 }
 0x643   :  { %3551 = vpow2.f32 %v1164_v34 }
 0x644   :  { %3553 = vrcp.f32 %v1168_v36 }
 0x646   :  { %v3492_v38 = vpop.permute.xlu0 %3491 }
 0x647   :  { %v3494_v39 = vunpack.i.h.bf16 %v3492_v38  ;;  %v3493_v40 = vunpack.i.l.bf16 %v3492_v38 }
 0x649   :  { %v3347_v41 = vpack.c.bf16 %v3494_v39, %v3493_v40 }
 0x64a   :  { %v1916_v59 = vpop.permute.xlu0 %1915 }
 0x64b   :  { %3348 = vmatprep.subr.bf16.mxu0 %v3347_v41 }
 0x64d   :  { %v3552_v42 = vpop.eup %3551 }
 0x64e   :  { %v1169_v43 = vsel %vm299_vm3, %v3552_v42, 0.0  ;;  %v3554_v52 = vpop.eup %3553 }
 0x64f   :  { %1170 = vadd.xlane.f32.xlu1 %v1169_v43  ;;  %v1174_v16 = vmul.f32 %v3554_v52, %v4033_v13 }
 0x660   :  { %3496 = vrot.lane.b32.xlu1 %v4019_v51, %s3735_s25 }
 0x664   :  { %1913 = vrot.lane.b32.xlu1 %v3986_v35, %s3737_s29 }
 0x6dc   :  { %v1171_v44 = vpop.xlane.xlu1 %1170 }
 0x6dd   :  { %3555 = vrcp.f32 %v1171_v44 }
 0x6e0   :  { %v3497_v45 = vpop.permute.xlu1 %3496 }
 0x6e1   :  { %v3499_v46 = vunpack.i.h.bf16 %v3497_v45  ;;  %v3498_v47 = vunpack.i.l.bf16 %v3497_v45 }
 0x6e3   :  { %v3371_v48 = vpack.c.bf16 %v3499_v46, %v3498_v47 }
 0x6e4   :  { %v1914_v49 = vpop.permute.xlu1 %1913 }
 0x6e5   :  { %3373 = vmatprep.subr.msk.bf16.mxu1 %vm3930_vm2, %v3371_v48  ;;  %3233 = vmatprep.mubr.msk.f32.mxu1 %vm213_vm1, %v1914_v49 }
 0x6e6   :  { %v3166_v53 = vpop.f32.mrb[4].mxu0  ;;  %3376 = vmatpush3.bf16.xpose.msk.msra.mxu1 %vm3930_vm2, %v3371_v48 }
 0x6e7   :  { %v968_v10 = vpop.f32.mrb[5].mxu0  ;;  %v3556_v54 = vpop.eup %3555 }
 0x6e8   :  { %3169 = vmatprep.mubr.msk.f32.mxu0 %vm213_vm1, %v968_v10  ;;  %v1175_v60 = vmul.f32 %v3556_v54, %v3552_v42 }
 0x6e9   :  { %3170 = vmatmul.mubr.msk.f32.vlgmr.msra.gmra.mrb[2].mxu0 %vm213_vm1, %v3166_v53  ;;  %v3197_v55 = vpop.f32.mrb[14].mxu1 }
 0x6ea   :  { %3350 = vmatpush3.bf16.msra.mxu0 %v3347_v41  ;;  %v1437_v56 = vmul.f32 0.35355338, %v3197_v55  ;;  %3183 = vmatprep.mubr.msk.f32.mxu0 %vm299_vm3, %v1174_v16  ;;  %v1427_v57 = vpop.f32.mrb[15].mxu1 }
 0x6eb   :  { %v1436_v58 = vmul.f32 0.35355338, %v1427_v57  ;;  %3186 = vmatprep.subr.mxu0 %v4085_v6 }
 0x6ec   :  { %v1441_v61 = vsel %vm299_vm3, %v1437_v56, -inf }
 0x6ed   :  { %3234 = vmatmul.mubr.msk.f32.vlgmr.msra.gmra.mrb[18].mxu1 %vm213_vm1, %v1916_v59  ;;  %1442 = vmax.xlane.f32.xlu0 %v1441_v61  ;;  %v1438_v62 = vsel %vm299_vm3, %v1436_v58, -inf }
 0x6ee   :  { %3184 = vmatmul.mubr.msk.f32.vlgmr.msra.gmra.mrb[6].mxu0 %vm299_vm3, %v1175_v60  ;;  %1439 = vmax.xlane.f32.xlu1 %v1438_v62 }
 0x6ef   :  { %3187 = vmatpush3.msra.mxu0 %v4085_v6 }
 0x6f1   :  { %v3211_v63 = vpop.f32.mrb[16].mxu1 }
 0x6f2   :  { %v1640_v0 = vmul.f32 0.35355338, %v3211_v63  ;;  %v1630_v1 = vpop.f32.mrb[17].mxu1 }
 0x6f3   :  { %v1639_v2 = vmul.f32 0.35355338, %v1630_v1 }
 0x6f4   :  { %v1644_v3 = vsel %vm299_vm3, %v1640_v0, -inf }
 0x6f5   :  { %1645 = vmax.xlane.f32.xlu1 %v1644_v3  ;;  %v1641_v4 = vsel %vm299_vm3, %v1639_v2, -inf }
 0x6f6   :  { %1642 = vmax.xlane.f32.xlu0 %v1641_v4 }
 0x77a   :  { %v1443_v8 = vpop.xlane.xlu0 %1442 }
 0x77b   :  { %v1445_v9 = vsub.f32 %v1437_v56, %v1443_v8  ;;  %v1440_v11 = vpop.xlane.xlu1 %1439 }
 0x77c   :  { %v1444_v13 = vsub.f32 %v1436_v58, %v1440_v11 }
 0x77d   :  { %v1448_v18 = vmul.f32 1.442695, %v1445_v9 }
 0x77e   :  { %v1446_v19 = vmul.f32 1.442695, %v1444_v13 }
 0x77f   :  { %3557 = vpow2.f32 %v1448_v18 }
 0x780   :  { %3559 = vpow2.f32 %v1446_v19  ;;  %v4133_v19 = vld [vmem:[%s4256_s4] ss:$0 sm:$0xff] }
 0x782   :  { %v1646_v20 = vpop.xlane.xlu1 %1645 }
 0x783   :  { %v1648_v21 = vsub.f32 %v1640_v0, %v1646_v20  ;;  %v1643_v12 = vpop.xlane.xlu0 %1642 }
 0x784   :  { %v1647_v23 = vsub.f32 %v1639_v2, %v1643_v12 }
 0x785   :  { %v1651_v24 = vmul.f32 1.442695, %v1648_v21 }
 0x786   :  { %v1649_v25 = vmul.f32 1.442695, %v1647_v23 }
 0x787   :  { %3561 = vpow2.f32 %v1651_v24 }
 0x788   :  { %3563 = vpow2.f32 %v1649_v25 }
 0x789   :  { %v3558_v26 = vpop.eup %3557 }
 0x78a   :  { %v3560_v27 = vpop.eup %3559  ;;  %v1453_v28 = vsel %vm299_vm3, %v3558_v26, 0.0 }
 0x78b   :  { %1454 = vadd.xlane.f32.xlu1 %v1453_v28  ;;  %v1450_v29 = vsel %vm299_vm3, %v3560_v27, 0.0 }
 0x78c   :  { %1451 = vadd.xlane.f32.xlu0 %v1450_v29 }
 0x791   :  { %v4091_v15 = vpop.eup %3561 }
 0x792   :  { %v3564_v30 = vpop.eup %3563  ;;  %v1656_v31 = vsel %vm299_vm3, %v4091_v15, 0.0 }
 0x793   :  { %1657 = vadd.xlane.f32.xlu1 %v1656_v31  ;;  %v1653_v32 = vsel %vm299_vm3, %v3564_v30, 0.0 }
 0x794   :  { %1654 = vadd.xlane.f32.xlu0 %v1653_v32 }
 0x7a4   :  { %3506 = vrot.lane.b32.xlu1 %v4019_v51, %s3736_s27 }
 0x7a8   :  { %3511 = vrot.lane.b32.xlu1 %v4019_v51, %s3739_s14 }
 0x7aa   :  { %3501 = vrot.lane.b32.xlu0 %v4019_v51, %s3734_s24 }
 0x7ac   :  { %2201 = vrot.lane.b32.xlu1 %v4013_v50, %s3738_s30 }
 0x7ae   :  { %2199 = vrot.lane.b32.xlu0 %v3986_v35, %s3738_s30 }
 0x7c0   :  { %v3235_v33 = vpop.f32.mrb[18].mxu1 }
 0x7c1   :  { %v3185_v34 = vpop.f32.mrb[6].mxu0  ;;  %v1995_v36 = vpop.f32.mrb[19].mxu1  ;;  %v2005_v40 = vmul.f32 0.35355338, %v3235_v33 }
 0x7c2   :  { %v1254_v38 = vpop.f32.mrb[7].mxu0  ;;  %v2004_v39 = vmul.f32 0.35355338, %v1995_v36 }
 0x7c3   :  { %3188 = vmatprep.mubr.msk.f32.mxu0 %vm213_vm1, %v1254_v38  ;;  %v2009_v42 = vsel %vm299_vm3, %v2005_v40, -inf }
 0x7c4   :  { %3189 = vmatmul.mubr.msk.f32.vlgmr.msra.gmra.mrb[2].mxu0 %vm213_vm1, %v3185_v34  ;;  %v2006_v41 = vsel %vm299_vm3, %v2004_v39, -inf }
 0x7cd   :  { %2007 = vmax.xlane.f32.xlu0 %v2006_v41 }
 0x7d0   :  { %2010 = vmax.xlane.f32.xlu1 %v2009_v42 }
 0x7e1   :  { %3516 = vrot.lane.b32.xlu1 %v4019_v51, %s3740_s26 }
 0x7e5   :  { %3521 = vrot.lane.b32.xlu1 %v4019_v51, %s3741_s19 }
 0x818   :  { %v1455_v50 = vpop.xlane.xlu1 %1454 }
 0x819   :  { %v1452_v35 = vpop.xlane.xlu0 %1451 }
 0x81a   :  { %3565 = vrcp.f32 %v1452_v35 }
 0x81b   :  { %3567 = vrcp.f32 %v1455_v50 }
 0x820   :  { %v1658_v43 = vpop.xlane.xlu1 %1657 }
 0x821   :  { %v1655_v44 = vpop.xlane.xlu0 %1654 }
 0x822   :  { %3569 = vrcp.f32 %v1655_v44 }
 0x823   :  { %3571 = vrcp.f32 %v1658_v43 }
 0x824   :  { %v3566_v45 = vpop.eup %3565  ;;  %v3507_v46 = vpop.permute.xlu1 %3506 }
 0x825   :  { %v3502_v47 = vpop.permute.xlu0 %3501  ;;  %v1458_v48 = vmul.f32 %v3566_v45, %v3560_v27  ;;  %v3509_v49 = vunpack.i.h.bf16 %v3507_v46  ;;  %v3508_v52 = vunpack.i.l.bf16 %v3507_v46  ;;  %v3568_v54 = vpop.eup %3567 }
 0x826   :  { %v3504_v53 = vunpack.i.h.bf16 %v3502_v47  ;;  %v3503_v10 = vunpack.i.l.bf16 %v3502_v47  ;;  %v1459_v61 = vmul.f32 %v3568_v54, %v3558_v26 }
 0x827   :  { %3202 = vmatprep.mubr.msk.f32.mxu0 %vm299_vm3, %v1458_v48  ;;  %v3367_v58 = vpack.c.bf16 %v3509_v49, %v3508_v52 }
 0x828   :  { %v3357_v16 = vpack.c.bf16 %v3504_v53, %v3503_v10  ;;  %v3512_v51 = vpop.permute.xlu1 %3511 }
 0x829   :  { %v3514_v55 = vunpack.i.h.bf16 %v3512_v51  ;;  %v3513_v56 = vunpack.i.l.bf16 %v3512_v51  ;;  %v2200_v57 = vpop.permute.xlu0 %2199 }
 0x82a   :  { %3358 = vmatprep.subr.bf16.mxu0 %v3357_v16  ;;  %3252 = vmatprep.mubr.msk.f32.mxu1 %vm213_vm1, %v2200_v57 }
 0x82b   :  { %v3381_v59 = vpack.c.bf16 %v3514_v55, %v3513_v56  ;;  %3360 = vmatpush3.bf16.msra.mxu0 %v3357_v16 }
 0x82c   :  { %v3570_v60 = vpop.eup %3569  ;;  %3368 = vmatprep.subr.bf16.mxu0 %v3367_v58  ;;  %v2202_v1 = vpop.permute.xlu1 %2201 }
 0x82d   :  { %v3572_v62 = vpop.eup %3571  ;;  %3383 = vmatprep.subr.msk.bf16.mxu1 %vm3930_vm2, %v3381_v59  ;;  %v1661_v63 = vmul.f32 %v3570_v60, %v3564_v30 }
 0x82e   :  { %3203 = vmatmul.mubr.msk.f32.vlgmr.msra.gmra.mrb[8].mxu0 %vm299_vm3, %v1459_v61  ;;  %3386 = vmatpush3.bf16.xpose.msk.msra.mxu1 %vm3930_vm2, %v3381_v59  ;;  %v1662_v0 = vmul.f32 %v3572_v62, %v4091_v15 }
 0x82f   :  { %3370 = vmatpush3.bf16.msra.mxu0 %v3367_v58  ;;  %3216 = vmatprep.mubr.msk.f32.mxu0 %vm299_vm3, %v1661_v63 }
 0x830   :  { %3219 = vmatprep.subr.mxu0 %v3994_v37 }
 0x832   :  { %3217 = vmatmul.mubr.msk.f32.vlgmr.msra.gmra.mrb[10].mxu0 %vm299_vm3, %v1662_v0 }
 0x833   :  { %3220 = vmatpush3.msra.mxu0 %v3994_v37 }
 0x834   :  { %3224 = vmatprep.subr.mxu0 %v4001_v17 }
 0x835   :  { %3253 = vmatmul.mubr.msk.f32.vlgmr.msra.gmra.mrb[20].mxu1 %vm213_vm1, %v2202_v1 }
 0x85a   :  { %v2008_v2 = vpop.xlane.xlu0 %2007 }
 0x85b   :  { %v2012_v3 = vsub.f32 %v2004_v39, %v2008_v2 }
 0x85d   :  { %v2014_v22 = vmul.f32 1.442695, %v2012_v3  ;;  %v2011_v4 = vpop.xlane.xlu1 %2010 }
 0x85e   :  { %v2013_v8 = vsub.f32 %v2005_v40, %v2011_v4 }
 0x85f   :  { %3573 = vpow2.f32 %v2014_v22 }
 0x860   :  { %v2016_v9 = vmul.f32 1.442695, %v2013_v8 }
 0x861   :  { %v3517_v26 = vpop.permute.xlu1 %3516 }
 0x862   :  { %3575 = vpow2.f32 %v2016_v9  ;;  %v3519_v15 = vunpack.i.h.bf16 %v3517_v26  ;;  %v3518_v30 = vunpack.i.l.bf16 %v3517_v26 }
 0x864   :  { %v3377_v33 = vpack.c.bf16 %v3519_v15, %v3518_v30  ;;  %v2576_v15 = vld [vmem:[#allocation7 + $0x8] sm:$0xff] }
 0x865   :  { %v3522_v41 = vpop.permute.xlu1 %3521 }
 0x866   :  { %v3524_v35 = vunpack.i.h.bf16 %v3522_v41  ;;  %v3523_v50 = vunpack.i.l.bf16 %v3522_v41 }
 0x868   :  { %v3387_v45 = vpack.c.bf16 %v3524_v35, %v3523_v50 }
 0x869   :  { %v3574_v11 = vpop.eup %3573 }
 0x86a   :  { %v2018_v13 = vsel %vm299_vm3, %v3574_v11, 0.0 }
 0x86b   :  { %2019 = vadd.xlane.f32.xlu0 %v2018_v13  ;;  %v3605_v13 = vld [vmem:[%s4252_s0 + $0x10] sm:$0xff] }
 0x86c   :  { %v3576_v18 = vpop.eup %3575 }
 0x86d   :  { %v2021_v37 = vsel %vm299_vm3, %v3576_v18, 0.0 }
 0x86f   :  { %2022 = vadd.xlane.f32.xlu0 %v2021_v37 }
 0x897   :  { %v3190_v20 = vpop.f32.mrb[2].mxu0 }
 0x898   :  { %v2493_v21 = vadd.f32 %v3190_v20, %v4133_v19  ;;  %v1336_v12 = vpop.f32.mrb[3].mxu0 }
 0x899   :  { %v2492_v16 = vadd.f32 %v4133_v19, %v1336_v12 }
 0x89a   :  { %v4137_v23 = vadd.f32 %v2493_v21, %v3886_v7  ;;  %v3606_v21 = vld [vmem:[%s4252_s0 + $0x18] sm:$0xff] }
 0x89c   :  { %v2503_v24 = vsel %vm109_vm0, %v4137_v23, 0.0 }
 0x89d   :  { %2504 = vadd.xlane.f32.xlu1 %v2503_v24 }
 0x8f8   :  { %v2020_v25 = vpop.xlane.xlu0 %2019 }
 0x8f9   :  { %3577 = vrcp.f32 %v2020_v25 }
 0x8fc   :  { %v2023_v28 = vpop.xlane.xlu0 %2022 }
 0x8fd   :  { %3579 = vrcp.f32 %v2023_v28 }
 0x901   :  { %v3204_v27 = vpop.f32.mrb[8].mxu0 }
 0x902   :  { %v1538_v29 = vpop.f32.mrb[9].mxu0 }
 0x903   :  { %v3578_v40 = vpop.eup %3577 }
 0x904   :  { %v2026_v44 = vmul.f32 %v3578_v40, %v3574_v11 }
 0x905   :  { %v3218_v31 = vpop.f32.mrb[10].mxu0 }
 0x906   :  { %v1741_v32 = vpop.f32.mrb[11].mxu0 }
 0x907   :  { %3221 = vmatprep.mubr.msk.f32.mxu0 %vm213_vm1, %v1741_v32  ;;  %v3580_v42 = vpop.eup %3579  ;;  %v2578_v32 = vld [vmem:[#allocation7 + $0x18] sm:$0xff] }
 0x908   :  { %3222 = vmatmul.mubr.msk.f32.vlgmr.msra.gmra.mrb[12].mxu0 %vm213_vm1, %v3218_v31  ;;  %v3254_v7 = vpop.f32.mrb[20].mxu1  ;;  %v2577_v31 = vld [vmem:[#allocation7 + $0x10] sm:$0xff] }
 0x909   :  { %3225 = vmatpush3.msra.mxu0 %v4001_v17  ;;  %3226 = vmatprep.mubr.msk.f32.mxu0 %vm213_vm1, %v1538_v29  ;;  %v2281_v34 = vpop.f32.mrb[21].mxu1  ;;  %v2291_v38 = vmul.f32 0.35355338, %v3254_v7  ;;  %v2027_v17 = vmul.f32 %v3580_v42, %v3576_v18  ;;  %v2575_v29 = vld [vmem:[#allocation7] sm:$0xff] }
 0x90a   :  { %3378 = vmatprep.subr.bf16.mxu0 %v3377_v33  ;;  %v2290_v36 = vmul.f32 0.35355338, %v2281_v34  ;;  %v3391_v30 = vpack.c.bf16 %v2576_v15, %v2575_v29 }
 0x90b   :  { %v2295_v43 = vsel %vm299_vm3, %v2291_v38, -inf }
 0x90c   :  { %v2292_v39 = vsel %vm299_vm3, %v2290_v36, -inf  ;;  %3392 = vmatprep.subr.bf16.mxu1 %v3391_v30 }
 0x90d   :  { %2293 = vmax.xlane.f32.xlu0 %v2292_v39  ;;  %3394 = vmatpush3.bf16.msra.mxu1 %v3391_v30 }
 0x910   :  { %3227 = vmatmul.mubr.msk.f32.vlgmr.msra.gmra.mrb[12].mxu0 %vm213_vm1, %v3204_v27 }
 0x911   :  { %3380 = vmatpush3.bf16.msra.mxu0 %v3377_v33  ;;  %2296 = vmax.xlane.f32.xlu0 %v2295_v43  ;;  %v3395_v33 = vpack.c.bf16 %v2578_v32, %v2577_v31 }
 0x912   :  { %3240 = vmatprep.mubr.msk.f32.mxu0 %vm299_vm3, %v2026_v44  ;;  %3243 = vmatprep.subr.mxu0 %v4040_v14 }
 0x913   :  { %3396 = vmatprep.subr.bf16.mxu1 %v3395_v33 }
 0x914   :  { %3241 = vmatmul.mubr.msk.f32.vlgmr.msra.gmra.mrb[14].mxu0 %vm299_vm3, %v2027_v17  ;;  %3398 = vmatpush3.bf16.msra.mxu1 %v3395_v33 }
 0x915   :  { %3244 = vmatpush3.msra.mxu0 %v4040_v14  ;;  %v2496_v14 = vadd.f32 %v2492_v16, %v3879_v5 }
 0x916   :  { %3388 = vmatprep.subr.bf16.mxu0 %v3387_v45 }
 0x917   :  { %v2500_v56 = vsel %vm109_vm0, %v2496_v14, 0.0 }
 0x92a   :  { %v2505_v11 = vpop.xlane.xlu1 %2504 }
 0x92b   :  { %v2514_v18 = vmul.f32 0.03125, %v2505_v11 }
 0x92d   :  { %v2518_v24 = vsub.f32 %v4137_v23, %v2514_v18 }
 0x92f   :  { %v2522_v27 = vmul.f32 %v2518_v24, %v2518_v24 }
 0x931   :  { %v2528_v28 = vsel %vm109_vm0, %v2522_v27, 0.0 }
 0x99a   :  { %v2294_v46 = vpop.xlane.xlu0 %2293 }
 0x99b   :  { %v2298_v47 = vsub.f32 %v2290_v36, %v2294_v46 }
 0x99d   :  { %v2300_v48 = vmul.f32 1.442695, %v2298_v47 }
 0x99e   :  { %v2297_v49 = vpop.xlane.xlu0 %2296 }
 0x99f   :  { %3581 = vpow2.f32 %v2300_v48  ;;  %v2299_v52 = vsub.f32 %v2291_v38, %v2297_v49  ;;  %v2971_v48 = vld [vmem:[#allocation2] ss:$0 sm:$0xff] }
 0x9a1   :  { %v2302_v53 = vmul.f32 1.442695, %v2299_v52  ;;  %v2972_v52 = vld [vmem:[#allocation5] ss:$0 sm:$0xff] }
 0x9a3   :  { %3583 = vpow2.f32 %v2302_v53 }
 0x9a9   :  { %v3582_v10 = vpop.eup %3581 }
 0x9aa   :  { %v2304_v51 = vsel %vm299_vm3, %v3582_v10, 0.0 }
 0x9ab   :  { %2305 = vadd.xlane.f32.xlu0 %v2304_v51 }
 0x9ad   :  { %v3584_v54 = vpop.eup %3583 }
 0x9ae   :  { %v2307_v55 = vsel %vm299_vm3, %v3584_v54, 0.0 }
 0x9af   :  { %2308 = vadd.xlane.f32.xlu0 %v2307_v55 }
 0x9b3   :  { %2501 = vadd.xlane.f32.xlu0 %v2500_v56  ;;  %v2688_v56 = vld [vmem:[%s4261_s9 + $0x8] sm:$0xff] }
 0x9e7   :  { %v3242_v57 = vpop.f32.mrb[14].mxu0 }
 0x9e8   :  { %v2106_v58 = vpop.f32.mrb[15].mxu0 }
 0x9e9   :  { %3245 = vmatprep.mubr.msk.f32.mxu0 %vm213_vm1, %v2106_v58 }
 0x9ea   :  { %3246 = vmatmul.mubr.msk.f32.vlgmr.msra.gmra.mrb[12].mxu0 %vm213_vm1, %v3242_v57  ;;  %v2689_v57 = vld [vmem:[%s4261_s9 + $0x10] sm:$0xff] }
 0x9eb   :  { %3390 = vmatpush3.bf16.msra.mxu0 %v3387_v45 }
 0x9ec   :  { %3262 = vmatprep.subr.mxu0 %v4085_v6 }
 0xa38   :  { %v2306_v59 = vpop.xlane.xlu0 %2305 }
 0xa39   :  { %3585 = vrcp.f32 %v2306_v59  ;;  %v2690_v59 = vld [vmem:[%s4261_s9 + $0x18] sm:$0xff] }
 0xa3c   :  { %v2309_v60 = vpop.xlane.xlu0 %2308 }
 0xa3d   :  { %3587 = vrcp.f32 %v2309_v60  ;;  %v3403_v60 = vpack.c.bf16 %v2690_v59, %v2689_v57 }
 0xa40   :  { %v2502_v2 = vpop.xlane.xlu0 %2501 }
 0xa41   :  { %v2513_v4 = vmul.f32 0.03125, %v2502_v2 }
 0xa43   :  { %v3586_v61 = vpop.eup %3585  ;;  %v2517_v37 = vsub.f32 %v2496_v14, %v2513_v4  ;;  %v2687_v14 = vld [vmem:[%s4261_s9] sm:$0xff] }
 0xa44   :  { %v2312_v62 = vmul.f32 %v3586_v61, %v3582_v10  ;;  %v3399_v58 = vpack.c.bf16 %v2688_v56, %v2687_v14  ;;  %v2691_v61 = vld [vmem:[%s4261_s9 + $0x20] sm:$0xff] }
 0xa45   :  { %v2521_v25 = vmul.f32 %v2517_v37, %v2517_v37 }
 0xa46   :  { %3259 = vmatprep.mubr.msk.f32.mxu0 %vm299_vm3, %v2312_v62  ;;  %v2692_v62 = vld [vmem:[%s4261_s9 + $0x28] sm:$0xff] }
 0xa47   :  { %v3588_v5 = vpop.eup %3587  ;;  %v2525_v26 = vsel %vm109_vm0, %v2521_v25, 0.0 }
 0xa48   :  { %v2313_v63 = vmul.f32 %v3588_v5, %v3584_v54  ;;  %v3407_v5 = vpack.c.bf16 %v2692_v62, %v2691_v61 }
 0xa4a   :  { %3260 = vmatmul.mubr.msk.f32.vlgmr.msra.gmra.mrb[16].mxu0 %vm299_vm3, %v2313_v63  ;;  %v2693_v63 = vld [vmem:[%s4261_s9 + $0x30] sm:$0xff] }
 0xa4b   :  { %3263 = vmatpush3.msra.mxu0 %v4085_v6 }
 0xa4c   :  { %3400 = vmatprep.subr.bf16.mxu0 %v3399_v58 }
 0xb1d   :  { %v3261_v0 = vpop.f32.mrb[16].mxu0 }
 0xb1e   :  { %v2392_v1 = vpop.f32.mrb[17].mxu0 }
 0xb1f   :  { %3264 = vmatprep.mubr.msk.f32.mxu0 %vm213_vm1, %v2392_v1 }
 0xb20   :  { %3265 = vmatmul.mubr.msk.f32.vlgmr.msra.gmra.mrb[12].mxu0 %vm213_vm1, %v3261_v0  ;;  %v2694_v0 = vld [vmem:[%s4261_s9 + $0x38] sm:$0xff] }
 0xb21   :  { %3402 = vmatpush3.bf16.msra.mxu0 %v3399_v58  ;;  %v3411_v1 = vpack.c.bf16 %v2694_v0, %v2693_v63 }
 0xb22   :  { %3404 = vmatprep.subr.bf16.mxu0 %v3403_v60 }
 0xb25   :  { %3406 = vmatpush3.bf16.msra.mxu0 %v3403_v60 }
 0xb26   :  { %3408 = vmatprep.subr.bf16.mxu0 %v3407_v5 }
 0xb29   :  { %3410 = vmatpush3.bf16.msra.mxu0 %v3407_v5 }
 0xb2a   :  { %3412 = vmatprep.subr.bf16.mxu0 %v3411_v1 }
 0xb2d   :  { %3414 = vmatpush3.bf16.msra.mxu0 %v3411_v1 }
 0xbf3   :  { %v3266_v3 = vpop.f32.mrb[12].mxu0 }
 0xbf4   :  { %v2474_v22 = vpop.f32.mrb[13].mxu0  ;;  %v2495_v8 = vadd.f32 %v3266_v3, %v4133_v19 }
 0xbf5   :  { %v2494_v9 = vadd.f32 %v4133_v19, %v2474_v22 }
 0xbf6   :  { %v2499_v12 = vadd.f32 %v3606_v21, %v2495_v8 }
 0xbf7   :  { %v2498_v6 = vadd.f32 %v3605_v13, %v2494_v9 }
 0xbf8   :  { %v2509_v19 = vsel %vm109_vm0, %v2499_v12, 0.0 }
 0xbf9   :  { %v2506_v20 = vsel %vm109_vm0, %v2498_v6, 0.0 }
 0xbfa   :  { %2507 = vadd.xlane.f32.xlu0 %v2506_v20 }
 0xbfe   :  { %2510 = vadd.xlane.f32.xlu0 %v2509_v19 }
 0xc02   :  { %2526 = vadd.xlane.f32.xlu0 %v2525_v26 }
 0xc06   :  { %2529 = vadd.xlane.f32.xlu0 %v2528_v28 }
 0xc87   :  { %v2508_v23 = vpop.xlane.xlu0 %2507 }
 0xc88   :  { %v2515_v7 = vmul.f32 0.03125, %v2508_v23 }
 0xc8a   :  { %v2519_v34 = vsub.f32 %v2498_v6, %v2515_v7  ;;  %v2978_v7 = vld [vmem:[%s4262_s10] ss:$0 sm:$0xff] }
 0xc8b   :  { %v2511_v36 = vpop.xlane.xlu0 %2510 }
 0xc8c   :  { %v2516_v38 = vmul.f32 0.03125, %v2511_v36  ;;  %v2523_v39 = vmul.f32 %v2519_v34, %v2519_v34 }
 0xc8e   :  { %v2520_v40 = vsub.f32 %v2499_v12, %v2516_v38  ;;  %v2531_v41 = vsel %vm109_vm0, %v2523_v39, 0.0 }
 0xc8f   :  { %2532 = vadd.xlane.f32.xlu0 %v2531_v41  ;;  %v2527_v42 = vpop.xlane.xlu0 %2526 }
 0xc90   :  { %v2537_v35 = vmul.f32 0.03125, %v2527_v42  ;;  %v2524_v50 = vmul.f32 %v2520_v40, %v2520_v40 }
 0xc92   :  { %v2541_v43 = vadd.f32 1e-05, %v2537_v35  ;;  %v2534_v44 = vsel %vm109_vm0, %v2524_v50, 0.0 }
 0xc93   :  { %2535 = vadd.xlane.f32.xlu0 %v2534_v44  ;;  %v2530_v17 = vpop.xlane.xlu0 %2529 }
 0xc94   :  { %3589 = vrsqrt.f32 %v2541_v43  ;;  %v2538_v45 = vmul.f32 0.03125, %v2530_v17 }
 0xc96   :  { %v2542_v46 = vadd.f32 1e-05, %v2538_v45 }
 0xc98   :  { %3591 = vrsqrt.f32 %v2542_v46 }
 0xc9e   :  { %v3590_v47 = vpop.eup %3589 }
 0xc9f   :  { %v2549_v49 = vmul.f32 %v3590_v47, %v2517_v37 }
 0xca1   :  { %v2560_v53 = vmul.f32 %v2971_v48, %v2549_v49 }
 0xca2   :  { %v3592_v10 = vpop.eup %3591 }
 0xca3   :  { %v2550_v16 = vmul.f32 %v3592_v10, %v2518_v24  ;;  %v4180_v51 = vadd.f32 %v2972_v52, %v2560_v53  ;;  %v2973_v24 = vld [vmem:[#allocation8] ss:$0 sm:$0xff] }
 0xca5   :  { %3275 = vmatprep.mubr.msk.f32.mxu1 %vm109_vm0, %v4180_v51  ;;  %v2561_v54 = vmul.f32 %v2971_v48, %v2550_v16 }
 0xca7   :  { %v4184_v55 = vadd.f32 %v2972_v52, %v2561_v54 }
 0xca9   :  { %3276 = vmatmul.mubr.msk.f32.vlgmr.msra.gmra.mrb[22].mxu1 %vm109_vm0, %v4184_v55 }
 0xd1c   :  { %v2533_v2 = vpop.xlane.xlu0 %2532 }
 0xd1d   :  { %v2539_v3 = vmul.f32 0.03125, %v2533_v2 }
 0xd1f   :  { %v2543_v22 = vadd.f32 1e-05, %v2539_v3 }
 0xd20   :  { %v2536_v4 = vpop.xlane.xlu0 %2535 }
 0xd21   :  { %3593 = vrsqrt.f32 %v2543_v22  ;;  %v2540_v8 = vmul.f32 0.03125, %v2536_v4 }
 0xd23   :  { %v2544_v9 = vadd.f32 1e-05, %v2540_v8 }
 0xd25   :  { %3595 = vrsqrt.f32 %v2544_v9 }
 0xd2b   :  { %v3594_v11 = vpop.eup %3593 }
 0xd2c   :  { %v2551_v13 = vmul.f32 %v3594_v11, %v2519_v34 }
 0xd2e   :  { %v2562_v6 = vmul.f32 %v2971_v48, %v2551_v13  ;;  %v2983_v13 = vld [vmem:[%s4263_s11] ss:$0 sm:$0xff]  ;;  %s3742_s11 = smov [#allocation10]  }
 0xd2f   :  { %v3596_v18 = vpop.eup %3595 }
 0xd30   :  { %v2573_v37 = vadd.f32 %v2972_v52, %v2562_v6  ;;  %v2552_v20 = vmul.f32 %v3596_v18, %v2520_v40  ;;  %v2984_v18 = vld [vmem:[%s4264_s12] ss:$0 sm:$0xff]  ;;  %s2887_s12 = sshll.u32 %s3742_s11, 4  ;;  %s2888_s12 = int_to_ptr.vmem [resolvable:$true] %s2887_s12 }
 0xd31   :  { %s3695_s4 = scalar_lea.vmem %s2888_s12, 512  ;;  %p3700_p5 = scmp.lt.s32.totalorder %s2888_s12, %s2888_s12 }
 0xd32   :  { %3278 = vmatprep.mubr.msk.f32.mxu1 %vm109_vm0, %v2573_v37  ;;  %v2563_v21 = vmul.f32 %v2971_v48, %v2552_v20  ;;  %p3696_p4 = scmp.ne.s32.totalorder %s2888_s12, %s3695_s4  ;;  %p3701_p6 = scmp.lt.s32.totalorder %s3695_s4, %s3695_s4 }
 0xd34   :  { %v2574_v12 = vadd.f32 %v2972_v52, %v2563_v21  ;;  %p3702_p7 = por %p3701_p6, %p3700_p5 }
 0xd36   :  { %3279 = vmatmul.mubr.msk.f32.gmra.mrb[24].mxu1 %vm109_vm0, %v2574_v12  ;;  %p3703_p8 = pnand %p3702_p7, %p3696_p4 }
 0xd7c   :  { %v3277_v19 = vpop.f32.mrb[22].mxu1 }
 0xd7d   :  { %v2670_v25 = vadd.f32 %v3277_v19, %v2973_v24  ;;  %v2664_v26 = vpop.f32.mrb[23].mxu1 }
 0xd7e   :  { %v2665_v27 = vadd.f32 %v2973_v24, %v2664_v26 }
 0xd7f   :  { %v2684_v29 = vmax.f32 %v2670_v25, 0.0 }
 0xd80   :  { %v2683_v28 = vmax.f32 %v2665_v27, 0.0 }
 0xd82   :  { %3297 = vmatprep.mubr.msk.f32.mxu0 %vm2702_vm4, %v2683_v28 }
 0xd83   :  { %3298 = vmatmul.mubr.msk.f32.vlgmr.msra.gmra.mrb[18].mxu0 %vm2702_vm4, %v2684_v29 }
 0xe09   :  { %v3280_v15 = vpop.f32.mrb[24].mxu1 }
 0xe0a   :  { %v2680_v30 = vadd.f32 %v3280_v15, %v2973_v24  ;;  %v2674_v31 = vpop.f32.mrb[25].mxu1 }
 0xe0b   :  { %v2675_v32 = vadd.f32 %v2973_v24, %v2674_v31 }
 0xe0c   :  { %v2686_v23 = vmax.f32 %v2680_v30, 0.0 }
 0xe0d   :  { %v2685_v33 = vmax.f32 %v2675_v32, 0.0 }
 0xe0f   :  { %3300 = vmatprep.mubr.msk.f32.mxu0 %vm2702_vm4, %v2685_v33 }
 0xe10   :  { %3301 = vmatmul.mubr.msk.f32.gmra.mrb[20].mxu0 %vm2702_vm4, %v2686_v23 }
 0xe56   :  { %v3299_v34 = vpop.f32.mrb[18].mxu0 }
 0xe57   :  { %v2781_v36 = vpop.f32.mrb[19].mxu0  ;;  %v2787_v38 = vadd.f32 %v3299_v34, %v2978_v7 }
 0xe58   :  { %v2782_v39 = vadd.f32 %v2978_v7, %v2781_v36 }
 0xe59   :  { %v2801_v42 = vadd.f32 %v2787_v38, %v4184_v55 }
 0xe5a   :  { %v2800_v40 = vadd.f32 %v2782_v39, %v4180_v51 }
 0xe5b   :  { %v2807_v35 = vsel %vm109_vm0, %v2801_v42, 0.0 }
 0xe5c   :  { %v2804_v41 = vsel %vm109_vm0, %v2800_v40, 0.0 }
 0xe5d   :  { %2805 = vadd.xlane.f32.xlu0 %v2804_v41 }
 0xe61   :  { %2808 = vadd.xlane.f32.xlu0 %v2807_v35 }
 0xee3   :  { %v3302_v50 = vpop.f32.mrb[20].mxu0 }
 0xee4   :  { %v2797_v43 = vadd.f32 %v3302_v50, %v2978_v7  ;;  %v2791_v44 = vpop.f32.mrb[21].mxu0 }
 0xee5   :  { %v2792_v17 = vadd.f32 %v2978_v7, %v2791_v44 }
 0xee6   :  { %v2803_v45 = vadd.f32 %v2797_v43, %v2574_v12 }
 0xee7   :  { %v2802_v46 = vadd.f32 %v2792_v17, %v2573_v37 }
 0xee8   :  { %v2813_v47 = vsel %vm109_vm0, %v2803_v45, 0.0 }
 0xee9   :  { %2814 = vadd.xlane.f32.xlu1 %v2813_v47  ;;  %v2810_v48 = vsel %vm109_vm0, %v2802_v46, 0.0 }
 0xeea   :  { %2811 = vadd.xlane.f32.xlu0 %v2810_v48  ;;  %v2806_v49 = vpop.xlane.xlu0 %2805 }
 0xeeb   :  { %v2816_v52 = vmul.f32 0.03125, %v2806_v49 }
 0xeed   :  { %v2820_v53 = vsub.f32 %v2800_v40, %v2816_v52 }
 0xeee   :  { %v2809_v10 = vpop.xlane.xlu0 %2808 }
 0xeef   :  { %v2817_v16 = vmul.f32 0.03125, %v2809_v10  ;;  %v2824_v51 = vmul.f32 %v2820_v53, %v2820_v53 }
 0xef1   :  { %v2821_v54 = vsub.f32 %v2801_v42, %v2817_v16  ;;  %v2828_v55 = vsel %vm109_vm0, %v2824_v51, 0.0 }
 0xef2   :  { %2829 = vadd.xlane.f32.xlu0 %v2828_v55 }
 0xef3   :  { %v2825_v14 = vmul.f32 %v2821_v54, %v2821_v54 }
 0xef5   :  { %v2831_v56 = vsel %vm109_vm0, %v2825_v14, 0.0 }
 0xef6   :  { %2832 = vadd.xlane.f32.xlu1 %v2831_v56 }
 0xf76   :  { %v2815_v57 = vpop.xlane.xlu1 %2814 }
 0xf77   :  { %v2819_v58 = vmul.f32 0.03125, %v2815_v57  ;;  %v2812_v59 = vpop.xlane.xlu0 %2811 }
 0xf78   :  { %v2818_v60 = vmul.f32 0.03125, %v2812_v59 }
 0xf79   :  { %v2823_v61 = vsub.f32 %v2803_v45, %v2819_v58 }
 0xf7a   :  { %v2822_v62 = vsub.f32 %v2802_v46, %v2818_v60 }
 0xf7b   :  { %v2827_v5 = vmul.f32 %v2823_v61, %v2823_v61 }
 0xf7c   :  { %v2826_v63 = vmul.f32 %v2822_v62, %v2822_v62 }
 0xf7d   :  { %v2837_v0 = vsel %vm109_vm0, %v2827_v5, 0.0 }
 0xf7e   :  { %2838 = vadd.xlane.f32.xlu1 %v2837_v0  ;;  %v2834_v1 = vsel %vm109_vm0, %v2826_v63, 0.0 }
 0xf7f   :  { %2835 = vadd.xlane.f32.xlu0 %v2834_v1  ;;  %v2830_v2 = vpop.xlane.xlu0 %2829 }
 0xf80   :  { %v2840_v3 = vmul.f32 0.03125, %v2830_v2 }
 0xf82   :  { %v2844_v22 = vadd.f32 1e-05, %v2840_v3 }
 0xf83   :  { %v2833_v4 = vpop.xlane.xlu1 %2832 }
 0xf84   :  { %3597 = vrsqrt.f32 %v2844_v22  ;;  %v2841_v8 = vmul.f32 0.03125, %v2833_v4 }
 0xf86   :  { %v2845_v9 = vadd.f32 1e-05, %v2841_v8 }
 0xf88   :  { %3599 = vrsqrt.f32 %v2845_v9 }
 0xf8e   :  { %v3598_v11 = vpop.eup %3597 }
 0xf8f   :  { %v2852_v6 = vmul.f32 %v3598_v11, %v2820_v53 }
 0xf91   :  { %v2863_v37 = vmul.f32 %v2983_v13, %v2852_v6 }
 0xf92   :  { %v3600_v20 = vpop.eup %3599 }
 0xf93   :  { %v2853_v21 = vmul.f32 %v3600_v20, %v2821_v54  ;;  %v2874_v12 = vadd.f32 %v2984_v18, %v2863_v37 }
 0xf95   :  { %v2864_v24 = vmul.f32 %v2983_v13, %v2853_v21  ;;  %2878 = vst.msk [vmem:[#allocation10] sm:$0xff] %vm109_vm0, %v2874_v12 }
 0xf97   :  { %v2875_v19 = vadd.f32 %v2984_v18, %v2864_v24 }
 0xf99   :  { %2879 = vst.msk [vmem:[#allocation10 + $0x8] sm:$0xff] %vm109_vm0, %v2875_v19 }
0x100b   :  { %v2839_v25 = vpop.xlane.xlu1 %2838 }
0x100c   :  { %v2843_v26 = vmul.f32 0.03125, %v2839_v25  ;;  %v2836_v27 = vpop.xlane.xlu0 %2835 }
0x100d   :  { %v2842_v28 = vmul.f32 0.03125, %v2836_v27 }
0x100e   :  { %v2847_v29 = vadd.f32 1e-05, %v2843_v26 }
0x100f   :  { %v2846_v15 = vadd.f32 1e-05, %v2842_v28 }
0x1010   :  { %3601 = vrsqrt.f32 %v2847_v29 }
0x1011   :  { %3603 = vrsqrt.f32 %v2846_v15 }
0x101a   :  { %v3602_v30 = vpop.eup %3601 }
0x101b   :  { %v3604_v31 = vpop.eup %3603  ;;  %v2855_v32 = vmul.f32 %v3602_v30, %v2823_v61 }
0x101c   :  { %v2854_v33 = vmul.f32 %v3604_v31, %v2822_v62 }
0x101d   :  { %v2866_v23 = vmul.f32 %v2983_v13, %v2855_v32 }
0x101e   :  { %v2865_v7 = vmul.f32 %v2983_v13, %v2854_v33 }
0x101f   :  { %v2877_v34 = vadd.f32 %v2984_v18, %v2866_v23 }
0x1020   :  { %v2876_v36 = vadd.f32 %v2984_v18, %v2865_v7 }
0x1021   :  { %2881 = vst.msk [vmem:[#allocation10 + $0x18] sm:$0xff] %vm109_vm0, %v2877_v34 }
0x1022   :  { %2880 = vst.msk [vmem:[#allocation10 + $0x10] sm:$0xff] %vm109_vm0, %v2876_v36 }
0x1023   :  { %3706 = shalt.err (!%p3703_p8)
}
0x1024   :  { %s3707_s2 = scalar_lea.hbm %s4265_s13, 512 }
0x1025   :  { %p3708_p9 = scmp.ne.s32.totalorder %s4265_s13, %s3707_s2  ;;  %p3711_p10 = scmp.lt.u32.totalorder %s3707_s2, %s4265_s13 }
0x1027   :  { %p3713_p11 = pnand %p3711_p10, %p3708_p9 }
0x1029   :  { %3716 = shalt.err (!%p3713_p11)
}
0x102a   :  { %2893 = dma.vmem_to_hbm [thread:$0]  %s2888_s12, 512, %s4265_s13, [#allocation4], %s3728_s5, %s3728_s5, %s3729_s28  }
0x102b   :  { %3723 = dma.done.wait [#allocation4], 512  }
0x102c   :  { %3724 = vsyncadd [#allocation4], 4294966784 }
0x102d   :  { %2897 = vsyncpa [#allocation3], 1 }
0x102e   :  { %2898 = vsyncpa [#allocation6], 1 }
0x102f   :  { %2899 = vsyncpa [#allocation9], 1 }
0x1030   :  { %2900 = vsyncpa [#allocation4], 1 }

</bundles_post_ra>
